<compile_context>
chip_gen: v7x
topology: tpu7x:2x2x1
jax: 0.10.0
libtpu: 0.0.40
codegen_flags: <defaults>
</compile_context>

<pallas_src>
import math
from functools import partial

import jax
import jax.numpy as jnp
from jax.experimental import pallas as pl
from jax.experimental.pallas import tpu as pltpu

_INV_SQRT2 = 1.0 / math.sqrt(2.0)


# ----------------------------------------------------------------------------
# in-kernel helpers (traced inside the Pallas body, all math in f32)
# ----------------------------------------------------------------------------
def _layernorm(x, g, b, eps):
    # torch LayerNorm semantics: biased variance, eps inside rsqrt.
    mu = jnp.mean(x, axis=-1, keepdims=True)
    var = jnp.mean((x - mu) ** 2, axis=-1, keepdims=True)
    return (x - mu) * jax.lax.rsqrt(var + eps) * g + b


def _gelu_exact(x):
    # exact (erf-based) GELU, matching torch.nn.GELU default
    return 0.5 * x * (1.0 + jax.lax.erf(x * _INV_SQRT2))


# ----------------------------------------------------------------------------
# Fused ViT kernel.  grid = (batch_block, layer); the output block (index
# constant over the layer axis) carries the residual stream in VMEM.
# Layer 0 additionally runs the patch-embedding prologue.
# ----------------------------------------------------------------------------
def _vit_kernel(p_ref, cw_ref, cb_ref, cls_ref, pos_ref,
                qkvw_ref, qkvb_ref, outw_ref, outb_ref,
                fc1w_ref, fc1b_ref, fc2w_ref, fc2b_ref,
                ln1g_ref, ln1b_ref, ln2g_ref, ln2b_ref,
                lnfg_ref, lnfb_ref, o_ref, *, bt, seq, heads, scale, eps):
    layer = pl.program_id(1)
    D = o_ref.shape[-1]
    dh = D // heads

    # ---- layer-0 prologue: conv_proj (as matmul) + cls token + pos embedding
    @pl.when(layer == 0)
    def _embed():
        cls_row = (cls_ref[...] + pos_ref[0, 0:1, :]).astype(o_ref.dtype)   # (1, D)
        for b in range(bt):                                                 # static
            tok = jnp.dot(p_ref[b], cw_ref[...],
                          preferred_element_type=jnp.float32) + cb_ref[...]  # (n, D)
            o_ref[b, 0:1, :] = cls_row
            o_ref[b, 1:seq, :] = (tok + pos_ref[0, 1:seq, :]).astype(o_ref.dtype)

    # residual stream, flattened to (bt*S, D) so every big matmul sees M = bt*S
    h = o_ref[...].reshape(bt * seq, D).astype(jnp.float32)

    # ---- self-attention block (LN1 fused, residual + out-proj fused) ----
    xn = _layernorm(h, ln1g_ref[0], ln1b_ref[0], eps)
    qkv = jnp.dot(xn.astype(jnp.bfloat16), qkvw_ref[0],
                  preferred_element_type=jnp.float32) + qkvb_ref[0]          # (bt*S, 3D)
    q = (qkv[:, 0:D] * scale).astype(jnp.bfloat16)   # fold 1/sqrt(dh) into Q
    k = qkv[:, D:2 * D].astype(jnp.bfloat16)
    v = qkv[:, 2 * D:3 * D].astype(jnp.bfloat16)

    img_out = []
    for b in range(bt):                      # static: images don't attend across
        rows = slice(b * seq, (b + 1) * seq)
        head_out = []
        for hh in range(heads):              # static head unroll
            cols = slice(hh * dh, (hh + 1) * dh)
            qh, kh, vh = q[rows, cols], k[rows, cols], v[rows, cols]
            s = jax.lax.dot_general(qh, kh, (((1,), (1,)), ((), ())),
                                    preferred_element_type=jnp.float32)      # (S, S)
            s = s - jnp.max(s, axis=-1, keepdims=True)
            p = jnp.exp(s)
            # approx reciprocal (EUP): ~1e-3 rel-err vs exact divide.
            p = p * pl.reciprocal(jnp.sum(p, axis=-1, keepdims=True), approx=True)
            head_out.append(jnp.dot(p.astype(jnp.bfloat16), vh,
                                    preferred_element_type=jnp.float32))     # (S, dh)
        img_out.append(jnp.concatenate(head_out, axis=-1))                   # (S, D)
    ao = jnp.concatenate(img_out, axis=0).astype(jnp.bfloat16)               # (bt*S, D)
    # single K=D out-projection instead of `heads` K=dh matmuls
    h = h + jnp.dot(ao, outw_ref[0],
                    preferred_element_type=jnp.float32) + outb_ref[0]

    # ---- MLP block (LN2 fused, residual fused) ----
    xn2 = _layernorm(h, ln2g_ref[0], ln2b_ref[0], eps)
    z = jnp.dot(xn2.astype(jnp.bfloat16), fc1w_ref[0],
                preferred_element_type=jnp.float32) + fc1b_ref[0]            # (bt*S, MLP)
    z = _gelu_exact(z)
    z = jnp.dot(z.astype(jnp.bfloat16), fc2w_ref[0],
                preferred_element_type=jnp.float32) + fc2b_ref[0]            # (bt*S, D)
    h = h + z

    last = pl.num_programs(1) - 1

    @pl.when(layer < last)
    def _carry():                            # carry residual stream to next layer
        o_ref[...] = h.reshape(bt, seq, D).astype(o_ref.dtype)

    @pl.when(layer == last)
    def _finalize():                         # final encoder LayerNorm, single store
        o_ref[...] = _layernorm(h, lnfg_ref[...], lnfb_ref[...], eps).reshape(
            bt, seq, D).astype(o_ref.dtype)


# ----------------------------------------------------------------------------
# Parameter init (deterministic, synthetic weights — no checkpoint loading).
# Per-layer weights are stacked along a leading layer axis; MXU weights are
# pre-cast to bf16 HERE (once, outside jit) per the perf review.
# ----------------------------------------------------------------------------
def init_params(key, *, in_ch, patch, hidden, heads, mlp_dim, layers, seq, classes):
    def w(k, shape, dtype=jnp.float32):
        return (jax.random.normal(k, shape, jnp.float32) * 0.02).astype(dtype)

    ks = jax.random.split(key, 8)
    bf = jnp.bfloat16
    return {
        "conv_w": w(ks[0], (in_ch * patch * patch, hidden), bf),  # conv_proj flattened
        "conv_b": jnp.zeros((1, hidden), jnp.float32),
        "cls_token": w(ks[1], (1, hidden)),
        "pos_emb": w(ks[2], (1, seq, hidden)),
        "qkv_w": w(ks[3], (layers, hidden, 3 * hidden), bf),
        "qkv_b": jnp.zeros((layers, 1, 3 * hidden), jnp.float32),
        "out_w": w(ks[4], (layers, hidden, hidden), bf),
        "out_b": jnp.zeros((layers, 1, hidden), jnp.float32),
        "fc1_w": w(ks[5], (layers, hidden, mlp_dim), bf),
        "fc1_b": jnp.zeros((layers, 1, mlp_dim), jnp.float32),
        "fc2_w": w(ks[6], (layers, mlp_dim, hidden), bf),
        "fc2_b": jnp.zeros((layers, 1, hidden), jnp.float32),
        "ln1_g": jnp.ones((layers, 1, hidden), jnp.float32),
        "ln1_b": jnp.zeros((layers, 1, hidden), jnp.float32),
        "ln2_g": jnp.ones((layers, 1, hidden), jnp.float32),
        "ln2_b": jnp.zeros((layers, 1, hidden), jnp.float32),
        "lnf_g": jnp.ones((1, hidden), jnp.float32),
        "lnf_b": jnp.zeros((1, hidden), jnp.float32),
        "head_w": w(ks[7], (hidden, classes)),
        "head_b": jnp.zeros((classes,), jnp.float32),
    }


# ----------------------------------------------------------------------------
# Forward pass (mirrors torchvision VisionTransformer.forward, eval mode:
# dropout == identity)
# ----------------------------------------------------------------------------
def vit_forward(params, x, *, patch, heads):
    B, C, H, W = x.shape
    ph, pw = H // patch, W // patch
    n = ph * pw
    S = n + 1
    hidden = params["conv_w"].shape[1]
    mlp_dim = params["fc1_w"].shape[2]
    layers = params["qkv_w"].shape[0]
    dh = hidden // heads
    scale = 1.0 / math.sqrt(dh)
    cpp = C * patch * patch

    # patch flatten (layout glue, done once) + bf16 pre-cast (halves patch DMA)
    patches = x.reshape(B, C, ph, patch, pw, patch)
    patches = patches.transpose(0, 2, 4, 1, 3, 5).reshape(B, n, cpp)
    patches = patches.astype(jnp.bfloat16)

    # Batch blocking: fuse images into each grid step (bigger MXU M, weights
    # streamed once per layer).  Keep 2 batch blocks when B >= 4 so both v7x
    # TensorCores stay busy; for small B, the whole batch goes in one block.
    nb = 2 if (B >= 4 and B % 2 == 0) else 1
    bt = B // nb

    def lw(shape):     # per-layer stacked weights, selected by the layer axis
        return pl.BlockSpec(shape, lambda i, l: (l, 0, 0))

    def const2(shape):
        return pl.BlockSpec(shape, lambda i, l: (0, 0))

    def const3(shape):
        return pl.BlockSpec(shape, lambda i, l: (0, 0, 0))

    h = pl.pallas_call(
        partial(_vit_kernel, bt=bt, seq=S, heads=heads, scale=scale, eps=1e-6),
        out_shape=jax.ShapeDtypeStruct((B, S, hidden), jnp.float32),
        grid=(nb, layers),
        in_specs=[
            pl.BlockSpec((bt, n, cpp), lambda i, l: (i, 0, 0)),     # patches (bf16)
            const2((cpp, hidden)),                                  # conv_w
            const2((1, hidden)),                                    # conv_b
            const2((1, hidden)),                                    # cls_token
            const3((1, S, hidden)),                                 # pos_emb
            lw((1, hidden, 3 * hidden)),                            # qkv_w
            lw((1, 1, 3 * hidden)),                                 # qkv_b
            lw((1, hidden, hidden)),                                # out_w
            lw((1, 1, hidden)),                                     # out_b
            lw((1, hidden, mlp_dim)),                               # fc1_w
            lw((1, 1, mlp_dim)),                                    # fc1_b
            lw((1, mlp_dim, hidden)),                               # fc2_w
            lw((1, 1, hidden)),                                     # fc2_b
            lw((1, 1, hidden)),                                     # ln1_g
            lw((1, 1, hidden)),                                     # ln1_b
            lw((1, 1, hidden)),                                     # ln2_g
            lw((1, 1, hidden)),                                     # ln2_b
            const2((1, hidden)),                                    # lnf_g
            const2((1, hidden)),                                    # lnf_b
        ],
        out_specs=pl.BlockSpec((bt, S, hidden), lambda i, l: (i, 0, 0)),
        compiler_params=pltpu.CompilerParams(
            dimension_semantics=("parallel", "arbitrary")),
    )(patches, params["conv_w"], params["conv_b"], params["cls_token"],
      params["pos_emb"], params["qkv_w"], params["qkv_b"], params["out_w"],
      params["out_b"], params["fc1_w"], params["fc1_b"], params["fc2_w"],
      params["fc2_b"], params["ln1_g"], params["ln1_b"], params["ln2_g"],
      params["ln2_b"], params["lnf_g"], params["lnf_b"])

    # classification head (B, 128) @ (128, 3): kept in plain JAX — a 3-lane-wide
    # Pallas output would force masked partial stores for ~768 FLOPs.
    cls_out = h[:, 0]                                       # class token
    return cls_out @ params["head_w"] + params["head_b"]


# ----------------------------------------------------------------------------
if __name__ == "__main__":
    # Small-scale ViT config (structure of vit_b_32 at reduced width/depth):
    # patch 32, 64x64 RGB input -> 4 patches + cls = 5 tokens,
    # hidden 128, 4 heads, MLP 256, 2 encoder layers, 3 classes.
    B, C, IMG = 2, 3, 64
    PATCH, HIDDEN, HEADS, MLP, LAYERS, CLASSES = 32, 128, 4, 256, 2, 3
    SEQ = (IMG // PATCH) ** 2 + 1

    key = jax.random.PRNGKey(0)
    kx, kp = jax.random.split(key)
    x = jax.random.normal(kx, (B, C, IMG, IMG), jnp.float32)
    params = init_params(kp, in_ch=C, patch=PATCH, hidden=HIDDEN, heads=HEADS,
                         mlp_dim=MLP, layers=LAYERS, seq=SEQ, classes=CLASSES)

    fwd = jax.jit(partial(vit_forward, patch=PATCH, heads=HEADS))
    logits = jax.block_until_ready(fwd(params, x))
    assert logits.shape == (B, CLASSES)
    print("KERNEL_OK")
</pallas_src>

<mosaic_0001>
module attributes {stable_mosaic.version = 11 : i64} {
  func.func @_vit_kernel(%arg0: i32, %arg1: i32, %arg2: memref<2x4x3072xbf16, #tpu.memory_space<vmem>>, %arg3: memref<3072x128xbf16, #tpu.memory_space<vmem>>, %arg4: memref<1x128xf32, #tpu.memory_space<vmem>>, %arg5: memref<1x128xf32, #tpu.memory_space<vmem>>, %arg6: memref<1x5x128xf32, #tpu.memory_space<vmem>>, %arg7: memref<1x128x384xbf16, #tpu.memory_space<vmem>>, %arg8: memref<1x1x384xf32, #tpu.memory_space<vmem>>, %arg9: memref<1x128x128xbf16, #tpu.memory_space<vmem>>, %arg10: memref<1x1x128xf32, #tpu.memory_space<vmem>>, %arg11: memref<1x128x256xbf16, #tpu.memory_space<vmem>>, %arg12: memref<1x1x256xf32, #tpu.memory_space<vmem>>, %arg13: memref<1x256x128xbf16, #tpu.memory_space<vmem>>, %arg14: memref<1x1x128xf32, #tpu.memory_space<vmem>>, %arg15: memref<1x1x128xf32, #tpu.memory_space<vmem>>, %arg16: memref<1x1x128xf32, #tpu.memory_space<vmem>>, %arg17: memref<1x1x128xf32, #tpu.memory_space<vmem>>, %arg18: memref<1x1x128xf32, #tpu.memory_space<vmem>>, %arg19: memref<1x128xf32, #tpu.memory_space<vmem>>, %arg20: memref<1x128xf32, #tpu.memory_space<vmem>>, %arg21: memref<2x5x128xf32, #tpu.memory_space<vmem>>) attributes {dimension_semantics = [#tpu.dimension_semantics<parallel>, #tpu.dimension_semantics<arbitrary>], iteration_bounds = array<i64: 1, 2>, scalar_prefetch = 0 : i64, scratch_operands = 0 : i64, tpu.core_type = #tpu.core_type<tc>, window_params = [{transform_indices = @transform_0, window_bounds = array<i64: 2, 4, 3072>}, {pipeline_mode = #tpu.pipeline_mode<synchronous>, transform_indices = @transform_1, window_bounds = array<i64: 3072, 128>}, {pipeline_mode = #tpu.pipeline_mode<synchronous>, transform_indices = @transform_2, window_bounds = array<i64: 1, 128>}, {pipeline_mode = #tpu.pipeline_mode<synchronous>, transform_indices = @transform_3, window_bounds = array<i64: 1, 128>}, {pipeline_mode = #tpu.pipeline_mode<synchronous>, transform_indices = @transform_4, window_bounds = array<i64: 1, 5, 128>}, {transform_indices = @transform_5, window_bounds = array<i64: 1, 128, 384>}, {transform_indices = @transform_6, window_bounds = array<i64: 1, 1, 384>}, {transform_indices = @transform_7, window_bounds = array<i64: 1, 128, 128>}, {transform_indices = @transform_8, window_bounds = array<i64: 1, 1, 128>}, {transform_indices = @transform_9, window_bounds = array<i64: 1, 128, 256>}, {transform_indices = @transform_10, window_bounds = array<i64: 1, 1, 256>}, {transform_indices = @transform_11, window_bounds = array<i64: 1, 256, 128>}, {transform_indices = @transform_12, window_bounds = array<i64: 1, 1, 128>}, {transform_indices = @transform_13, window_bounds = array<i64: 1, 1, 128>}, {transform_indices = @transform_14, window_bounds = array<i64: 1, 1, 128>}, {transform_indices = @transform_15, window_bounds = array<i64: 1, 1, 128>}, {transform_indices = @transform_16, window_bounds = array<i64: 1, 1, 128>}, {pipeline_mode = #tpu.pipeline_mode<synchronous>, transform_indices = @transform_17, window_bounds = array<i64: 1, 128>}, {pipeline_mode = #tpu.pipeline_mode<synchronous>, transform_indices = @transform_18, window_bounds = array<i64: 1, 128>}, {transform_indices = @transform_19, window_bounds = array<i64: 2, 5, 128>}]} {
    %c0_i32 = arith.constant 0 : i32
    %0 = arith.cmpi eq, %arg1, %c0_i32 : i32
    %1 = arith.extui %0 : i1 to i32
    %c0_i32_0 = arith.constant 0 : i32
    %2 = arith.cmpi ne, %1, %c0_i32_0 : i32
    scf.if %2 {
      %c0_91 = arith.constant 0 : index
      %c0_92 = arith.constant 0 : index
      %244 = vector.load %arg5[%c0_91, %c0_92] : memref<1x128xf32, #tpu.memory_space<vmem>>, vector<1x128xf32>
      %c0_93 = arith.constant 0 : index
      %c0_94 = arith.constant 0 : index
      %c0_95 = arith.constant 0 : index
      %245 = vector.load %arg6[%c0_93, %c0_94, %c0_95] : memref<1x5x128xf32, #tpu.memory_space<vmem>>, vector<1x1x128xf32>
      %246 = vector.shape_cast %245 : vector<1x1x128xf32> to vector<1x128xf32>
      %247 = arith.addf %244, %246 : vector<1x128xf32>
      %c0_96 = arith.constant 0 : index
      %c0_97 = arith.constant 0 : index
      %c0_98 = arith.constant 0 : index
      %248 = vector.load %arg2[%c0_96, %c0_97, %c0_98] : memref<2x4x3072xbf16, #tpu.memory_space<vmem>>, vector<1x4x3072xbf16>
      %249 = vector.shape_cast %248 : vector<1x4x3072xbf16> to vector<4x3072xbf16>
      %c0_99 = arith.constant 0 : index
      %c0_100 = arith.constant 0 : index
      %250 = vector.load %arg3[%c0_99, %c0_100] : memref<3072x128xbf16, #tpu.memory_space<vmem>>, vector<3072x128xbf16>
      %cst_101 = arith.constant dense<0.000000e+00> : vector<4x128xf32>
      %251 = tpu.matmul %249, %250, %cst_101 {dimension_numbers = #tpu.dot_dimension_numbers<[1], [0], [0], [1], [0, 0, 1, 1], [], []>} : vector<4x3072xbf16>, vector<3072x128xbf16>, vector<4x128xf32> -> vector<4x128xf32>
      %c0_102 = arith.constant 0 : index
      %c0_103 = arith.constant 0 : index
      %252 = vector.load %arg4[%c0_102, %c0_103] : memref<1x128xf32, #tpu.memory_space<vmem>>, vector<1x128xf32>
      %253 = vector.broadcast %252 : vector<1x128xf32> to vector<4x128xf32>
      %254 = arith.addf %251, %253 : vector<4x128xf32>
      %c0_104 = arith.constant 0 : index
      %c0_105 = arith.constant 0 : index
      %c0_106 = arith.constant 0 : index
      %255 = vector.load %arg21[%c0_104, %c0_105, %c0_106] : memref<2x5x128xf32, #tpu.memory_space<vmem>>, vector<1x1x128xf32>
      %256 = vector.shape_cast %255 : vector<1x1x128xf32> to vector<1x128xf32>
      %257 = vector.shape_cast %247 : vector<1x128xf32> to vector<1x1x128xf32>
      tpu.vector_store %arg21[%c0_104, %c0_105, %c0_106], %257 {strides = array<i32>} : memref<2x5x128xf32, #tpu.memory_space<vmem>>, vector<1x1x128xf32>,
      %c0_107 = arith.constant 0 : index
      %c1 = arith.constant 1 : index
      %c0_108 = arith.constant 0 : index
      %258 = vector.load %arg6[%c0_107, %c1, %c0_108] : memref<1x5x128xf32, #tpu.memory_space<vmem>>, vector<1x4x128xf32>
      %259 = vector.shape_cast %258 : vector<1x4x128xf32> to vector<4x128xf32>
      %260 = arith.addf %254, %259 : vector<4x128xf32>
      %c0_109 = arith.constant 0 : index
      %c1_110 = arith.constant 1 : index
      %c0_111 = arith.constant 0 : index
      %261 = vector.load %arg21[%c0_109, %c1_110, %c0_111] : memref<2x5x128xf32, #tpu.memory_space<vmem>>, vector<1x4x128xf32>
      %262 = vector.shape_cast %261 : vector<1x4x128xf32> to vector<4x128xf32>
      %263 = vector.shape_cast %260 : vector<4x128xf32> to vector<1x4x128xf32>
      tpu.vector_store %arg21[%c0_109, %c1_110, %c0_111], %263 {strides = array<i32>} : memref<2x5x128xf32, #tpu.memory_space<vmem>>, vector<1x4x128xf32>,
      %c1_112 = arith.constant 1 : index
      %c0_113 = arith.constant 0 : index
      %c0_114 = arith.constant 0 : index
      %264 = vector.load %arg2[%c1_112, %c0_113, %c0_114] : memref<2x4x3072xbf16, #tpu.memory_space<vmem>>, vector<1x4x3072xbf16>
      %265 = vector.shape_cast %264 : vector<1x4x3072xbf16> to vector<4x3072xbf16>
      %c0_115 = arith.constant 0 : index
      %c0_116 = arith.constant 0 : index
      %266 = vector.load %arg3[%c0_115, %c0_116] : memref<3072x128xbf16, #tpu.memory_space<vmem>>, vector<3072x128xbf16>
      %cst_117 = arith.constant dense<0.000000e+00> : vector<4x128xf32>
      %267 = tpu.matmul %265, %266, %cst_117 {dimension_numbers = #tpu.dot_dimension_numbers<[1], [0], [0], [1], [0, 0, 1, 1], [], []>} : vector<4x3072xbf16>, vector<3072x128xbf16>, vector<4x128xf32> -> vector<4x128xf32>
      %c0_118 = arith.constant 0 : index
      %c0_119 = arith.constant 0 : index
      %268 = vector.load %arg4[%c0_118, %c0_119] : memref<1x128xf32, #tpu.memory_space<vmem>>, vector<1x128xf32>
      %269 = vector.broadcast %268 : vector<1x128xf32> to vector<4x128xf32>
      %270 = arith.addf %267, %269 : vector<4x128xf32>
      %c1_120 = arith.constant 1 : index
      %c0_121 = arith.constant 0 : index
      %c0_122 = arith.constant 0 : index
      %271 = vector.load %arg21[%c1_120, %c0_121, %c0_122] : memref<2x5x128xf32, #tpu.memory_space<vmem>>, vector<1x1x128xf32>
      %272 = vector.shape_cast %271 : vector<1x1x128xf32> to vector<1x128xf32>
      %273 = vector.shape_cast %247 : vector<1x128xf32> to vector<1x1x128xf32>
      tpu.vector_store %arg21[%c1_120, %c0_121, %c0_122], %273 {strides = array<i32>} : memref<2x5x128xf32, #tpu.memory_space<vmem>>, vector<1x1x128xf32>,
      %c0_123 = arith.constant 0 : index
      %c1_124 = arith.constant 1 : index
      %c0_125 = arith.constant 0 : index
      %274 = vector.load %arg6[%c0_123, %c1_124, %c0_125] : memref<1x5x128xf32, #tpu.memory_space<vmem>>, vector<1x4x128xf32>
      %275 = vector.shape_cast %274 : vector<1x4x128xf32> to vector<4x128xf32>
      %276 = arith.addf %270, %275 : vector<4x128xf32>
      %c1_126 = arith.constant 1 : index
      %c1_127 = arith.constant 1 : index
      %c0_128 = arith.constant 0 : index
      %277 = vector.load %arg21[%c1_126, %c1_127, %c0_128] : memref<2x5x128xf32, #tpu.memory_space<vmem>>, vector<1x4x128xf32>
      %278 = vector.shape_cast %277 : vector<1x4x128xf32> to vector<4x128xf32>
      %279 = vector.shape_cast %276 : vector<4x128xf32> to vector<1x4x128xf32>
      tpu.vector_store %arg21[%c1_126, %c1_127, %c0_128], %279 {strides = array<i32>} : memref<2x5x128xf32, #tpu.memory_space<vmem>>, vector<1x4x128xf32>,
    } else {
    }
    %c0 = arith.constant 0 : index
    %c0_1 = arith.constant 0 : index
    %c0_2 = arith.constant 0 : index
    %3 = vector.load %arg21[%c0, %c0_1, %c0_2] : memref<2x5x128xf32, #tpu.memory_space<vmem>>, vector<2x5x128xf32>
    %4 = vector.shape_cast %3 : vector<2x5x128xf32> to vector<10x128xf32>
    %c0_3 = arith.constant 0 : index
    %c0_4 = arith.constant 0 : index
    %c0_5 = arith.constant 0 : index
    %5 = vector.load %arg15[%c0_3, %c0_4, %c0_5] : memref<1x1x128xf32, #tpu.memory_space<vmem>>, vector<1x1x128xf32>
    %6 = vector.shape_cast %5 : vector<1x1x128xf32> to vector<1x128xf32>
    %c0_6 = arith.constant 0 : index
    %c0_7 = arith.constant 0 : index
    %c0_8 = arith.constant 0 : index
    %7 = vector.load %arg16[%c0_6, %c0_7, %c0_8] : memref<1x1x128xf32, #tpu.memory_space<vmem>>, vector<1x1x128xf32>
    %8 = vector.shape_cast %7 : vector<1x1x128xf32> to vector<1x128xf32>
    %cst = arith.constant dense<0.000000e+00> : vector<10xf32>
    %9 = vector.multi_reduction <add>, %4, %cst [1] : vector<10x128xf32> to vector<10xf32>
    %10 = vector.shape_cast %9 : vector<10xf32> to vector<10x1xf32>
    %cst_9 = arith.constant 1.280000e+02 : f32
    %11 = vector.broadcast %cst_9 : f32 to vector<10x1xf32>
    %12 = arith.divf %10, %11 : vector<10x1xf32>
    %13 = vector.broadcast %12 : vector<10x1xf32> to vector<10x128xf32>
    %14 = arith.subf %4, %13 : vector<10x128xf32>
    %15 = arith.mulf %14, %14 : vector<10x128xf32>
    %cst_10 = arith.constant dense<0.000000e+00> : vector<10xf32>
    %16 = vector.multi_reduction <add>, %15, %cst_10 [1] : vector<10x128xf32> to vector<10xf32>
    %17 = vector.shape_cast %16 : vector<10xf32> to vector<10x1xf32>
    %cst_11 = arith.constant 1.280000e+02 : f32
    %18 = vector.broadcast %cst_11 : f32 to vector<10x1xf32>
    %19 = arith.divf %17, %18 : vector<10x1xf32>
    %20 = vector.broadcast %12 : vector<10x1xf32> to vector<10x128xf32>
    %21 = arith.subf %4, %20 : vector<10x128xf32>
    %cst_12 = arith.constant 9.99999997E-7 : f32
    %22 = vector.broadcast %cst_12 : f32 to vector<10x1xf32>
    %23 = arith.addf %19, %22 : vector<10x1xf32>
    %24 = math.rsqrt %23 : vector<10x1xf32>
    %25 = vector.broadcast %24 : vector<10x1xf32> to vector<10x128xf32>
    %26 = arith.mulf %21, %25 : vector<10x128xf32>
    %27 = vector.broadcast %6 : vector<1x128xf32> to vector<10x128xf32>
    %28 = arith.mulf %26, %27 : vector<10x128xf32>
    %29 = vector.broadcast %8 : vector<1x128xf32> to vector<10x128xf32>
    %30 = arith.addf %28, %29 : vector<10x128xf32>
    %31 = arith.truncf %30 : vector<10x128xf32> to vector<10x128xbf16>
    %c0_13 = arith.constant 0 : index
    %c0_14 = arith.constant 0 : index
    %c0_15 = arith.constant 0 : index
    %32 = vector.load %arg7[%c0_13, %c0_14, %c0_15] : memref<1x128x384xbf16, #tpu.memory_space<vmem>>, vector<1x128x384xbf16>
    %33 = vector.shape_cast %32 : vector<1x128x384xbf16> to vector<128x384xbf16>
    %cst_16 = arith.constant dense<0.000000e+00> : vector<10x384xf32>
    %34 = tpu.matmul %31, %33, %cst_16 {dimension_numbers = #tpu.dot_dimension_numbers<[1], [0], [0], [1], [0, 0, 1, 1], [], []>} : vector<10x128xbf16>, vector<128x384xbf16>, vector<10x384xf32> -> vector<10x384xf32>
    %c0_17 = arith.constant 0 : index
    %c0_18 = arith.constant 0 : index
    %c0_19 = arith.constant 0 : index
    %35 = vector.load %arg8[%c0_17, %c0_18, %c0_19] : memref<1x1x384xf32, #tpu.memory_space<vmem>>, vector<1x1x384xf32>
    %36 = vector.shape_cast %35 : vector<1x1x384xf32> to vector<1x384xf32>
    %37 = vector.broadcast %36 : vector<1x384xf32> to vector<10x384xf32>
    %38 = arith.addf %34, %37 : vector<10x384xf32>
    %39 = vector.extract_strided_slice %38 {offsets = [0, 0], sizes = [10, 128], strides = [1, 1]} : vector<10x384xf32> to vector<10x128xf32>
    %cst_20 = arith.constant 0.176776692 : f32
    %40 = vector.broadcast %cst_20 : f32 to vector<10x128xf32>
    %41 = arith.mulf %39, %40 : vector<10x128xf32>
    %42 = arith.truncf %41 : vector<10x128xf32> to vector<10x128xbf16>
    %43 = vector.extract_strided_slice %38 {offsets = [0, 128], sizes = [10, 128], strides = [1, 1]} : vector<10x384xf32> to vector<10x128xf32>
    %44 = arith.truncf %43 : vector<10x128xf32> to vector<10x128xbf16>
    %45 = vector.extract_strided_slice %38 {offsets = [0, 256], sizes = [10, 128], strides = [1, 1]} : vector<10x384xf32> to vector<10x128xf32>
    %46 = arith.truncf %45 : vector<10x128xf32> to vector<10x128xbf16>
    %47 = vector.extract_strided_slice %42 {offsets = [0, 0], sizes = [5, 32], strides = [1, 1]} : vector<10x128xbf16> to vector<5x32xbf16>
    %48 = vector.extract_strided_slice %44 {offsets = [0, 0], sizes = [5, 32], strides = [1, 1]} : vector<10x128xbf16> to vector<5x32xbf16>
    %49 = vector.extract_strided_slice %46 {offsets = [0, 0], sizes = [5, 32], strides = [1, 1]} : vector<10x128xbf16> to vector<5x32xbf16>
    %cst_21 = arith.constant dense<0.000000e+00> : vector<5x5xf32>
    %50 = tpu.matmul %47, %48, %cst_21 {dimension_numbers = #tpu.dot_dimension_numbers<[1], [1], [0], [0], [0, 0, 1, 0], [], []>} : vector<5x32xbf16>, vector<5x32xbf16>, vector<5x5xf32> -> vector<5x5xf32>
    %cst_22 = arith.constant dense<0xFF800000> : vector<5xf32>
    %51 = vector.multi_reduction <maximumf>, %50, %cst_22 [1] : vector<5x5xf32> to vector<5xf32>
    %52 = vector.shape_cast %51 : vector<5xf32> to vector<5x1xf32>
    %53 = vector.broadcast %52 : vector<5x1xf32> to vector<5x5xf32>
    %54 = arith.subf %50, %53 : vector<5x5xf32>
    %55 = math.exp %54 : vector<5x5xf32>
    %cst_23 = arith.constant dense<0.000000e+00> : vector<5xf32>
    %56 = vector.multi_reduction <add>, %55, %cst_23 [1] : vector<5x5xf32> to vector<5xf32>
    %57 = vector.shape_cast %56 : vector<5xf32> to vector<5x1xf32>
    %58 = tpu.reciprocal %57 {approx = true} : vector<5x1xf32> -> vector<5x1xf32>
    %59 = vector.broadcast %58 : vector<5x1xf32> to vector<5x5xf32>
    %60 = arith.mulf %55, %59 : vector<5x5xf32>
    %61 = arith.truncf %60 : vector<5x5xf32> to vector<5x5xbf16>
    %cst_24 = arith.constant dense<0.000000e+00> : vector<5x32xf32>
    %62 = tpu.matmul %61, %49, %cst_24 {dimension_numbers = #tpu.dot_dimension_numbers<[1], [0], [0], [1], [0, 0, 1, 1], [], []>} : vector<5x5xbf16>, vector<5x32xbf16>, vector<5x32xf32> -> vector<5x32xf32>
    %63 = vector.extract_strided_slice %42 {offsets = [0, 32], sizes = [5, 32], strides = [1, 1]} : vector<10x128xbf16> to vector<5x32xbf16>
    %64 = vector.extract_strided_slice %44 {offsets = [0, 32], sizes = [5, 32], strides = [1, 1]} : vector<10x128xbf16> to vector<5x32xbf16>
    %65 = vector.extract_strided_slice %46 {offsets = [0, 32], sizes = [5, 32], strides = [1, 1]} : vector<10x128xbf16> to vector<5x32xbf16>
    %cst_25 = arith.constant dense<0.000000e+00> : vector<5x5xf32>
    %66 = tpu.matmul %63, %64, %cst_25 {dimension_numbers = #tpu.dot_dimension_numbers<[1], [1], [0], [0], [0, 0, 1, 0], [], []>} : vector<5x32xbf16>, vector<5x32xbf16>, vector<5x5xf32> -> vector<5x5xf32>
    %cst_26 = arith.constant dense<0xFF800000> : vector<5xf32>
    %67 = vector.multi_reduction <maximumf>, %66, %cst_26 [1] : vector<5x5xf32> to vector<5xf32>
    %68 = vector.shape_cast %67 : vector<5xf32> to vector<5x1xf32>
    %69 = vector.broadcast %68 : vector<5x1xf32> to vector<5x5xf32>
    %70 = arith.subf %66, %69 : vector<5x5xf32>
    %71 = math.exp %70 : vector<5x5xf32>
    %cst_27 = arith.constant dense<0.000000e+00> : vector<5xf32>
    %72 = vector.multi_reduction <add>, %71, %cst_27 [1] : vector<5x5xf32> to vector<5xf32>
    %73 = vector.shape_cast %72 : vector<5xf32> to vector<5x1xf32>
    %74 = tpu.reciprocal %73 {approx = true} : vector<5x1xf32> -> vector<5x1xf32>
    %75 = vector.broadcast %74 : vector<5x1xf32> to vector<5x5xf32>
    %76 = arith.mulf %71, %75 : vector<5x5xf32>
    %77 = arith.truncf %76 : vector<5x5xf32> to vector<5x5xbf16>
    %cst_28 = arith.constant dense<0.000000e+00> : vector<5x32xf32>
    %78 = tpu.matmul %77, %65, %cst_28 {dimension_numbers = #tpu.dot_dimension_numbers<[1], [0], [0], [1], [0, 0, 1, 1], [], []>} : vector<5x5xbf16>, vector<5x32xbf16>, vector<5x32xf32> -> vector<5x32xf32>
    %79 = vector.extract_strided_slice %42 {offsets = [0, 64], sizes = [5, 32], strides = [1, 1]} : vector<10x128xbf16> to vector<5x32xbf16>
    %80 = vector.extract_strided_slice %44 {offsets = [0, 64], sizes = [5, 32], strides = [1, 1]} : vector<10x128xbf16> to vector<5x32xbf16>
    %81 = vector.extract_strided_slice %46 {offsets = [0, 64], sizes = [5, 32], strides = [1, 1]} : vector<10x128xbf16> to vector<5x32xbf16>
    %cst_29 = arith.constant dense<0.000000e+00> : vector<5x5xf32>
    %82 = tpu.matmul %79, %80, %cst_29 {dimension_numbers = #tpu.dot_dimension_numbers<[1], [1], [0], [0], [0, 0, 1, 0], [], []>} : vector<5x32xbf16>, vector<5x32xbf16>, vector<5x5xf32> -> vector<5x5xf32>
    %cst_30 = arith.constant dense<0xFF800000> : vector<5xf32>
    %83 = vector.multi_reduction <maximumf>, %82, %cst_30 [1] : vector<5x5xf32> to vector<5xf32>
    %84 = vector.shape_cast %83 : vector<5xf32> to vector<5x1xf32>
    %85 = vector.broadcast %84 : vector<5x1xf32> to vector<5x5xf32>
    %86 = arith.subf %82, %85 : vector<5x5xf32>
    %87 = math.exp %86 : vector<5x5xf32>
    %cst_31 = arith.constant dense<0.000000e+00> : vector<5xf32>
    %88 = vector.multi_reduction <add>, %87, %cst_31 [1] : vector<5x5xf32> to vector<5xf32>
    %89 = vector.shape_cast %88 : vector<5xf32> to vector<5x1xf32>
    %90 = tpu.reciprocal %89 {approx = true} : vector<5x1xf32> -> vector<5x1xf32>
    %91 = vector.broadcast %90 : vector<5x1xf32> to vector<5x5xf32>
    %92 = arith.mulf %87, %91 : vector<5x5xf32>
    %93 = arith.truncf %92 : vector<5x5xf32> to vector<5x5xbf16>
    %cst_32 = arith.constant dense<0.000000e+00> : vector<5x32xf32>
    %94 = tpu.matmul %93, %81, %cst_32 {dimension_numbers = #tpu.dot_dimension_numbers<[1], [0], [0], [1], [0, 0, 1, 1], [], []>} : vector<5x5xbf16>, vector<5x32xbf16>, vector<5x32xf32> -> vector<5x32xf32>
    %95 = vector.extract_strided_slice %42 {offsets = [0, 96], sizes = [5, 32], strides = [1, 1]} : vector<10x128xbf16> to vector<5x32xbf16>
    %96 = vector.extract_strided_slice %44 {offsets = [0, 96], sizes = [5, 32], strides = [1, 1]} : vector<10x128xbf16> to vector<5x32xbf16>
    %97 = vector.extract_strided_slice %46 {offsets = [0, 96], sizes = [5, 32], strides = [1, 1]} : vector<10x128xbf16> to vector<5x32xbf16>
    %cst_33 = arith.constant dense<0.000000e+00> : vector<5x5xf32>
    %98 = tpu.matmul %95, %96, %cst_33 {dimension_numbers = #tpu.dot_dimension_numbers<[1], [1], [0], [0], [0, 0, 1, 0], [], []>} : vector<5x32xbf16>, vector<5x32xbf16>, vector<5x5xf32> -> vector<5x5xf32>
    %cst_34 = arith.constant dense<0xFF800000> : vector<5xf32>
    %99 = vector.multi_reduction <maximumf>, %98, %cst_34 [1] : vector<5x5xf32> to vector<5xf32>
    %100 = vector.shape_cast %99 : vector<5xf32> to vector<5x1xf32>
    %101 = vector.broadcast %100 : vector<5x1xf32> to vector<5x5xf32>
    %102 = arith.subf %98, %101 : vector<5x5xf32>
    %103 = math.exp %102 : vector<5x5xf32>
    %cst_35 = arith.constant dense<0.000000e+00> : vector<5xf32>
    %104 = vector.multi_reduction <add>, %103, %cst_35 [1] : vector<5x5xf32> to vector<5xf32>
    %105 = vector.shape_cast %104 : vector<5xf32> to vector<5x1xf32>
    %106 = tpu.reciprocal %105 {approx = true} : vector<5x1xf32> -> vector<5x1xf32>
    %107 = vector.broadcast %106 : vector<5x1xf32> to vector<5x5xf32>
    %108 = arith.mulf %103, %107 : vector<5x5xf32>
    %109 = arith.truncf %108 : vector<5x5xf32> to vector<5x5xbf16>
    %cst_36 = arith.constant dense<0.000000e+00> : vector<5x32xf32>
    %110 = tpu.matmul %109, %97, %cst_36 {dimension_numbers = #tpu.dot_dimension_numbers<[1], [0], [0], [1], [0, 0, 1, 1], [], []>} : vector<5x5xbf16>, vector<5x32xbf16>, vector<5x32xf32> -> vector<5x32xf32>
    %111 = tpu.concatenate %62, %78, %94, %110 in 1 : vector<5x32xf32>, vector<5x32xf32>, vector<5x32xf32>, vector<5x32xf32> -> vector<5x128xf32>
    %112 = vector.extract_strided_slice %42 {offsets = [5, 0], sizes = [5, 32], strides = [1, 1]} : vector<10x128xbf16> to vector<5x32xbf16>
    %113 = vector.extract_strided_slice %44 {offsets = [5, 0], sizes = [5, 32], strides = [1, 1]} : vector<10x128xbf16> to vector<5x32xbf16>
    %114 = vector.extract_strided_slice %46 {offsets = [5, 0], sizes = [5, 32], strides = [1, 1]} : vector<10x128xbf16> to vector<5x32xbf16>
    %cst_37 = arith.constant dense<0.000000e+00> : vector<5x5xf32>
    %115 = tpu.matmul %112, %113, %cst_37 {dimension_numbers = #tpu.dot_dimension_numbers<[1], [1], [0], [0], [0, 0, 1, 0], [], []>} : vector<5x32xbf16>, vector<5x32xbf16>, vector<5x5xf32> -> vector<5x5xf32>
    %cst_38 = arith.constant dense<0xFF800000> : vector<5xf32>
    %116 = vector.multi_reduction <maximumf>, %115, %cst_38 [1] : vector<5x5xf32> to vector<5xf32>
    %117 = vector.shape_cast %116 : vector<5xf32> to vector<5x1xf32>
    %118 = vector.broadcast %117 : vector<5x1xf32> to vector<5x5xf32>
    %119 = arith.subf %115, %118 : vector<5x5xf32>
    %120 = math.exp %119 : vector<5x5xf32>
    %cst_39 = arith.constant dense<0.000000e+00> : vector<5xf32>
    %121 = vector.multi_reduction <add>, %120, %cst_39 [1] : vector<5x5xf32> to vector<5xf32>
    %122 = vector.shape_cast %121 : vector<5xf32> to vector<5x1xf32>
    %123 = tpu.reciprocal %122 {approx = true} : vector<5x1xf32> -> vector<5x1xf32>
    %124 = vector.broadcast %123 : vector<5x1xf32> to vector<5x5xf32>
    %125 = arith.mulf %120, %124 : vector<5x5xf32>
    %126 = arith.truncf %125 : vector<5x5xf32> to vector<5x5xbf16>
    %cst_40 = arith.constant dense<0.000000e+00> : vector<5x32xf32>
    %127 = tpu.matmul %126, %114, %cst_40 {dimension_numbers = #tpu.dot_dimension_numbers<[1], [0], [0], [1], [0, 0, 1, 1], [], []>} : vector<5x5xbf16>, vector<5x32xbf16>, vector<5x32xf32> -> vector<5x32xf32>
    %128 = vector.extract_strided_slice %42 {offsets = [5, 32], sizes = [5, 32], strides = [1, 1]} : vector<10x128xbf16> to vector<5x32xbf16>
    %129 = vector.extract_strided_slice %44 {offsets = [5, 32], sizes = [5, 32], strides = [1, 1]} : vector<10x128xbf16> to vector<5x32xbf16>
    %130 = vector.extract_strided_slice %46 {offsets = [5, 32], sizes = [5, 32], strides = [1, 1]} : vector<10x128xbf16> to vector<5x32xbf16>
    %cst_41 = arith.constant dense<0.000000e+00> : vector<5x5xf32>
    %131 = tpu.matmul %128, %129, %cst_41 {dimension_numbers = #tpu.dot_dimension_numbers<[1], [1], [0], [0], [0, 0, 1, 0], [], []>} : vector<5x32xbf16>, vector<5x32xbf16>, vector<5x5xf32> -> vector<5x5xf32>
    %cst_42 = arith.constant dense<0xFF800000> : vector<5xf32>
    %132 = vector.multi_reduction <maximumf>, %131, %cst_42 [1] : vector<5x5xf32> to vector<5xf32>
    %133 = vector.shape_cast %132 : vector<5xf32> to vector<5x1xf32>
    %134 = vector.broadcast %133 : vector<5x1xf32> to vector<5x5xf32>
    %135 = arith.subf %131, %134 : vector<5x5xf32>
    %136 = math.exp %135 : vector<5x5xf32>
    %cst_43 = arith.constant dense<0.000000e+00> : vector<5xf32>
    %137 = vector.multi_reduction <add>, %136, %cst_43 [1] : vector<5x5xf32> to vector<5xf32>
    %138 = vector.shape_cast %137 : vector<5xf32> to vector<5x1xf32>
    %139 = tpu.reciprocal %138 {approx = true} : vector<5x1xf32> -> vector<5x1xf32>
    %140 = vector.broadcast %139 : vector<5x1xf32> to vector<5x5xf32>
    %141 = arith.mulf %136, %140 : vector<5x5xf32>
    %142 = arith.truncf %141 : vector<5x5xf32> to vector<5x5xbf16>
    %cst_44 = arith.constant dense<0.000000e+00> : vector<5x32xf32>
    %143 = tpu.matmul %142, %130, %cst_44 {dimension_numbers = #tpu.dot_dimension_numbers<[1], [0], [0], [1], [0, 0, 1, 1], [], []>} : vector<5x5xbf16>, vector<5x32xbf16>, vector<5x32xf32> -> vector<5x32xf32>
    %144 = vector.extract_strided_slice %42 {offsets = [5, 64], sizes = [5, 32], strides = [1, 1]} : vector<10x128xbf16> to vector<5x32xbf16>
    %145 = vector.extract_strided_slice %44 {offsets = [5, 64], sizes = [5, 32], strides = [1, 1]} : vector<10x128xbf16> to vector<5x32xbf16>
    %146 = vector.extract_strided_slice %46 {offsets = [5, 64], sizes = [5, 32], strides = [1, 1]} : vector<10x128xbf16> to vector<5x32xbf16>
    %cst_45 = arith.constant dense<0.000000e+00> : vector<5x5xf32>
    %147 = tpu.matmul %144, %145, %cst_45 {dimension_numbers = #tpu.dot_dimension_numbers<[1], [1], [0], [0], [0, 0, 1, 0], [], []>} : vector<5x32xbf16>, vector<5x32xbf16>, vector<5x5xf32> -> vector<5x5xf32>
    %cst_46 = arith.constant dense<0xFF800000> : vector<5xf32>
    %148 = vector.multi_reduction <maximumf>, %147, %cst_46 [1] : vector<5x5xf32> to vector<5xf32>
    %149 = vector.shape_cast %148 : vector<5xf32> to vector<5x1xf32>
    %150 = vector.broadcast %149 : vector<5x1xf32> to vector<5x5xf32>
    %151 = arith.subf %147, %150 : vector<5x5xf32>
    %152 = math.exp %151 : vector<5x5xf32>
    %cst_47 = arith.constant dense<0.000000e+00> : vector<5xf32>
    %153 = vector.multi_reduction <add>, %152, %cst_47 [1] : vector<5x5xf32> to vector<5xf32>
    %154 = vector.shape_cast %153 : vector<5xf32> to vector<5x1xf32>
    %155 = tpu.reciprocal %154 {approx = true} : vector<5x1xf32> -> vector<5x1xf32>
    %156 = vector.broadcast %155 : vector<5x1xf32> to vector<5x5xf32>
    %157 = arith.mulf %152, %156 : vector<5x5xf32>
    %158 = arith.truncf %157 : vector<5x5xf32> to vector<5x5xbf16>
    %cst_48 = arith.constant dense<0.000000e+00> : vector<5x32xf32>
    %159 = tpu.matmul %158, %146, %cst_48 {dimension_numbers = #tpu.dot_dimension_numbers<[1], [0], [0], [1], [0, 0, 1, 1], [], []>} : vector<5x5xbf16>, vector<5x32xbf16>, vector<5x32xf32> -> vector<5x32xf32>
    %160 = vector.extract_strided_slice %42 {offsets = [5, 96], sizes = [5, 32], strides = [1, 1]} : vector<10x128xbf16> to vector<5x32xbf16>
    %161 = vector.extract_strided_slice %44 {offsets = [5, 96], sizes = [5, 32], strides = [1, 1]} : vector<10x128xbf16> to vector<5x32xbf16>
    %162 = vector.extract_strided_slice %46 {offsets = [5, 96], sizes = [5, 32], strides = [1, 1]} : vector<10x128xbf16> to vector<5x32xbf16>
    %cst_49 = arith.constant dense<0.000000e+00> : vector<5x5xf32>
    %163 = tpu.matmul %160, %161, %cst_49 {dimension_numbers = #tpu.dot_dimension_numbers<[1], [1], [0], [0], [0, 0, 1, 0], [], []>} : vector<5x32xbf16>, vector<5x32xbf16>, vector<5x5xf32> -> vector<5x5xf32>
    %cst_50 = arith.constant dense<0xFF800000> : vector<5xf32>
    %164 = vector.multi_reduction <maximumf>, %163, %cst_50 [1] : vector<5x5xf32> to vector<5xf32>
    %165 = vector.shape_cast %164 : vector<5xf32> to vector<5x1xf32>
    %166 = vector.broadcast %165 : vector<5x1xf32> to vector<5x5xf32>
    %167 = arith.subf %163, %166 : vector<5x5xf32>
    %168 = math.exp %167 : vector<5x5xf32>
    %cst_51 = arith.constant dense<0.000000e+00> : vector<5xf32>
    %169 = vector.multi_reduction <add>, %168, %cst_51 [1] : vector<5x5xf32> to vector<5xf32>
    %170 = vector.shape_cast %169 : vector<5xf32> to vector<5x1xf32>
    %171 = tpu.reciprocal %170 {approx = true} : vector<5x1xf32> -> vector<5x1xf32>
    %172 = vector.broadcast %171 : vector<5x1xf32> to vector<5x5xf32>
    %173 = arith.mulf %168, %172 : vector<5x5xf32>
    %174 = arith.truncf %173 : vector<5x5xf32> to vector<5x5xbf16>
    %cst_52 = arith.constant dense<0.000000e+00> : vector<5x32xf32>
    %175 = tpu.matmul %174, %162, %cst_52 {dimension_numbers = #tpu.dot_dimension_numbers<[1], [0], [0], [1], [0, 0, 1, 1], [], []>} : vector<5x5xbf16>, vector<5x32xbf16>, vector<5x32xf32> -> vector<5x32xf32>
    %176 = tpu.concatenate %127, %143, %159, %175 in 1 : vector<5x32xf32>, vector<5x32xf32>, vector<5x32xf32>, vector<5x32xf32> -> vector<5x128xf32>
    %177 = tpu.concatenate %111, %176 in 0 : vector<5x128xf32>, vector<5x128xf32> -> vector<10x128xf32>
    %178 = arith.truncf %177 : vector<10x128xf32> to vector<10x128xbf16>
    %c0_53 = arith.constant 0 : index
    %c0_54 = arith.constant 0 : index
    %c0_55 = arith.constant 0 : index
    %179 = vector.load %arg9[%c0_53, %c0_54, %c0_55] : memref<1x128x128xbf16, #tpu.memory_space<vmem>>, vector<1x128x128xbf16>
    %180 = vector.shape_cast %179 : vector<1x128x128xbf16> to vector<128x128xbf16>
    %cst_56 = arith.constant dense<0.000000e+00> : vector<10x128xf32>
    %181 = tpu.matmul %178, %180, %cst_56 {dimension_numbers = #tpu.dot_dimension_numbers<[1], [0], [0], [1], [0, 0, 1, 1], [], []>} : vector<10x128xbf16>, vector<128x128xbf16>, vector<10x128xf32> -> vector<10x128xf32>
    %182 = arith.addf %4, %181 : vector<10x128xf32>
    %c0_57 = arith.constant 0 : index
    %c0_58 = arith.constant 0 : index
    %c0_59 = arith.constant 0 : index
    %183 = vector.load %arg10[%c0_57, %c0_58, %c0_59] : memref<1x1x128xf32, #tpu.memory_space<vmem>>, vector<1x1x128xf32>
    %184 = vector.shape_cast %183 : vector<1x1x128xf32> to vector<1x128xf32>
    %185 = vector.broadcast %184 : vector<1x128xf32> to vector<10x128xf32>
    %186 = arith.addf %182, %185 : vector<10x128xf32>
    %c0_60 = arith.constant 0 : index
    %c0_61 = arith.constant 0 : index
    %c0_62 = arith.constant 0 : index
    %187 = vector.load %arg17[%c0_60, %c0_61, %c0_62] : memref<1x1x128xf32, #tpu.memory_space<vmem>>, vector<1x1x128xf32>
    %188 = vector.shape_cast %187 : vector<1x1x128xf32> to vector<1x128xf32>
    %c0_63 = arith.constant 0 : index
    %c0_64 = arith.constant 0 : index
    %c0_65 = arith.constant 0 : index
    %189 = vector.load %arg18[%c0_63, %c0_64, %c0_65] : memref<1x1x128xf32, #tpu.memory_space<vmem>>, vector<1x1x128xf32>
    %190 = vector.shape_cast %189 : vector<1x1x128xf32> to vector<1x128xf32>
    %cst_66 = arith.constant dense<0.000000e+00> : vector<10xf32>
    %191 = vector.multi_reduction <add>, %186, %cst_66 [1] : vector<10x128xf32> to vector<10xf32>
    %192 = vector.shape_cast %191 : vector<10xf32> to vector<10x1xf32>
    %cst_67 = arith.constant 1.280000e+02 : f32
    %193 = vector.broadcast %cst_67 : f32 to vector<10x1xf32>
    %194 = arith.divf %192, %193 : vector<10x1xf32>
    %195 = vector.broadcast %194 : vector<10x1xf32> to vector<10x128xf32>
    %196 = arith.subf %186, %195 : vector<10x128xf32>
    %197 = arith.mulf %196, %196 : vector<10x128xf32>
    %cst_68 = arith.constant dense<0.000000e+00> : vector<10xf32>
    %198 = vector.multi_reduction <add>, %197, %cst_68 [1] : vector<10x128xf32> to vector<10xf32>
    %199 = vector.shape_cast %198 : vector<10xf32> to vector<10x1xf32>
    %cst_69 = arith.constant 1.280000e+02 : f32
    %200 = vector.broadcast %cst_69 : f32 to vector<10x1xf32>
    %201 = arith.divf %199, %200 : vector<10x1xf32>
    %202 = vector.broadcast %194 : vector<10x1xf32> to vector<10x128xf32>
    %203 = arith.subf %186, %202 : vector<10x128xf32>
    %cst_70 = arith.constant 9.99999997E-7 : f32
    %204 = vector.broadcast %cst_70 : f32 to vector<10x1xf32>
    %205 = arith.addf %201, %204 : vector<10x1xf32>
    %206 = math.rsqrt %205 : vector<10x1xf32>
    %207 = vector.broadcast %206 : vector<10x1xf32> to vector<10x128xf32>
    %208 = arith.mulf %203, %207 : vector<10x128xf32>
    %209 = vector.broadcast %188 : vector<1x128xf32> to vector<10x128xf32>
    %210 = arith.mulf %208, %209 : vector<10x128xf32>
    %211 = vector.broadcast %190 : vector<1x128xf32> to vector<10x128xf32>
    %212 = arith.addf %210, %211 : vector<10x128xf32>
    %213 = arith.truncf %212 : vector<10x128xf32> to vector<10x128xbf16>
    %c0_71 = arith.constant 0 : index
    %c0_72 = arith.constant 0 : index
    %c0_73 = arith.constant 0 : index
    %214 = vector.load %arg11[%c0_71, %c0_72, %c0_73] : memref<1x128x256xbf16, #tpu.memory_space<vmem>>, vector<1x128x256xbf16>
    %215 = vector.shape_cast %214 : vector<1x128x256xbf16> to vector<128x256xbf16>
    %cst_74 = arith.constant dense<0.000000e+00> : vector<10x256xf32>
    %216 = tpu.matmul %213, %215, %cst_74 {dimension_numbers = #tpu.dot_dimension_numbers<[1], [0], [0], [1], [0, 0, 1, 1], [], []>} : vector<10x128xbf16>, vector<128x256xbf16>, vector<10x256xf32> -> vector<10x256xf32>
    %c0_75 = arith.constant 0 : index
    %c0_76 = arith.constant 0 : index
    %c0_77 = arith.constant 0 : index
    %217 = vector.load %arg12[%c0_75, %c0_76, %c0_77] : memref<1x1x256xf32, #tpu.memory_space<vmem>>, vector<1x1x256xf32>
    %218 = vector.shape_cast %217 : vector<1x1x256xf32> to vector<1x256xf32>
    %219 = vector.broadcast %218 : vector<1x256xf32> to vector<10x256xf32>
    %220 = arith.addf %216, %219 : vector<10x256xf32>
    %cst_78 = arith.constant 5.000000e-01 : f32
    %221 = vector.broadcast %cst_78 : f32 to vector<10x256xf32>
    %222 = arith.mulf %221, %220 : vector<10x256xf32>
    %cst_79 = arith.constant 0.707106769 : f32
    %223 = vector.broadcast %cst_79 : f32 to vector<10x256xf32>
    %224 = arith.mulf %220, %223 : vector<10x256xf32>
    %225 = math.erf %224 : vector<10x256xf32>
    %cst_80 = arith.constant 1.000000e+00 : f32
    %226 = vector.broadcast %cst_80 : f32 to vector<10x256xf32>
    %227 = arith.addf %226, %225 : vector<10x256xf32>
    %228 = arith.mulf %222, %227 : vector<10x256xf32>
    %229 = arith.truncf %228 : vector<10x256xf32> to vector<10x256xbf16>
    %c0_81 = arith.constant 0 : index
    %c0_82 = arith.constant 0 : index
    %c0_83 = arith.constant 0 : index
    %230 = vector.load %arg13[%c0_81, %c0_82, %c0_83] : memref<1x256x128xbf16, #tpu.memory_space<vmem>>, vector<1x256x128xbf16>
    %231 = vector.shape_cast %230 : vector<1x256x128xbf16> to vector<256x128xbf16>
    %cst_84 = arith.constant dense<0.000000e+00> : vector<10x128xf32>
    %232 = tpu.matmul %229, %231, %cst_84 {dimension_numbers = #tpu.dot_dimension_numbers<[1], [0], [0], [1], [0, 0, 1, 1], [], []>} : vector<10x256xbf16>, vector<256x128xbf16>, vector<10x128xf32> -> vector<10x128xf32>
    %c0_85 = arith.constant 0 : index
    %c0_86 = arith.constant 0 : index
    %c0_87 = arith.constant 0 : index
    %233 = vector.load %arg14[%c0_85, %c0_86, %c0_87] : memref<1x1x128xf32, #tpu.memory_space<vmem>>, vector<1x1x128xf32>
    %234 = vector.shape_cast %233 : vector<1x1x128xf32> to vector<1x128xf32>
    %235 = vector.broadcast %234 : vector<1x128xf32> to vector<10x128xf32>
    %236 = arith.addf %232, %235 : vector<10x128xf32>
    %237 = arith.addf %186, %236 : vector<10x128xf32>
    %c1_i32 = arith.constant 1 : i32
    %238 = arith.cmpi slt, %arg1, %c1_i32 : i32
    %239 = arith.extui %238 : i1 to i32
    %c0_i32_88 = arith.constant 0 : i32
    %240 = arith.cmpi ne, %239, %c0_i32_88 : i32
    scf.if %240 {
      %244 = vector.shape_cast %237 : vector<10x128xf32> to vector<2x5x128xf32>
      %c0_91 = arith.constant 0 : index
      %c0_92 = arith.constant 0 : index
      %c0_93 = arith.constant 0 : index
      %245 = vector.load %arg21[%c0_91, %c0_92, %c0_93] : memref<2x5x128xf32, #tpu.memory_space<vmem>>, vector<2x5x128xf32>
      tpu.vector_store %arg21[%c0_91, %c0_92, %c0_93], %244 {strides = array<i32>} : memref<2x5x128xf32, #tpu.memory_space<vmem>>, vector<2x5x128xf32>,
    } else {
    }
    %c1_i32_89 = arith.constant 1 : i32
    %241 = arith.cmpi eq, %arg1, %c1_i32_89 : i32
    %242 = arith.extui %241 : i1 to i32
    %c0_i32_90 = arith.constant 0 : i32
    %243 = arith.cmpi ne, %242, %c0_i32_90 : i32
    scf.if %243 {
      %c0_91 = arith.constant 0 : index
      %c0_92 = arith.constant 0 : index
      %244 = vector.load %arg19[%c0_91, %c0_92] : memref<1x128xf32, #tpu.memory_space<vmem>>, vector<1x128xf32>
      %c0_93 = arith.constant 0 : index
      %c0_94 = arith.constant 0 : index
      %245 = vector.load %arg20[%c0_93, %c0_94] : memref<1x128xf32, #tpu.memory_space<vmem>>, vector<1x128xf32>
      %cst_95 = arith.constant dense<0.000000e+00> : vector<10xf32>
      %246 = vector.multi_reduction <add>, %237, %cst_95 [1] : vector<10x128xf32> to vector<10xf32>
      %247 = vector.shape_cast %246 : vector<10xf32> to vector<10x1xf32>
      %cst_96 = arith.constant 1.280000e+02 : f32
      %248 = vector.broadcast %cst_96 : f32 to vector<10x1xf32>
      %249 = arith.divf %247, %248 : vector<10x1xf32>
      %250 = vector.broadcast %249 : vector<10x1xf32> to vector<10x128xf32>
      %251 = arith.subf %237, %250 : vector<10x128xf32>
      %252 = arith.mulf %251, %251 : vector<10x128xf32>
      %cst_97 = arith.constant dense<0.000000e+00> : vector<10xf32>
      %253 = vector.multi_reduction <add>, %252, %cst_97 [1] : vector<10x128xf32> to vector<10xf32>
      %254 = vector.shape_cast %253 : vector<10xf32> to vector<10x1xf32>
      %cst_98 = arith.constant 1.280000e+02 : f32
      %255 = vector.broadcast %cst_98 : f32 to vector<10x1xf32>
      %256 = arith.divf %254, %255 : vector<10x1xf32>
      %257 = vector.broadcast %249 : vector<10x1xf32> to vector<10x128xf32>
      %258 = arith.subf %237, %257 : vector<10x128xf32>
      %cst_99 = arith.constant 9.99999997E-7 : f32
      %259 = vector.broadcast %cst_99 : f32 to vector<10x1xf32>
      %260 = arith.addf %256, %259 : vector<10x1xf32>
      %261 = math.rsqrt %260 : vector<10x1xf32>
      %262 = vector.broadcast %261 : vector<10x1xf32> to vector<10x128xf32>
      %263 = arith.mulf %258, %262 : vector<10x128xf32>
      %264 = vector.broadcast %244 : vector<1x128xf32> to vector<10x128xf32>
      %265 = arith.mulf %263, %264 : vector<10x128xf32>
      %266 = vector.broadcast %245 : vector<1x128xf32> to vector<10x128xf32>
      %267 = arith.addf %265, %266 : vector<10x128xf32>
      %268 = vector.shape_cast %267 : vector<10x128xf32> to vector<2x5x128xf32>
      %c0_100 = arith.constant 0 : index
      %c0_101 = arith.constant 0 : index
      %c0_102 = arith.constant 0 : index
      %269 = vector.load %arg21[%c0_100, %c0_101, %c0_102] : memref<2x5x128xf32, #tpu.memory_space<vmem>>, vector<2x5x128xf32>
      tpu.vector_store %arg21[%c0_100, %c0_101, %c0_102], %268 {strides = array<i32>} : memref<2x5x128xf32, #tpu.memory_space<vmem>>, vector<2x5x128xf32>,
    } else {
    }
    return
  }
  func.func @transform_0(%arg0: i32, %arg1: i32) -> (i32, i32, i32) {
    %c0_i32 = arith.constant 0 : i32
    %c0_i32_0 = arith.constant 0 : i32
    %c0_i32_1 = arith.constant 0 : i32
    return %arg0, %c0_i32, %c0_i32_0 : i32, i32, i32
  }
  func.func @transform_1(%arg0: i32, %arg1: i32) -> (i32, i32) {
    %c0_i32 = arith.constant 0 : i32
    %c0_i32_0 = arith.constant 0 : i32
    %c0_i32_1 = arith.constant 0 : i32
    return %c0_i32, %c0_i32_0 : i32, i32
  }
  func.func @transform_2(%arg0: i32, %arg1: i32) -> (i32, i32) {
    %c0_i32 = arith.constant 0 : i32
    %c0_i32_0 = arith.constant 0 : i32
    %c0_i32_1 = arith.constant 0 : i32
    return %c0_i32, %c0_i32_0 : i32, i32
  }
  func.func @transform_3(%arg0: i32, %arg1: i32) -> (i32, i32) {
    %c0_i32 = arith.constant 0 : i32
    %c0_i32_0 = arith.constant 0 : i32
    %c0_i32_1 = arith.constant 0 : i32
    return %c0_i32, %c0_i32_0 : i32, i32
  }
  func.func @transform_4(%arg0: i32, %arg1: i32) -> (i32, i32, i32) {
    %c0_i32 = arith.constant 0 : i32
    %c0_i32_0 = arith.constant 0 : i32
    %c0_i32_1 = arith.constant 0 : i32
    %c0_i32_2 = arith.constant 0 : i32
    return %c0_i32, %c0_i32_0, %c0_i32_1 : i32, i32, i32
  }
  func.func @transform_5(%arg0: i32, %arg1: i32) -> (i32, i32, i32) {
    %c0_i32 = arith.constant 0 : i32
    %c0_i32_0 = arith.constant 0 : i32
    %c0_i32_1 = arith.constant 0 : i32
    return %arg1, %c0_i32, %c0_i32_0 : i32, i32, i32
  }
  func.func @transform_6(%arg0: i32, %arg1: i32) -> (i32, i32, i32) {
    %c0_i32 = arith.constant 0 : i32
    %c0_i32_0 = arith.constant 0 : i32
    %c0_i32_1 = arith.constant 0 : i32
    return %arg1, %c0_i32, %c0_i32_0 : i32, i32, i32
  }
  func.func @transform_7(%arg0: i32, %arg1: i32) -> (i32, i32, i32) {
    %c0_i32 = arith.constant 0 : i32
    %c0_i32_0 = arith.constant 0 : i32
    %c0_i32_1 = arith.constant 0 : i32
    return %arg1, %c0_i32, %c0_i32_0 : i32, i32, i32
  }
  func.func @transform_8(%arg0: i32, %arg1: i32) -> (i32, i32, i32) {
    %c0_i32 = arith.constant 0 : i32
    %c0_i32_0 = arith.constant 0 : i32
    %c0_i32_1 = arith.constant 0 : i32
    return %arg1, %c0_i32, %c0_i32_0 : i32, i32, i32
  }
  func.func @transform_9(%arg0: i32, %arg1: i32) -> (i32, i32, i32) {
    %c0_i32 = arith.constant 0 : i32
    %c0_i32_0 = arith.constant 0 : i32
    %c0_i32_1 = arith.constant 0 : i32
    return %arg1, %c0_i32, %c0_i32_0 : i32, i32, i32
  }
  func.func @transform_10(%arg0: i32, %arg1: i32) -> (i32, i32, i32) {
    %c0_i32 = arith.constant 0 : i32
    %c0_i32_0 = arith.constant 0 : i32
    %c0_i32_1 = arith.constant 0 : i32
    return %arg1, %c0_i32, %c0_i32_0 : i32, i32, i32
  }
  func.func @transform_11(%arg0: i32, %arg1: i32) -> (i32, i32, i32) {
    %c0_i32 = arith.constant 0 : i32
    %c0_i32_0 = arith.constant 0 : i32
    %c0_i32_1 = arith.constant 0 : i32
    return %arg1, %c0_i32, %c0_i32_0 : i32, i32, i32
  }
  func.func @transform_12(%arg0: i32, %arg1: i32) -> (i32, i32, i32) {
    %c0_i32 = arith.constant 0 : i32
    %c0_i32_0 = arith.constant 0 : i32
    %c0_i32_1 = arith.constant 0 : i32
    return %arg1, %c0_i32, %c0_i32_0 : i32, i32, i32
  }
  func.func @transform_13(%arg0: i32, %arg1: i32) -> (i32, i32, i32) {
    %c0_i32 = arith.constant 0 : i32
    %c0_i32_0 = arith.constant 0 : i32
    %c0_i32_1 = arith.constant 0 : i32
    return %arg1, %c0_i32, %c0_i32_0 : i32, i32, i32
  }
  func.func @transform_14(%arg0: i32, %arg1: i32) -> (i32, i32, i32) {
    %c0_i32 = arith.constant 0 : i32
    %c0_i32_0 = arith.constant 0 : i32
    %c0_i32_1 = arith.constant 0 : i32
    return %arg1, %c0_i32, %c0_i32_0 : i32, i32, i32
  }
  func.func @transform_15(%arg0: i32, %arg1: i32) -> (i32, i32, i32) {
    %c0_i32 = arith.constant 0 : i32
    %c0_i32_0 = arith.constant 0 : i32
    %c0_i32_1 = arith.constant 0 : i32
    return %arg1, %c0_i32, %c0_i32_0 : i32, i32, i32
  }
  func.func @transform_16(%arg0: i32, %arg1: i32) -> (i32, i32, i32) {
    %c0_i32 = arith.constant 0 : i32
    %c0_i32_0 = arith.constant 0 : i32
    %c0_i32_1 = arith.constant 0 : i32
    return %arg1, %c0_i32, %c0_i32_0 : i32, i32, i32
  }
  func.func @transform_17(%arg0: i32, %arg1: i32) -> (i32, i32) {
    %c0_i32 = arith.constant 0 : i32
    %c0_i32_0 = arith.constant 0 : i32
    %c0_i32_1 = arith.constant 0 : i32
    return %c0_i32, %c0_i32_0 : i32, i32
  }
  func.func @transform_18(%arg0: i32, %arg1: i32) -> (i32, i32) {
    %c0_i32 = arith.constant 0 : i32
    %c0_i32_0 = arith.constant 0 : i32
    %c0_i32_1 = arith.constant 0 : i32
    return %c0_i32, %c0_i32_0 : i32, i32
  }
  func.func @transform_19(%arg0: i32, %arg1: i32) -> (i32, i32, i32) {
    %c0_i32 = arith.constant 0 : i32
    %c0_i32_0 = arith.constant 0 : i32
    %c0_i32_1 = arith.constant 0 : i32
    return %arg0, %c0_i32, %c0_i32_0 : i32, i32, i32
  }
}

</mosaic_0001>

<bundles_post_ra>
// kernel: vit_forward.1
= control target key start
LH: loop header
LB: loop body
LE: loop exit
PB: predicated region body
PF: predicated region fallthrough
CT: control target
= control target key end

     0   :  { %s13410_s0 = inlined_call_operand.vmem [shape: bf16[2,4,3072], index: 0, kind: input, shape index: {}]   ;;  %s13411_s1 = inlined_call_operand.vmem [shape: bf16[3072,128], index: 1, kind: input, shape index: {}]   ;;  %s13412_s2 = inlined_call_operand.vmem [shape: f32[1,128], index: 2, kind: input, shape index: {}]   ;;  %s13413_s3 = inlined_call_operand.vmem [shape: f32[1,128], index: 3, kind: input, shape index: {}]   ;;  %s13414_s4 = inlined_call_operand.vmem [shape: f32[1,5,128], index: 4, kind: input, shape index: {}]   ;;  %s13415_s5 = inlined_call_operand.vmem [shape: bf16[2,128,384], index: 5, kind: input, shape index: {}]   ;;  %s13416_s6 = inlined_call_operand.vmem [shape: f32[2,1,384], index: 6, kind: input, shape index: {}]   ;;  %s13417_s7 = inlined_call_operand.hbm [shape: bf16[2,128,128], index: 7, kind: input, shape index: {}]   ;;  %s13418_s8 = inlined_call_operand.vmem [shape: f32[2,1,128], index: 8, kind: input, shape index: {}]   ;;  %s13419_s9 = inlined_call_operand.vmem [shape: bf16[2,128,256], index: 9, kind: input, shape index: {}]   ;;  %s13420_s10 = inlined_call_operand.vmem [shape: f32[2,1,256], index: 10, kind: input, shape index: {}]   ;;  %s13421_s11 = inlined_call_operand.vmem [shape: bf16[2,256,128], index: 11, kind: input, shape index: {}]   ;;  %s13422_s12 = inlined_call_operand.vmem [shape: f32[2,1,128], index: 12, kind: input, shape index: {}]   ;;  %s13423_s13 = inlined_call_operand.vmem [shape: f32[2,1,128], index: 13, kind: input, shape index: {}]   ;;  %s13424_s14 = inlined_call_operand.vmem [shape: f32[2,1,128], index: 14, kind: input, shape index: {}]   ;;  %s13425_s15 = inlined_call_operand.vmem [shape: f32[2,1,128], index: 15, kind: input, shape index: {}]   ;;  %s13426_s16 = inlined_call_operand.vmem [shape: f32[2,1,128], index: 16, kind: input, shape index: {}]   ;;  %s13427_s17 = inlined_call_operand.vmem [shape: f32[1,128], index: 17, kind: input, shape index: {}]   ;;  %s13428_s18 = inlined_call_operand.vmem [shape: f32[1,128], index: 18, kind: input, shape index: {}]   ;;  %s13429_s19 = inlined_call_operand.vmem [shape: f32[2,5,128], index: 19, kind: output, shape index: {}]  }
   0x1   :  { %13449 = sst [smem:[#allocation12_spill]] %s13410_s0 }
   0x2   :  { %13450 = sst [smem:[#allocation13_spill]] %s13411_s1 }
   0x3   :  { %13451 = sst [smem:[#allocation14_spill]] %s13412_s2 }
   0x4   :  { %13452 = sst [smem:[#allocation15_spill]] %s13413_s3 }
   0x5   :  { %13453 = sst [smem:[#allocation16_spill]] %s13414_s4 }
   0x6   :  { %13454 = sst [smem:[#allocation17_spill]] %s13415_s5 }
   0x7   :  { %13455 = sst [smem:[#allocation18_spill]] %s13416_s6 }
   0x8   :  { %13456 = sst [smem:[#allocation19_spill]] %s13417_s7 }
   0x9   :  { %13457 = sst [smem:[#allocation20_spill]] %s13419_s9 }
   0xa   :  { %13458 = sst [smem:[#allocation21_spill]] %s13420_s10 }
   0xb   :  { %13459 = sst [smem:[#allocation22_spill]] %s13427_s17 }
   0xc   :  { %13460 = sst [smem:[#allocation23_spill]] %s13428_s18 }
   0xd   :  { %13461 = sst [smem:[#allocation24_spill]] %s13429_s19 }
   0xe   :  { %24 = vsyncpa [#allocation3], 0 }
   0xf   :  { %26 = vsyncpa [#allocation3 + $0x1], 0  ;;  %s11122_s0 = smov 0   ;;  %s11124_s30 = smov 0  }
  0x10   :  { %s11126_s20 = smov 0   ;;  %s11128_s21 = smov 0  }
  0x11   :  { %s11130_s1 = smov 0   ;;  %s11132_s22 = smov 0  }
  0x12 LB: > { %13462 = sst [smem:[#allocation5_spill]] %s10992_s30  ;;  %s9076_s2 = sadd.s32 4294967295, %s11008_s22   ;;  %s11008_s22 = sphi %s11132_s22, %s32_s22   ;;  %s11004_s1 = sphi %s11130_s1, %s13502_s1   ;;  %s11000_s21 = sphi %s11128_s21, %s13501_s21   ;;  %s10996_s20 = sphi %s11126_s20, %s13500_s20   ;;  %s10992_s30 = sphi %s11124_s30, %s13499_s30   ;;  %s10988_s0 = sphi %s11122_s0, %s13498_s0  }
  0x13   : > { %13463 = sst [smem:[#allocation6_spill]] %s10996_s20  ;;  %s41_s23 = sadd.s32 1, %s11004_s1 }
  0x14   : > { %13464 = sst [smem:[#allocation7_spill]] %s11004_s1  ;;  %p42_p0 = scmp.ge.s32.totalorder %s41_s23, 2 }
  0x15   : > { %13465 = sst [smem:[#allocation8_spill]] %s11008_s22  ;;  %s213_s24 = sadd.s32 1, %s10996_s20 }
  0x16   : > { %p220_p1 = scmp.ne.s32.totalorder %s10996_s20, %s10992_s30  ;;  %p221_p2 = scmp.eq.s32.totalorder %s11008_s22, 0 }
  0x17   : > { %s13504_s23 = smov (%p42_p0, %s41_s23), 0  ;;  %p226_p4 = scmp.ne.s32.totalorder %s10992_s30, %s10988_s0 }
  0x18   : > { %13466 = sst [smem:[#allocation9_spill]] %s13504_s23  ;;  %p11158_p3 = por %p221_p2, %p220_p1 }
  0x19   : > { %s210_s3 = ssub.s32 %s11004_s1, %s13504_s23  ;;  %p227_p5 = scmp.eq.s32.totalorder %s9076_s2, 0 }
  0x1a   : > { %p211_p6 = scmp.eq.s32.totalorder %s210_s3, 0  ;;  %p10328_p8 = scmp.lt.s32.totalorder %s11008_s22, 2 }
  0x1b   : > { %p11165_p7 = por %p227_p5, %p226_p4  ;;  %s595_s28 = sand.u32 1, %s10996_s20  }
  0x1c   : > { %s11171_s27 = scalar_select %p211_p6, %s10996_s20, %s213_s24  }
  0x1d   : > { %s9581_s29 = sshll.u32 %s11004_s1, 10  ;;  %s9080_s18 = sshll.u32 %s595_s28, 6 }
  0x1e   : > { %13469 = sst [smem:[#allocation10_spill]] %s11171_s27  ;;  %s13470_s7 = sld [smem:[#allocation19_spill]] }
  0x1f   : > { %s599_s0 = scalar_lea.vmem [#allocation2], %s9080_s18  ;;  %p11182_p9 = pnand %p10328_p8, %p11158_p3 }
  0x20   : > { %s606_s2 = sshll.u32 %s599_s0, 4  ;;  %s11188_s24 = scalar_lea.sflag [#allocation3], %s595_s28  ;;  %s11186_s2 = int_to_ptr.vmem [resolvable:$true] %s606_s2 }
  0x21   : > { %p10930_p11 = pneg %p11182_p9 }
  0x24   : > { %s11178_s4 = scalar_lea.hbm %s13470_s7, %s9581_s29  ;;  %s10933_s25 = scalar_lea.hbm %s13470_s7, 2048 }
  0x25   : > { %s10928_s17 = scalar_lea.hbm %s11178_s4, 1024  ;;  %p10934_p0 = scmp.lt.u32.totalorder %s11178_s4, %s13470_s7 }
  0x26   : > { %p10929_p10 = scmp.ne.s32.totalorder %s11178_s4, %s10928_s17  ;;  %p10935_p1 = scmp.lt.u32.totalorder %s10933_s25, %s10928_s17 }
  0x27   : > { %p10937_p3 = scmp.lt.u32.totalorder %s10928_s17, %s11178_s4 }
  0x28   : > { %p10931_p12 = pnand %p10930_p11, %p10929_p10  ;;  %p10936_p2 = por %p10935_p1, %p10934_p0 }
  0x2a   : > { %p10932_p13 = pneg %p10931_p12  ;;  %p10938_p4 = por %p10937_p3, %p10936_p2 }
  0x2c   : > { %p10939_p5 = pnand %p10938_p4, %p10932_p13 }
  0x2e   : > { %10942 = shalt.err (!%p10939_p5)
}
  0x2f   : > { %s10943_s28 = scalar_lea.vmem %s11186_s2, 1024  ;;  %s11010_s18 = smov [#allocation2]  }
  0x30   : > { %p10944_p6 = scmp.ne.s32.totalorder %s11186_s2, %s10943_s28  ;;  %s10948_s19 = sshll.u32 %s11010_s18, 4  ;;  %s10949_s19 = int_to_ptr.vmem [resolvable:$false] %s10948_s19 }
  0x31   : > { %s10950_s29 = scalar_lea.vmem %s10949_s19, 2048  ;;  %p10951_p12 = scmp.lt.s32.totalorder %s11186_s2, %s10949_s19 }
  0x32   : > { %p10946_p8 = pnand %p10944_p6, %p10930_p11  ;;  %p10952_p0 = scmp.lt.s32.totalorder %s10950_s29, %s10943_s28 }
  0x34   : > { %p10947_p10 = pneg %p10946_p8  ;;  %p10953_p1 = por %p10952_p0, %p10951_p12 }
  0x36   : > { %p10954_p2 = pnand %p10953_p1, %p10947_p10 }
  0x38   : > { %10957 = shalt.err (!%p10954_p2)
}
  0x39   : > { %s11011_s17 = smov 64   ;;  %s11012_s25 = smov 4  }
  0x3a   : > { %10327 = dma.hbm_to_vmem [thread:$0]  (!%p11182_p9), %s11178_s4, 1024, %s11186_s2, %s11188_s24, %s11011_s17, %s11011_s17, %s11012_s25  }
  0x3b   : > { %p9083_p11 = scmp.ge.s32.totalorder %s11008_s22, 1  ;;  %p673_p13 = scmp.lt.s32.totalorder %s11008_s22, 3 }
  0x3d   : > { %p674_p3 = pnand %p9083_p11, %p673_p13 }
  0x3f   : > { %677 = sbr.rel (%p674_p3) target bundleno = 4181 (0x1055), region = 96 }
  0x46   : > { %s679_s0 = sand.u32 1, %s10992_s30  }
  0x47   : > { %s9084_s28 = sshll.u32 %s679_s0, 6  ;;  %s680_s18 = scalar_lea.sflag [#allocation3], %s679_s0 }
  0x48   : > { %s11219_s19 = scalar_lea.vmem [#allocation2], %s9084_s28 }
  0x49   : > { %10983 = dma.done.wait (%p11165_p7), %s680_s18, 1024  }
  0x4a   : > { %10985 = vsyncadd (%p11165_p7), %s680_s18, 4294966272  ;;  %p792_p4 = scmp.lt.s32.totalorder %s11000_s21, 1  ;;  %s13472_s5 = sld [smem:[#allocation17_spill]] }
  0x4b   : > { %s13473_s9 = sld [smem:[#allocation20_spill]]  ;;  %s13474_s6 = sld [smem:[#allocation18_spill]] }
  0x4c   : > { %s11227_s4 = scalar_select %p792_p4, %s11000_s21, 1 }
  0x4d   : > { %s13475_s10 = sld [smem:[#allocation21_spill]]  ;;  %p9091_p7 = scmp.ne.s32.totalorder %s11000_s21, 0 }
  0x4e   : > { %s10320_s2 = smul.u32 192, %s11227_s4  ;;  %s9582_s17 = sshll.u32 %s11227_s4, 7  ;;  %v1254_v32 = vlaneseq (!%p9091_p7)  ;;  %v11013_v37 = vmov (!%p9091_p7), 1983009808  }
  0x4f   : > { %s10321_s29 = smul.u32 3, %s11227_s4  ;;  %s9088_s30 = sshll.u32 %s11227_s4, 1  ;;  %v1252_v38 = vunpack.c.l.s4 (!%p9091_p7), %v11013_v37 }
  0x50   : > { %s11239_s28 = scalar_lea.vmem %s13472_s5, %s10320_s2  ;;  %s11260_s2 = scalar_lea.vmem %s13421_s11, %s9582_s17  ;;  %v1255_v39 = vshrl.u32 (!%p9091_p7), %v1254_v32, 7 }
  0x51   : > { %s11244_s23 = scalar_lea.vmem %s13473_s9, %s9582_s17  ;;  %s11249_s20 = scalar_lea.vmem %s13474_s6, %s10321_s29  ;;  %v1253_v42 = vunpack.c.0.s8 (!%p9091_p7), %v1252_v38 }
  0x52   : > { %s823_s1 = scalar_lea.vmem %s13423_s13, %s11227_s4  ;;  %843 = sbr.rel (%p9091_p7) target bundleno = 699 (0x2bb), region = 104 }
  0x53   : > { %s11255_s26 = scalar_lea.vmem %s13475_s10, %s9088_s30  ;;  %s13476_s7 = sld [smem:[#allocation15_spill]] (!%p9091_p7)  ;;  %v11400_v44 = vsub.s32 (!%p9091_p7), %v1253_v42, %v1255_v39 }
  0x54   : > { %s13477_s18 = sld [smem:[#allocation16_spill]] (!%p9091_p7)  ;;  %s13478_s3 = sld [smem:[#allocation13_spill]] (!%p9091_p7) }
  0x55   : > { %s13479_s17 = sld [smem:[#allocation24_spill]] (!%p9091_p7)  ;;  %s13480_s10 = sld [smem:[#allocation12_spill]] (!%p9091_p7) }
  0x56   : > { %s13481_s6 = sld [smem:[#allocation14_spill]] (!%p9091_p7) }
  0x59   : > { %v844_v0 = vld [vmem:[%s13476_s7] sm:$0x1] }
  0x5a   : > { %v845_v1 = vld [vmem:[%s13477_s18] sm:$0x1]  ;;  %v10392_v7 = vld [vmem:[%s13478_s3 + $0x48] sm:$0xff]   ;;  %v10396_v11 = vld [vmem:[%s13478_s3 + $0x50] sm:$0xff]  }
  0x5b   : > { %v846_v2 = vadd.f32 %v845_v1, %v844_v0  ;;  %v10388_v3 = vld [vmem:[%s13478_s3 + $0x40] sm:$0xff]   ;;  %v10393_v8 = vld [vmem:[%s13478_s3 + $0xc8] sm:$0xff]   ;;  %v10397_v12 = vld [vmem:[%s13478_s3 + $0xd0] sm:$0xff]  }
  0x5c   : > { %v10389_v4 = vld [vmem:[%s13478_s3 + $0xc0] sm:$0xff]   ;;  %9584 = vmatprep.subr.bf16.mxu0 %v10388_v3  ;;  %v10394_v9 = vld [vmem:[%s13478_s3 + $0x8] sm:$0xff]   ;;  %v10398_v13 = vld [vmem:[%s13478_s3 + $0x10] sm:$0xff]  }
  0x5d   : > { %3008 = vst [vmem:[%s13479_s17] sm:$0x1] %v846_v2  ;;  %9484 = vst [vmem:[%s13479_s17 + $0x8] sm:$0x1] %v846_v2  ;;  %v10390_v5 = vld [vmem:[%s13478_s3] sm:$0xff]   ;;  %9606 = vmatprep.subr.bf16.mxu1 %v10389_v4  ;;  %v10395_v10 = vld [vmem:[%s13478_s3 + $0x88] sm:$0xff]  }
  0x5e   : > { %v10391_v6 = vld [vmem:[%s13478_s3 + $0x80] sm:$0xff]   ;;  %9585 = vmatpush3.bf16.msra.mxu0 %v10390_v5  ;;  %v10399_v14 = vld [vmem:[%s13478_s3 + $0x90] sm:$0xff]   ;;  %v10400_v15 = vld [vmem:[%s13478_s3 + $0x58] sm:$0xff]  }
  0x5f   : > { %9607 = vmatpush3.bf16.msra.mxu1 %v10391_v6  ;;  %9586 = vmatprep.subr.bf16.mxu0 %v10392_v7  ;;  %v10401_v16 = vld [vmem:[%s13478_s3 + $0xd8] sm:$0xff]   ;;  %v10404_v19 = vld [vmem:[%s13478_s3 + $0x60] sm:$0xff]   ;;  %v10408_v23 = vld [vmem:[%s13478_s3 + $0x68] sm:$0xff]  }
  0x60   : > { %9608 = vmatprep.subr.bf16.mxu1 %v10393_v8  ;;  %v10402_v17 = vld [vmem:[%s13478_s3 + $0x18] sm:$0xff]   ;;  %v10405_v20 = vld [vmem:[%s13478_s3 + $0xe0] sm:$0xff]   ;;  %v10409_v24 = vld [vmem:[%s13478_s3 + $0xe8] sm:$0xff]  }
  0x61   : > { %v10403_v18 = vld [vmem:[%s13478_s3 + $0x98] sm:$0xff]   ;;  %v10406_v21 = vld [vmem:[%s13478_s3 + $0x20] sm:$0xff]   ;;  %v10410_v25 = vld [vmem:[%s13478_s3 + $0x28] sm:$0xff]  }
  0x62   : > { %9587 = vmatpush3.bf16.msra.mxu0 %v10394_v9  ;;  %v10407_v22 = vld [vmem:[%s13478_s3 + $0xa0] sm:$0xff]   ;;  %v10411_v26 = vld [vmem:[%s13478_s3 + $0xa8] sm:$0xff]   ;;  %v10412_v27 = vld [vmem:[%s13478_s3 + $0x70] sm:$0xff]  }
  0x63   : > { %9609 = vmatpush3.bf16.msra.mxu1 %v10395_v10  ;;  %9588 = vmatprep.subr.bf16.mxu0 %v10396_v11  ;;  %v10413_v28 = vld [vmem:[%s13478_s3 + $0xf0] sm:$0xff]   ;;  %v10416_v31 = vld [vmem:[%s13478_s3 + $0x78] sm:$0xff]   ;;  %v847_v36 = vld [vmem:[%s13480_s10] sm:$0xff] }
  0x64   : > { %9610 = vmatprep.subr.bf16.mxu1 %v10397_v12  ;;  %v10414_v29 = vld [vmem:[%s13478_s3 + $0x30] sm:$0xff]   ;;  %v10417_v33 = vld [vmem:[%s13478_s3 + $0xf8] sm:$0xff]   ;;  %v10421_v40 = vld [vmem:[%s13478_s3 + $0x140] sm:$0xff]   ;;  %v1250_v43 = vcombine.high %v847_v36, %v847_v36  ;;  %v1257_v45 = vrot.slane %v847_v36, %v11400_v44 }
  0x65   : > { %v10415_v30 = vld [vmem:[%s13478_s3 + $0xb0] sm:$0xff]   ;;  %v10418_v34 = vld [vmem:[%s13478_s3 + $0x38] sm:$0xff]   ;;  %v10422_v41 = vld [vmem:[%s13478_s3 + $0x1c0] sm:$0xff]  }
  0x66   : > { %9589 = vmatpush3.bf16.msra.mxu0 %v10398_v13  ;;  %v10419_v35 = vld [vmem:[%s13478_s3 + $0xb8] sm:$0xff]   ;;  %v1264_v46 = vrot.slane %v1250_v43, %v11400_v44  ;;  %v10423_v47 = vld [vmem:[%s13478_s3 + $0x100] sm:$0xff]   ;;  %v1265_v49 = vcombine.high %v1257_v45, %v1257_v45  ;;  %v10425_v51 = vld [vmem:[%s13478_s3 + $0x148] sm:$0xff]  }
  0x67   : > { %9611 = vmatpush3.bf16.msra.mxu1 %v10399_v14  ;;  %9590 = vmatprep.subr.bf16.mxu0 %v10400_v15  ;;  %v10424_v48 = vld [vmem:[%s13478_s3 + $0x180] sm:$0xff]   ;;  %v10426_v52 = vld [vmem:[%s13478_s3 + $0x1c8] sm:$0xff]   ;;  %v10429_v55 = vld [vmem:[%s13478_s3 + $0x150] sm:$0xff]  }
  0x68   : > { %9612 = vmatprep.subr.bf16.mxu1 %v10401_v16  ;;  %v1266_v50 = vcombine.high %v1264_v46, %v1264_v46  ;;  %2560 = vmatprep.mubr.bf16.mxu0 %v1265_v49  ;;  %v10427_v53 = vld [vmem:[%s13478_s3 + $0x108] sm:$0xff]   ;;  %v10430_v56 = vld [vmem:[%s13478_s3 + $0x1d0] sm:$0xff]   ;;  %v10433_v59 = vld [vmem:[%s13478_s3 + $0x158] sm:$0xff]  }
  0x69   : > { %v10428_v54 = vld [vmem:[%s13478_s3 + $0x188] sm:$0xff]   ;;  %v10431_v57 = vld [vmem:[%s13478_s3 + $0x110] sm:$0xff]   ;;  %v10434_v60 = vld [vmem:[%s13478_s3 + $0x1d8] sm:$0xff]  }
  0x6a   : > { %9591 = vmatpush3.bf16.msra.mxu0 %v10402_v17  ;;  %2600 = vmatprep.mubr.bf16.mxu1 %v1266_v50  ;;  %v10432_v58 = vld [vmem:[%s13478_s3 + $0x190] sm:$0xff]   ;;  %v10435_v61 = vld [vmem:[%s13478_s3 + $0x118] sm:$0xff]   ;;  %v10437_v63 = vld [vmem:[%s13478_s3 + $0x160] sm:$0xff]  }
  0x6b   : > { %9613 = vmatpush3.bf16.msra.mxu1 %v10403_v18  ;;  %9592 = vmatprep.subr.bf16.mxu0 %v10404_v19  ;;  %v10436_v62 = vld [vmem:[%s13478_s3 + $0x198] sm:$0xff]   ;;  %v10438_v0 = vld [vmem:[%s13478_s3 + $0x1e0] sm:$0xff]   ;;  %v10441_v3 = vld [vmem:[%s13478_s3 + $0x168] sm:$0xff]  }
  0x6c   : > { %9614 = vmatprep.subr.bf16.mxu1 %v10405_v20  ;;  %v10439_v1 = vld [vmem:[%s13478_s3 + $0x120] sm:$0xff]   ;;  %v10442_v4 = vld [vmem:[%s13478_s3 + $0x1e8] sm:$0xff]   ;;  %v10445_v7 = vld [vmem:[%s13478_s3 + $0x170] sm:$0xff]  }
  0x6d   : > { %v10440_v2 = vld [vmem:[%s13478_s3 + $0x1a0] sm:$0xff]   ;;  %v10443_v5 = vld [vmem:[%s13478_s3 + $0x128] sm:$0xff]   ;;  %v10446_v8 = vld [vmem:[%s13478_s3 + $0x1f0] sm:$0xff]  }
  0x6e   : > { %9593 = vmatpush3.bf16.msra.mxu0 %v10406_v21  ;;  %v10444_v6 = vld [vmem:[%s13478_s3 + $0x1a8] sm:$0xff]   ;;  %v10447_v9 = vld [vmem:[%s13478_s3 + $0x130] sm:$0xff]   ;;  %v10449_v11 = vld [vmem:[%s13478_s3 + $0x178] sm:$0xff]  }
  0x6f   : > { %9615 = vmatpush3.bf16.msra.mxu1 %v10407_v22  ;;  %9594 = vmatprep.subr.bf16.mxu0 %v10408_v23  ;;  %v10448_v10 = vld [vmem:[%s13478_s3 + $0x1b0] sm:$0xff]   ;;  %v848_v12 = vld [vmem:[%s13480_s10 + $0x8] sm:$0xff]  ;;  %v10450_v13 = vld [vmem:[%s13478_s3 + $0x1f8] sm:$0xff]  }
  0x70   : > { %9616 = vmatprep.subr.bf16.mxu1 %v10409_v24  ;;  %v1274_v14 = vrot.slane %v848_v12, %v11400_v44  ;;  %v1267_v15 = vcombine.high %v848_v12, %v848_v12  ;;  %v10451_v16 = vld [vmem:[%s13478_s3 + $0x138] sm:$0xff]   ;;  %v10454_v20 = vld [vmem:[%s13478_s3 + $0x240] sm:$0xff]   ;;  %v10465_v32 = vld [vmem:[%s13478_s3 + $0x290] sm:$0xff]  }
  0x71   : > { %v10452_v17 = vld [vmem:[%s13478_s3 + $0x1b8] sm:$0xff]   ;;  %v10455_v22 = vld [vmem:[%s13478_s3 + $0x2c0] sm:$0xff]   ;;  %v10475_v42 = vld [vmem:[%s13478_s3 + $0x2e8] sm:$0xff]  }
  0x72   : > { %9595 = vmatpush3.bf16.msra.mxu0 %v10410_v25  ;;  %v1282_v18 = vcombine.high %v1274_v14, %v1274_v14  ;;  %v1281_v19 = vrot.slane %v1267_v15, %v11400_v44  ;;  %v10456_v23 = vld [vmem:[%s13478_s3 + $0x200] sm:$0xff]   ;;  %v10458_v25 = vld [vmem:[%s13478_s3 + $0x248] sm:$0xff]   ;;  %v10469_v36 = vld [vmem:[%s13478_s3 + $0x298] sm:$0xff]  }
  0x73   : > { %9617 = vmatpush3.bf16.msra.mxu1 %v10411_v26  ;;  %9596 = vmatprep.subr.bf16.mxu0 %v10412_v27  ;;  %v10457_v24 = vld [vmem:[%s13478_s3 + $0x280] sm:$0xff]   ;;  %v10459_v26 = vld [vmem:[%s13478_s3 + $0x2c8] sm:$0xff]   ;;  %v10481_v49 = vld [vmem:[%s13478_s3 + $0x2b0] sm:$0xff]  }
  0x74   : > { %9618 = vmatprep.subr.bf16.mxu1 %v10413_v28  ;;  %v1283_v21 = vcombine.high %v1281_v19, %v1281_v19  ;;  %v10460_v27 = vld [vmem:[%s13478_s3 + $0x208] sm:$0xff]   ;;  %v10470_v37 = vld [vmem:[%s13478_s3 + $0x260] sm:$0xff]   ;;  %v10482_v50 = vld [vmem:[%s13478_s3 + $0x278] sm:$0xff]  }
  0x75   : > { %v10461_v28 = vld [vmem:[%s13478_s3 + $0x288] sm:$0xff]   ;;  %v10471_v38 = vld [vmem:[%s13478_s3 + $0x2e0] sm:$0xff]  }
  0x76   : > { %9597 = vmatpush3.bf16.msra.mxu0 %v10414_v29  ;;  %v10462_v29 = vld [vmem:[%s13478_s3 + $0x250] sm:$0xff]   ;;  %v10472_v39 = vld [vmem:[%s13478_s3 + $0x220] sm:$0xff]   ;;  %v10476_v43 = vld [vmem:[%s13478_s3 + $0x228] sm:$0xff]  }
  0x77   : > { %9619 = vmatpush3.bf16.msra.mxu1 %v10415_v30  ;;  %9598 = vmatprep.subr.bf16.mxu0 %v10416_v31  ;;  %v10463_v30 = vld [vmem:[%s13478_s3 + $0x2d0] sm:$0xff]   ;;  %v10503_v12 = vld [vmem:[%s13478_s3 + $0x360] sm:$0xff]  }
  0x78   : > { %9620 = vmatprep.subr.bf16.mxu1 %v10417_v33  ;;  %v10464_v31 = vld [vmem:[%s13478_s3 + $0x210] sm:$0xff]   ;;  %v10466_v33 = vld [vmem:[%s13478_s3 + $0x258] sm:$0xff]   ;;  %v10506_v15 = vld [vmem:[%s13478_s3 + $0x3a0] sm:$0xff]  }
  0x7a   : > { %9599 = vmatpush3.bf16.msra.mxu0 %v10418_v34  ;;  %v10467_v34 = vld [vmem:[%s13478_s3 + $0x2d8] sm:$0xff]  }
  0x7b   : > { %9621 = vmatpush3.bf16.msra.mxu1 %v10419_v35  ;;  %9628 = vmatprep.subr.bf16.mxu0 %v10421_v40  ;;  %v10468_v35 = vld [vmem:[%s13478_s3 + $0x218] sm:$0xff]   ;;  %v10473_v40 = vld [vmem:[%s13478_s3 + $0x2a0] sm:$0xff]  }
  0x7c   : > { %9650 = vmatprep.subr.bf16.mxu1 %v10422_v41  ;;  %v10474_v41 = vld [vmem:[%s13478_s3 + $0x268] sm:$0xff]  }
  0x7d   : > { %2561 = vmatmul.mubr.bf16.vlgmr.msra.gmra.mrb[0].mxu0 %v1257_v45  ;;  %v10477_v45 = vld [vmem:[%s13478_s3 + $0x2a8] sm:$0xff]  }
  0x7e   : > { %2601 = vmatmul.mubr.bf16.vlgmr.msra.gmra.mrb[0].mxu1 %v1264_v46  ;;  %9629 = vmatpush3.bf16.msra.mxu0 %v10423_v47  ;;  %v10478_v46 = vld [vmem:[%s13478_s3 + $0x270] sm:$0xff]  }
  0x7f   : > { %9651 = vmatpush3.bf16.msra.mxu1 %v10424_v48  ;;  %9630 = vmatprep.subr.bf16.mxu0 %v10425_v51  ;;  %v10479_v47 = vld [vmem:[%s13478_s3 + $0x2f0] sm:$0xff]  }
  0x80   : > { %9652 = vmatprep.subr.bf16.mxu1 %v10426_v52  ;;  %2640 = vmatprep.mubr.bf16.mxu0 %v1282_v18  ;;  %v10480_v48 = vld [vmem:[%s13478_s3 + $0x230] sm:$0xff]   ;;  %v10483_v52 = vld [vmem:[%s13478_s3 + $0x2f8] sm:$0xff]   ;;  %v10509_v18 = vld [vmem:[%s13478_s3 + $0x328] sm:$0xff]  }
  0x81   : > { %2680 = vmatprep.mubr.bf16.mxu1 %v1283_v21  ;;  %v849_v51 = vld [vmem:[%s13480_s10 + $0x10] sm:$0xff] }
  0x82   : > { %9631 = vmatpush3.bf16.msra.mxu0 %v10427_v53  ;;  %v1291_v53 = vrot.slane %v849_v51, %v11400_v44  ;;  %v10512_v21 = vld [vmem:[%s13478_s3 + $0x3f0] sm:$0xff]  }
  0x83   : > { %9653 = vmatpush3.bf16.msra.mxu1 %v10428_v54  ;;  %9632 = vmatprep.subr.bf16.mxu0 %v10429_v55  ;;  %v1284_v54 = vcombine.high %v849_v51, %v849_v51  ;;  %v10484_v55 = vld [vmem:[%s13478_s3 + $0x238] sm:$0xff]   ;;  %v10536_v51 = vld [vmem:[%s13478_s3 + $0x460] sm:$0xff]  }
  0x84   : > { %9654 = vmatprep.subr.bf16.mxu1 %v10430_v56  ;;  %v10485_v56 = vld [vmem:[%s13478_s3 + $0x2b8] sm:$0xff]  }
  0x86   : > { %9633 = vmatpush3.bf16.msra.mxu0 %v10431_v57  ;;  %v1299_v57 = vcombine.high %v1291_v53, %v1291_v53 }
  0x87   : > { %9655 = vmatpush3.bf16.msra.mxu1 %v10432_v58  ;;  %9634 = vmatprep.subr.bf16.mxu0 %v10433_v59  ;;  %v1298_v58 = vrot.slane %v1284_v54, %v11400_v44  ;;  %v10487_v59 = vld [vmem:[%s13478_s3 + $0x340] sm:$0xff]  }
  0x88   : > { %9656 = vmatprep.subr.bf16.mxu1 %v10434_v60  ;;  %v10539_v54 = vld [vmem:[%s13478_s3 + $0x4a0] sm:$0xff]  }
  0x89   : > { %v1300_v60 = vcombine.high %v1298_v58, %v1298_v58 }
  0x8a   : > { %9635 = vmatpush3.bf16.msra.mxu0 %v10435_v61  ;;  %v10488_v61 = vld [vmem:[%s13478_s3 + $0x3c0] sm:$0xff]  }
  0x8b   : > { %9657 = vmatpush3.bf16.msra.mxu1 %v10436_v62  ;;  %9636 = vmatprep.subr.bf16.mxu0 %v10437_v63  ;;  %v10489_v62 = vld [vmem:[%s13478_s3 + $0x300] sm:$0xff]  }
  0x8c   : > { %9658 = vmatprep.subr.bf16.mxu1 %v10438_v0  ;;  %v10490_v63 = vld [vmem:[%s13478_s3 + $0x380] sm:$0xff]   ;;  %v10491_v0 = vld [vmem:[%s13478_s3 + $0x348] sm:$0xff]  }
  0x8e   : > { %9637 = vmatpush3.bf16.msra.mxu0 %v10439_v1  ;;  %v10492_v1 = vld [vmem:[%s13478_s3 + $0x3c8] sm:$0xff]  }
  0x8f   : > { %9659 = vmatpush3.bf16.msra.mxu1 %v10440_v2  ;;  %9638 = vmatprep.subr.bf16.mxu0 %v10441_v3  ;;  %v10493_v2 = vld [vmem:[%s13478_s3 + $0x308] sm:$0xff]  }
  0x90   : > { %9660 = vmatprep.subr.bf16.mxu1 %v10442_v4  ;;  %v10494_v3 = vld [vmem:[%s13478_s3 + $0x388] sm:$0xff]   ;;  %v10495_v4 = vld [vmem:[%s13478_s3 + $0x350] sm:$0xff]  }
  0x92   : > { %9639 = vmatpush3.bf16.msra.mxu0 %v10443_v5  ;;  %v10496_v5 = vld [vmem:[%s13478_s3 + $0x3d0] sm:$0xff]  }
  0x93   : > { %9661 = vmatpush3.bf16.msra.mxu1 %v10444_v6  ;;  %9640 = vmatprep.subr.bf16.mxu0 %v10445_v7  ;;  %v10497_v6 = vld [vmem:[%s13478_s3 + $0x310] sm:$0xff]  }
  0x94   : > { %9662 = vmatprep.subr.bf16.mxu1 %v10446_v8  ;;  %v10498_v7 = vld [vmem:[%s13478_s3 + $0x390] sm:$0xff]   ;;  %v10499_v8 = vld [vmem:[%s13478_s3 + $0x358] sm:$0xff]  }
  0x96   : > { %9641 = vmatpush3.bf16.msra.mxu0 %v10447_v9  ;;  %v10500_v9 = vld [vmem:[%s13478_s3 + $0x3d8] sm:$0xff]  }
  0x97   : > { %9663 = vmatpush3.bf16.msra.mxu1 %v10448_v10  ;;  %9642 = vmatprep.subr.bf16.mxu0 %v10449_v11  ;;  %v10501_v10 = vld [vmem:[%s13478_s3 + $0x318] sm:$0xff]  }
  0x98   : > { %9664 = vmatprep.subr.bf16.mxu1 %v10450_v13  ;;  %v10502_v11 = vld [vmem:[%s13478_s3 + $0x398] sm:$0xff]   ;;  %v10504_v13 = vld [vmem:[%s13478_s3 + $0x3e0] sm:$0xff]  }
  0x9a   : > { %9643 = vmatpush3.bf16.msra.mxu0 %v10451_v16  ;;  %v10507_v16 = vld [vmem:[%s13478_s3 + $0x368] sm:$0xff]  }
  0x9b   : > { %9665 = vmatpush3.bf16.msra.mxu1 %v10452_v17  ;;  %9672 = vmatprep.subr.bf16.mxu0 %v10454_v20  ;;  %v10508_v17 = vld [vmem:[%s13478_s3 + $0x3e8] sm:$0xff]   ;;  %v10511_v20 = vld [vmem:[%s13478_s3 + $0x370] sm:$0xff]  }
  0x9c   : > { %9694 = vmatprep.subr.bf16.mxu1 %v10455_v22  ;;  %v10513_v22 = vld [vmem:[%s13478_s3 + $0x330] sm:$0xff]  }
  0x9d   : > { %2641 = vmatmul.mubr.bf16.vlgmr.msra.gmra.mrb[4].mxu0 %v1274_v14  ;;  %v10505_v14 = vld [vmem:[%s13478_s3 + $0x320] sm:$0xff]  }
  0x9e   : > { %2681 = vmatmul.mubr.bf16.vlgmr.msra.gmra.mrb[4].mxu1 %v1281_v19  ;;  %9673 = vmatpush3.bf16.msra.mxu0 %v10456_v23  ;;  %v10510_v19 = vld [vmem:[%s13478_s3 + $0x3a8] sm:$0xff]   ;;  %v10514_v23 = vld [vmem:[%s13478_s3 + $0x3b0] sm:$0xff]  }
  0x9f   : > { %9695 = vmatpush3.bf16.msra.mxu1 %v10457_v24  ;;  %9674 = vmatprep.subr.bf16.mxu0 %v10458_v25  ;;  %v10515_v24 = vld [vmem:[%s13478_s3 + $0x378] sm:$0xff]  }
  0xa0   : > { %9696 = vmatprep.subr.bf16.mxu1 %v10459_v26  ;;  %2720 = vmatprep.mubr.bf16.mxu0 %v1299_v57  ;;  %v850_v25 = vld [vmem:[%s13480_s10 + $0x18] sm:$0xff]  ;;  %v10542_v57 = vld [vmem:[%s13478_s3 + $0x428] sm:$0xff]  }
  0xa1   : > { %2760 = vmatprep.mubr.bf16.mxu1 %v1300_v60  ;;  %v10516_v26 = vld [vmem:[%s13478_s3 + $0x3f8] sm:$0xff]   ;;  %v10545_v60 = vld [vmem:[%s13478_s3 + $0x4f0] sm:$0xff]  }
  0xa2   : > { %9675 = vmatpush3.bf16.msra.mxu0 %v10460_v27  ;;  %v1308_v27 = vrot.slane %v850_v25, %v11400_v44 }
  0xa3   : > { %9697 = vmatpush3.bf16.msra.mxu1 %v10461_v28  ;;  %9676 = vmatprep.subr.bf16.mxu0 %v10462_v29  ;;  %v1301_v28 = vcombine.high %v850_v25, %v850_v25  ;;  %v10517_v29 = vld [vmem:[%s13478_s3 + $0x338] sm:$0xff]   ;;  %v10569_v25 = vld [vmem:[%s13478_s3 + $0x560] sm:$0xff]  }
  0xa4   : > { %9698 = vmatprep.subr.bf16.mxu1 %v10463_v30  ;;  %v10518_v30 = vld [vmem:[%s13478_s3 + $0x3b8] sm:$0xff]  }
  0xa6   : > { %9677 = vmatpush3.bf16.msra.mxu0 %v10464_v31  ;;  %v1316_v31 = vcombine.high %v1308_v27, %v1308_v27 }
  0xa7   : > { %9699 = vmatpush3.bf16.msra.mxu1 %v10465_v32  ;;  %9678 = vmatprep.subr.bf16.mxu0 %v10466_v33  ;;  %v1315_v32 = vrot.slane %v1301_v28, %v11400_v44  ;;  %v10520_v33 = vld [vmem:[%s13478_s3 + $0x440] sm:$0xff]  }
  0xa8   : > { %9700 = vmatprep.subr.bf16.mxu1 %v10467_v34  ;;  %v10572_v28 = vld [vmem:[%s13478_s3 + $0x5a0] sm:$0xff]  }
  0xa9   : > { %v1317_v34 = vcombine.high %v1315_v32, %v1315_v32 }
  0xaa   : > { %9679 = vmatpush3.bf16.msra.mxu0 %v10468_v35  ;;  %v10521_v35 = vld [vmem:[%s13478_s3 + $0x4c0] sm:$0xff]  }
  0xab   : > { %9701 = vmatpush3.bf16.msra.mxu1 %v10469_v36  ;;  %9680 = vmatprep.subr.bf16.mxu0 %v10470_v37  ;;  %v10522_v36 = vld [vmem:[%s13478_s3 + $0x400] sm:$0xff]  }
  0xac   : > { %9702 = vmatprep.subr.bf16.mxu1 %v10471_v38  ;;  %v10523_v37 = vld [vmem:[%s13478_s3 + $0x480] sm:$0xff]   ;;  %v10524_v38 = vld [vmem:[%s13478_s3 + $0x448] sm:$0xff]  }
  0xae   : > { %9681 = vmatpush3.bf16.msra.mxu0 %v10472_v39  ;;  %v10525_v39 = vld [vmem:[%s13478_s3 + $0x4c8] sm:$0xff]  }
  0xaf   : > { %9703 = vmatpush3.bf16.msra.mxu1 %v10473_v40  ;;  %9682 = vmatprep.subr.bf16.mxu0 %v10474_v41  ;;  %v10526_v40 = vld [vmem:[%s13478_s3 + $0x408] sm:$0xff]  }
  0xb0   : > { %9704 = vmatprep.subr.bf16.mxu1 %v10475_v42  ;;  %v10527_v41 = vld [vmem:[%s13478_s3 + $0x488] sm:$0xff]   ;;  %v10528_v42 = vld [vmem:[%s13478_s3 + $0x450] sm:$0xff]  }
  0xb2   : > { %9683 = vmatpush3.bf16.msra.mxu0 %v10476_v43  ;;  %v10529_v43 = vld [vmem:[%s13478_s3 + $0x4d0] sm:$0xff]  }
  0xb3   : > { %9705 = vmatpush3.bf16.msra.mxu1 %v10477_v45  ;;  %9684 = vmatprep.subr.bf16.mxu0 %v10478_v46  ;;  %v10530_v45 = vld [vmem:[%s13478_s3 + $0x410] sm:$0xff]  }
  0xb4   : > { %9706 = vmatprep.subr.bf16.mxu1 %v10479_v47  ;;  %v10531_v46 = vld [vmem:[%s13478_s3 + $0x490] sm:$0xff]   ;;  %v10532_v47 = vld [vmem:[%s13478_s3 + $0x458] sm:$0xff]  }
  0xb6   : > { %9685 = vmatpush3.bf16.msra.mxu0 %v10480_v48  ;;  %v10533_v48 = vld [vmem:[%s13478_s3 + $0x4d8] sm:$0xff]  }
  0xb7   : > { %9707 = vmatpush3.bf16.msra.mxu1 %v10481_v49  ;;  %9686 = vmatprep.subr.bf16.mxu0 %v10482_v50  ;;  %v10534_v49 = vld [vmem:[%s13478_s3 + $0x418] sm:$0xff]  }
  0xb8   : > { %9708 = vmatprep.subr.bf16.mxu1 %v10483_v52  ;;  %v10535_v50 = vld [vmem:[%s13478_s3 + $0x498] sm:$0xff]   ;;  %v10537_v52 = vld [vmem:[%s13478_s3 + $0x4e0] sm:$0xff]  }
  0xba   : > { %9687 = vmatpush3.bf16.msra.mxu0 %v10484_v55  ;;  %v10540_v55 = vld [vmem:[%s13478_s3 + $0x468] sm:$0xff]  }
  0xbb   : > { %9709 = vmatpush3.bf16.msra.mxu1 %v10485_v56  ;;  %9716 = vmatprep.subr.bf16.mxu0 %v10487_v59  ;;  %v10541_v56 = vld [vmem:[%s13478_s3 + $0x4e8] sm:$0xff]   ;;  %v10544_v59 = vld [vmem:[%s13478_s3 + $0x470] sm:$0xff]  }
  0xbc   : > { %9738 = vmatprep.subr.bf16.mxu1 %v10488_v61  ;;  %v10546_v61 = vld [vmem:[%s13478_s3 + $0x430] sm:$0xff]  }
  0xbd   : > { %2721 = vmatmul.mubr.bf16.vlgmr.msra.gmra.mrb[8].mxu0 %v1291_v53  ;;  %v10538_v53 = vld [vmem:[%s13478_s3 + $0x420] sm:$0xff]  }
  0xbe   : > { %2761 = vmatmul.mubr.bf16.vlgmr.msra.gmra.mrb[8].mxu1 %v1298_v58  ;;  %9717 = vmatpush3.bf16.msra.mxu0 %v10489_v62  ;;  %v10543_v58 = vld [vmem:[%s13478_s3 + $0x4a8] sm:$0xff]   ;;  %v10547_v62 = vld [vmem:[%s13478_s3 + $0x4b0] sm:$0xff]  }
  0xbf   : > { %9739 = vmatpush3.bf16.msra.mxu1 %v10490_v63  ;;  %9718 = vmatprep.subr.bf16.mxu0 %v10491_v0  ;;  %v10548_v63 = vld [vmem:[%s13478_s3 + $0x478] sm:$0xff]  }
  0xc0   : > { %9740 = vmatprep.subr.bf16.mxu1 %v10492_v1  ;;  %2800 = vmatprep.mubr.bf16.mxu0 %v1316_v31  ;;  %v10549_v0 = vld [vmem:[%s13478_s3 + $0x4f8] sm:$0xff]   ;;  %v851_v1 = vld [vmem:[%s13480_s10 + $0x20] sm:$0xff]  ;;  %v10575_v31 = vld [vmem:[%s13478_s3 + $0x528] sm:$0xff]  }
  0xc1   : > { %2840 = vmatprep.mubr.bf16.mxu1 %v1317_v34  ;;  %v10578_v34 = vld [vmem:[%s13478_s3 + $0x5f0] sm:$0xff]  }
  0xc2   : > { %9719 = vmatpush3.bf16.msra.mxu0 %v10493_v2  ;;  %v10550_v2 = vld [vmem:[%s13478_s3 + $0x438] sm:$0xff]  }
  0xc3   : > { %9741 = vmatpush3.bf16.msra.mxu1 %v10494_v3  ;;  %9720 = vmatprep.subr.bf16.mxu0 %v10495_v4  ;;  %v1325_v3 = vrot.slane %v851_v1, %v11400_v44  ;;  %v1318_v4 = vcombine.high %v851_v1, %v851_v1  ;;  %v10603_v1 = vld [vmem:[%s13478_s3 + $0xe0] sm:$0xff]  }
  0xc4   : > { %9742 = vmatprep.subr.bf16.mxu1 %v10496_v5  ;;  %v10551_v5 = vld [vmem:[%s13478_s3 + $0x4b8] sm:$0xff]  }
  0xc6   : > { %9721 = vmatpush3.bf16.msra.mxu0 %v10497_v6  ;;  %v1333_v6 = vcombine.high %v1325_v3, %v1325_v3 }
  0xc7   : > { %9743 = vmatpush3.bf16.msra.mxu1 %v10498_v7  ;;  %9722 = vmatprep.subr.bf16.mxu0 %v10499_v8  ;;  %v1332_v7 = vrot.slane %v1318_v4, %v11400_v44  ;;  %v10553_v8 = vld [vmem:[%s13478_s3 + $0x540] sm:$0xff]   ;;  %v10606_v4 = vld [vmem:[%s13478_s3 + $0x68] sm:$0xff]  }
  0xc8   : > { %9744 = vmatprep.subr.bf16.mxu1 %v10500_v9  ;;  %v10554_v9 = vld [vmem:[%s13478_s3 + $0x5c0] sm:$0xff]  }
  0xca   : > { %9723 = vmatpush3.bf16.msra.mxu0 %v10501_v10  ;;  %v1334_v10 = vcombine.high %v1332_v7, %v1332_v7 }
  0xcb   : > { %9745 = vmatpush3.bf16.msra.mxu1 %v10502_v11  ;;  %9724 = vmatprep.subr.bf16.mxu0 %v10503_v12  ;;  %v10555_v11 = vld [vmem:[%s13478_s3 + $0x500] sm:$0xff]  }
  0xcc   : > { %9746 = vmatprep.subr.bf16.mxu1 %v10504_v13  ;;  %v10556_v12 = vld [vmem:[%s13478_s3 + $0x580] sm:$0xff]   ;;  %v10557_v13 = vld [vmem:[%s13478_s3 + $0x548] sm:$0xff]  }
  0xce   : > { %9725 = vmatpush3.bf16.msra.mxu0 %v10505_v14  ;;  %v10558_v14 = vld [vmem:[%s13478_s3 + $0x5c8] sm:$0xff]  }
  0xcf   : > { %9747 = vmatpush3.bf16.msra.mxu1 %v10506_v15  ;;  %9726 = vmatprep.subr.bf16.mxu0 %v10507_v16  ;;  %v10559_v15 = vld [vmem:[%s13478_s3 + $0x508] sm:$0xff]  }
  0xd0   : > { %9748 = vmatprep.subr.bf16.mxu1 %v10508_v17  ;;  %v10560_v16 = vld [vmem:[%s13478_s3 + $0x588] sm:$0xff]   ;;  %v10561_v17 = vld [vmem:[%s13478_s3 + $0x550] sm:$0xff]  }
  0xd2   : > { %9727 = vmatpush3.bf16.msra.mxu0 %v10509_v18  ;;  %v10562_v18 = vld [vmem:[%s13478_s3 + $0x5d0] sm:$0xff]  }
  0xd3   : > { %9749 = vmatpush3.bf16.msra.mxu1 %v10510_v19  ;;  %9728 = vmatprep.subr.bf16.mxu0 %v10511_v20  ;;  %v10563_v19 = vld [vmem:[%s13478_s3 + $0x510] sm:$0xff]  }
  0xd4   : > { %9750 = vmatprep.subr.bf16.mxu1 %v10512_v21  ;;  %v10564_v20 = vld [vmem:[%s13478_s3 + $0x590] sm:$0xff]   ;;  %v10565_v21 = vld [vmem:[%s13478_s3 + $0x558] sm:$0xff]  }
  0xd6   : > { %9729 = vmatpush3.bf16.msra.mxu0 %v10513_v22  ;;  %v10566_v22 = vld [vmem:[%s13478_s3 + $0x5d8] sm:$0xff]  }
  0xd7   : > { %9751 = vmatpush3.bf16.msra.mxu1 %v10514_v23  ;;  %9730 = vmatprep.subr.bf16.mxu0 %v10515_v24  ;;  %v10567_v23 = vld [vmem:[%s13478_s3 + $0x518] sm:$0xff]  }
  0xd8   : > { %9752 = vmatprep.subr.bf16.mxu1 %v10516_v26  ;;  %v10568_v24 = vld [vmem:[%s13478_s3 + $0x598] sm:$0xff]   ;;  %v10570_v26 = vld [vmem:[%s13478_s3 + $0x5e0] sm:$0xff]  }
  0xda   : > { %9731 = vmatpush3.bf16.msra.mxu0 %v10517_v29  ;;  %v10573_v29 = vld [vmem:[%s13478_s3 + $0x568] sm:$0xff]  }
  0xdb   : > { %9753 = vmatpush3.bf16.msra.mxu1 %v10518_v30  ;;  %9760 = vmatprep.subr.bf16.mxu0 %v10520_v33  ;;  %v10574_v30 = vld [vmem:[%s13478_s3 + $0x5e8] sm:$0xff]   ;;  %v10577_v33 = vld [vmem:[%s13478_s3 + $0x570] sm:$0xff]  }
  0xdc   : > { %9782 = vmatprep.subr.bf16.mxu1 %v10521_v35  ;;  %v10579_v35 = vld [vmem:[%s13478_s3 + $0x530] sm:$0xff]  }
  0xdd   : > { %2801 = vmatmul.mubr.bf16.vlgmr.msra.gmra.mrb[12].mxu0 %v1308_v27  ;;  %v10571_v27 = vld [vmem:[%s13478_s3 + $0x520] sm:$0xff]  }
  0xde   : > { %2841 = vmatmul.mubr.bf16.vlgmr.msra.gmra.mrb[12].mxu1 %v1315_v32  ;;  %9761 = vmatpush3.bf16.msra.mxu0 %v10522_v36  ;;  %v10576_v32 = vld [vmem:[%s13478_s3 + $0x5a8] sm:$0xff]   ;;  %v10580_v36 = vld [vmem:[%s13478_s3 + $0x5b0] sm:$0xff]  }
  0xdf   : > { %9783 = vmatpush3.bf16.msra.mxu1 %v10523_v37  ;;  %9762 = vmatprep.subr.bf16.mxu0 %v10524_v38  ;;  %v10581_v37 = vld [vmem:[%s13478_s3 + $0x578] sm:$0xff]  }
  0xe0   : > { %9784 = vmatprep.subr.bf16.mxu1 %v10525_v39  ;;  %2880 = vmatprep.mubr.bf16.mxu0 %v1333_v6  ;;  %v10582_v38 = vld [vmem:[%s13478_s3 + $0x5f8] sm:$0xff]   ;;  %v852_v39 = vld [vmem:[%s13480_s10 + $0x28] sm:$0xff] }
  0xe1   : > { %2920 = vmatprep.mubr.bf16.mxu1 %v1334_v10  ;;  %v10608_v6 = vld [vmem:[%s13478_s3 + $0x28] sm:$0xff]   ;;  %v10612_v10 = vld [vmem:[%s13478_s3 + $0x30] sm:$0xff]  }
  0xe2   : > { %9763 = vmatpush3.bf16.msra.mxu0 %v10526_v40  ;;  %v10583_v40 = vld [vmem:[%s13478_s3 + $0x538] sm:$0xff]  }
  0xe3   : > { %9785 = vmatpush3.bf16.msra.mxu1 %v10527_v41  ;;  %9764 = vmatprep.subr.bf16.mxu0 %v10528_v42  ;;  %v1342_v41 = vrot.slane %v852_v39, %v11400_v44  ;;  %v1335_v42 = vcombine.high %v852_v39, %v852_v39  ;;  %v10636_v39 = vld [vmem:[%s13478_s3 + $0x1e0] sm:$0xff]  }
  0xe4   : > { %9786 = vmatprep.subr.bf16.mxu1 %v10529_v43  ;;  %v10584_v43 = vld [vmem:[%s13478_s3 + $0x5b8] sm:$0xff]  }
  0xe6   : > { %9765 = vmatpush3.bf16.msra.mxu0 %v10530_v45  ;;  %v1350_v45 = vcombine.high %v1342_v41, %v1342_v41 }
  0xe7   : > { %9787 = vmatpush3.bf16.msra.mxu1 %v10531_v46  ;;  %9766 = vmatprep.subr.bf16.mxu0 %v10532_v47  ;;  %v1349_v46 = vrot.slane %v1335_v42, %v11400_v44  ;;  %v10586_v47 = vld [vmem:[%s13478_s3 + $0x40] sm:$0xff]   ;;  %v10639_v42 = vld [vmem:[%s13478_s3 + $0x168] sm:$0xff]  }
  0xe8   : > { %9788 = vmatprep.subr.bf16.mxu1 %v10533_v48  ;;  %v10587_v48 = vld [vmem:[%s13478_s3 + $0xc0] sm:$0xff]  }
  0xea   : > { %9767 = vmatpush3.bf16.msra.mxu0 %v10534_v49  ;;  %v1351_v49 = vcombine.high %v1349_v46, %v1349_v46 }
  0xeb   : > { %9789 = vmatpush3.bf16.msra.mxu1 %v10535_v50  ;;  %9768 = vmatprep.subr.bf16.mxu0 %v10536_v51  ;;  %v10588_v50 = vld [vmem:[%s13478_s3] sm:$0xff]  }
  0xec   : > { %9790 = vmatprep.subr.bf16.mxu1 %v10537_v52  ;;  %v10589_v51 = vld [vmem:[%s13478_s3 + $0x80] sm:$0xff]   ;;  %v10590_v52 = vld [vmem:[%s13478_s3 + $0x48] sm:$0xff]  }
  0xee   : > { %9769 = vmatpush3.bf16.msra.mxu0 %v10538_v53  ;;  %v10591_v53 = vld [vmem:[%s13478_s3 + $0xc8] sm:$0xff]  }
  0xef   : > { %9791 = vmatpush3.bf16.msra.mxu1 %v10539_v54  ;;  %9770 = vmatprep.subr.bf16.mxu0 %v10540_v55  ;;  %v10592_v54 = vld [vmem:[%s13478_s3 + $0x8] sm:$0xff]  }
  0xf0   : > { %9792 = vmatprep.subr.bf16.mxu1 %v10541_v56  ;;  %v10593_v55 = vld [vmem:[%s13478_s3 + $0x88] sm:$0xff]   ;;  %v10594_v56 = vld [vmem:[%s13478_s3 + $0x50] sm:$0xff]  }
  0xf2   : > { %9771 = vmatpush3.bf16.msra.mxu0 %v10542_v57  ;;  %v10595_v57 = vld [vmem:[%s13478_s3 + $0xd0] sm:$0xff]  }
  0xf3   : > { %9793 = vmatpush3.bf16.msra.mxu1 %v10543_v58  ;;  %9772 = vmatprep.subr.bf16.mxu0 %v10544_v59  ;;  %v10596_v58 = vld [vmem:[%s13478_s3 + $0x10] sm:$0xff]  }
  0xf4   : > { %9794 = vmatprep.subr.bf16.mxu1 %v10545_v60  ;;  %v10597_v59 = vld [vmem:[%s13478_s3 + $0x90] sm:$0xff]   ;;  %v10598_v60 = vld [vmem:[%s13478_s3 + $0x58] sm:$0xff]  }
  0xf6   : > { %9773 = vmatpush3.bf16.msra.mxu0 %v10546_v61  ;;  %v10599_v61 = vld [vmem:[%s13478_s3 + $0xd8] sm:$0xff]  }
  0xf7   : > { %9795 = vmatpush3.bf16.msra.mxu1 %v10547_v62  ;;  %9774 = vmatprep.subr.bf16.mxu0 %v10548_v63  ;;  %v10600_v62 = vld [vmem:[%s13478_s3 + $0x18] sm:$0xff]  }
  0xf8   : > { %9796 = vmatprep.subr.bf16.mxu1 %v10549_v0  ;;  %v10601_v63 = vld [vmem:[%s13478_s3 + $0x98] sm:$0xff]   ;;  %v10602_v0 = vld [vmem:[%s13478_s3 + $0x60] sm:$0xff]  }
  0xfa   : > { %9775 = vmatpush3.bf16.msra.mxu0 %v10550_v2  ;;  %v10604_v2 = vld [vmem:[%s13478_s3 + $0x20] sm:$0xff]  }
  0xfb   : > { %9797 = vmatpush3.bf16.msra.mxu1 %v10551_v5  ;;  %9804 = vmatprep.subr.bf16.mxu0 %v10553_v8  ;;  %v10607_v5 = vld [vmem:[%s13478_s3 + $0xe8] sm:$0xff]   ;;  %v10610_v8 = vld [vmem:[%s13478_s3 + $0x70] sm:$0xff]  }
  0xfc   : > { %9826 = vmatprep.subr.bf16.mxu1 %v10554_v9  ;;  %v10611_v9 = vld [vmem:[%s13478_s3 + $0xf0] sm:$0xff]  }
  0xfd   : > { %2881 = vmatmul.mubr.bf16.vlgmr.msra.gmra.mrb[16].mxu0 %v1325_v3  ;;  %v10605_v3 = vld [vmem:[%s13478_s3 + $0xa0] sm:$0xff]  }
  0xfe   : > { %2921 = vmatmul.mubr.bf16.vlgmr.msra.gmra.mrb[16].mxu1 %v1332_v7  ;;  %9805 = vmatpush3.bf16.msra.mxu0 %v10555_v11  ;;  %v10609_v7 = vld [vmem:[%s13478_s3 + $0xa8] sm:$0xff]   ;;  %v10613_v11 = vld [vmem:[%s13478_s3 + $0xb0] sm:$0xff]  }
  0xff   : > { %9827 = vmatpush3.bf16.msra.mxu1 %v10556_v12  ;;  %9806 = vmatprep.subr.bf16.mxu0 %v10557_v13  ;;  %v10614_v12 = vld [vmem:[%s13478_s3 + $0x78] sm:$0xff]  }
 0x100   : > { %9828 = vmatprep.subr.bf16.mxu1 %v10558_v14  ;;  %2960 = vmatprep.mubr.bf16.mxu0 %v1350_v45  ;;  %v10615_v13 = vld [vmem:[%s13478_s3 + $0xf8] sm:$0xff]   ;;  %v9285_v14 = vld [vmem:[%s13480_s10 + $0x30] sm:$0xff]  ;;  %v10641_v45 = vld [vmem:[%s13478_s3 + $0x128] sm:$0xff]  }
 0x101   : > { %3000 = vmatprep.mubr.bf16.mxu1 %v1351_v49  ;;  %v10644_v49 = vld [vmem:[%s13478_s3 + $0x1f0] sm:$0xff]  }
 0x102   : > { %9807 = vmatpush3.bf16.msra.mxu0 %v10559_v15  ;;  %v10616_v15 = vld [vmem:[%s13478_s3 + $0x38] sm:$0xff]  }
 0x103   : > { %9829 = vmatpush3.bf16.msra.mxu1 %v10560_v16  ;;  %9808 = vmatprep.subr.bf16.mxu0 %v10561_v17  ;;  %v3423_v16 = vrot.slane %v9285_v14, %v11400_v44  ;;  %v3416_v17 = vcombine.high %v9285_v14, %v9285_v14  ;;  %v10656_v14 = vld [vmem:[%s13478_s3 + $0x248] sm:$0xff]  }
 0x104   : > { %9830 = vmatprep.subr.bf16.mxu1 %v10562_v18  ;;  %v10617_v18 = vld [vmem:[%s13478_s3 + $0xb8] sm:$0xff]  }
 0x106   : > { %9809 = vmatpush3.bf16.msra.mxu0 %v10563_v19  ;;  %v3431_v19 = vcombine.high %v3423_v16, %v3423_v16 }
 0x107   : > { %9831 = vmatpush3.bf16.msra.mxu1 %v10564_v20  ;;  %9810 = vmatprep.subr.bf16.mxu0 %v10565_v21  ;;  %v3430_v20 = vrot.slane %v3416_v17, %v11400_v44  ;;  %v10619_v21 = vld [vmem:[%s13478_s3 + $0x140] sm:$0xff]   ;;  %v10659_v17 = vld [vmem:[%s13478_s3 + $0x288] sm:$0xff]  }
 0x108   : > { %9832 = vmatprep.subr.bf16.mxu1 %v10566_v22  ;;  %v10620_v22 = vld [vmem:[%s13478_s3 + $0x1c0] sm:$0xff]  }
 0x10a   : > { %9811 = vmatpush3.bf16.msra.mxu0 %v10567_v23  ;;  %v3432_v23 = vcombine.high %v3430_v20, %v3430_v20 }
 0x10b   : > { %9833 = vmatpush3.bf16.msra.mxu1 %v10568_v24  ;;  %9812 = vmatprep.subr.bf16.mxu0 %v10569_v25  ;;  %v10621_v24 = vld [vmem:[%s13478_s3 + $0x100] sm:$0xff]  }
 0x10c   : > { %9834 = vmatprep.subr.bf16.mxu1 %v10570_v26  ;;  %v10622_v25 = vld [vmem:[%s13478_s3 + $0x180] sm:$0xff]   ;;  %v10623_v26 = vld [vmem:[%s13478_s3 + $0x148] sm:$0xff]  }
 0x10e   : > { %9813 = vmatpush3.bf16.msra.mxu0 %v10571_v27  ;;  %v10624_v27 = vld [vmem:[%s13478_s3 + $0x1c8] sm:$0xff]  }
 0x10f   : > { %9835 = vmatpush3.bf16.msra.mxu1 %v10572_v28  ;;  %9814 = vmatprep.subr.bf16.mxu0 %v10573_v29  ;;  %v10625_v28 = vld [vmem:[%s13478_s3 + $0x108] sm:$0xff]  }
 0x110   : > { %9836 = vmatprep.subr.bf16.mxu1 %v10574_v30  ;;  %v10626_v29 = vld [vmem:[%s13478_s3 + $0x188] sm:$0xff]   ;;  %v10627_v30 = vld [vmem:[%s13478_s3 + $0x150] sm:$0xff]  }
 0x112   : > { %9815 = vmatpush3.bf16.msra.mxu0 %v10575_v31  ;;  %v10628_v31 = vld [vmem:[%s13478_s3 + $0x1d0] sm:$0xff]  }
 0x113   : > { %9837 = vmatpush3.bf16.msra.mxu1 %v10576_v32  ;;  %9816 = vmatprep.subr.bf16.mxu0 %v10577_v33  ;;  %v10629_v32 = vld [vmem:[%s13478_s3 + $0x110] sm:$0xff]  }
 0x114   : > { %9838 = vmatprep.subr.bf16.mxu1 %v10578_v34  ;;  %v10630_v33 = vld [vmem:[%s13478_s3 + $0x190] sm:$0xff]   ;;  %v10631_v34 = vld [vmem:[%s13478_s3 + $0x158] sm:$0xff]  }
 0x116   : > { %9817 = vmatpush3.bf16.msra.mxu0 %v10579_v35  ;;  %v10632_v35 = vld [vmem:[%s13478_s3 + $0x1d8] sm:$0xff]  }
 0x117   : > { %9839 = vmatpush3.bf16.msra.mxu1 %v10580_v36  ;;  %9818 = vmatprep.subr.bf16.mxu0 %v10581_v37  ;;  %v10633_v36 = vld [vmem:[%s13478_s3 + $0x118] sm:$0xff]  }
 0x118   : > { %9840 = vmatprep.subr.bf16.mxu1 %v10582_v38  ;;  %v10634_v37 = vld [vmem:[%s13478_s3 + $0x198] sm:$0xff]   ;;  %v10635_v38 = vld [vmem:[%s13478_s3 + $0x160] sm:$0xff]  }
 0x11a   : > { %9819 = vmatpush3.bf16.msra.mxu0 %v10583_v40  ;;  %v10637_v40 = vld [vmem:[%s13478_s3 + $0x120] sm:$0xff]  }
 0x11b   : > { %9841 = vmatpush3.bf16.msra.mxu1 %v10584_v43  ;;  %9848 = vmatprep.subr.bf16.mxu0 %v10586_v47  ;;  %v10640_v43 = vld [vmem:[%s13478_s3 + $0x1e8] sm:$0xff]   ;;  %v10643_v47 = vld [vmem:[%s13478_s3 + $0x170] sm:$0xff]  }
 0x11c   : > { %9870 = vmatprep.subr.bf16.mxu1 %v10587_v48  ;;  %v9092_v48 = vld [vmem:[%s13481_s6] ss:$0 sm:$0xff] }
 0x11d   : > { %2961 = vmatmul.mubr.bf16.vlgmr.msra.gmra.mrb[20].mxu0 %v1342_v41  ;;  %v10638_v41 = vld [vmem:[%s13478_s3 + $0x1a0] sm:$0xff]  }
 0x11e   : > { %3001 = vmatmul.mubr.bf16.vlgmr.msra.gmra.mrb[20].mxu1 %v1349_v46  ;;  %9849 = vmatpush3.bf16.msra.mxu0 %v10588_v50  ;;  %v10642_v46 = vld [vmem:[%s13478_s3 + $0x1a8] sm:$0xff]  }
 0x11f   : > { %9871 = vmatpush3.bf16.msra.mxu1 %v10589_v51  ;;  %9850 = vmatprep.subr.bf16.mxu0 %v10590_v52  ;;  %v10645_v52 = vld [vmem:[%s13478_s3 + $0x130] sm:$0xff]  }
 0x120   : > { %9872 = vmatprep.subr.bf16.mxu1 %v10591_v53  ;;  %4726 = vmatprep.mubr.bf16.mxu0 %v3431_v19  ;;  %v10646_v53 = vld [vmem:[%s13478_s3 + $0x1b0] sm:$0xff]  }
 0x121   : > { %4766 = vmatprep.mubr.bf16.mxu1 %v3432_v23  ;;  %v10661_v19 = vld [vmem:[%s13478_s3 + $0x2d0] sm:$0xff]   ;;  %v10665_v23 = vld [vmem:[%s13478_s3 + $0x2d8] sm:$0xff]  }
 0x122   : > { %9851 = vmatpush3.bf16.msra.mxu0 %v10592_v54 }
 0x123   : > { %9873 = vmatpush3.bf16.msra.mxu1 %v10593_v55  ;;  %9852 = vmatprep.subr.bf16.mxu0 %v10594_v56 }
 0x124   : > { %9874 = vmatprep.subr.bf16.mxu1 %v10595_v57 }
 0x126   : > { %9853 = vmatpush3.bf16.msra.mxu0 %v10596_v58 }
 0x127   : > { %9875 = vmatpush3.bf16.msra.mxu1 %v10597_v59  ;;  %9854 = vmatprep.subr.bf16.mxu0 %v10598_v60  ;;  %v10647_v60 = vld [vmem:[%s13478_s3 + $0x178] sm:$0xff]  }
 0x128   : > { %9876 = vmatprep.subr.bf16.mxu1 %v10599_v61  ;;  %v10648_v61 = vld [vmem:[%s13478_s3 + $0x1f8] sm:$0xff]  }
 0x12a   : > { %9855 = vmatpush3.bf16.msra.mxu0 %v10600_v62 }
 0x12b   : > { %9877 = vmatpush3.bf16.msra.mxu1 %v10601_v63  ;;  %9856 = vmatprep.subr.bf16.mxu0 %v10602_v0 }
 0x12c   : > { %9878 = vmatprep.subr.bf16.mxu1 %v10603_v1  ;;  %v10649_v1 = vld [vmem:[%s13478_s3 + $0x138] sm:$0xff]  }
 0x12e   : > { %9857 = vmatpush3.bf16.msra.mxu0 %v10604_v2  ;;  %v10650_v2 = vld [vmem:[%s13478_s3 + $0x1b8] sm:$0xff]  }
 0x12f   : > { %9879 = vmatpush3.bf16.msra.mxu1 %v10605_v3  ;;  %9858 = vmatprep.subr.bf16.mxu0 %v10606_v4  ;;  %v9286_v3 = vld [vmem:[%s13480_s10 + $0x38] sm:$0xff] }
 0x130   : > { %9880 = vmatprep.subr.bf16.mxu1 %v10607_v5  ;;  %v3440_v5 = vrot.slane %v9286_v3, %v11400_v44 }
 0x132   : > { %9859 = vmatpush3.bf16.msra.mxu0 %v10608_v6  ;;  %v3433_v6 = vcombine.high %v9286_v3, %v9286_v3  ;;  %v10691_v3 = vld [vmem:[%s13478_s3 + $0x308] sm:$0xff]  }
 0x133   : > { %9881 = vmatpush3.bf16.msra.mxu1 %v10609_v7  ;;  %9860 = vmatprep.subr.bf16.mxu0 %v10610_v8  ;;  %v10652_v7 = vld [vmem:[%s13478_s3 + $0x240] sm:$0xff]  }
 0x134   : > { %9882 = vmatprep.subr.bf16.mxu1 %v10611_v9  ;;  %v10653_v8 = vld [vmem:[%s13478_s3 + $0x2c0] sm:$0xff]   ;;  %v3448_v9 = vcombine.high %v3440_v5, %v3440_v5 }
 0x136   : > { %9861 = vmatpush3.bf16.msra.mxu0 %v10612_v10  ;;  %v3447_v10 = vrot.slane %v3433_v6, %v11400_v44  ;;  %v10694_v6 = vld [vmem:[%s13478_s3 + $0x3d0] sm:$0xff]  }
 0x137   : > { %9883 = vmatpush3.bf16.msra.mxu1 %v10613_v11  ;;  %9862 = vmatprep.subr.bf16.mxu0 %v10614_v12  ;;  %v10654_v11 = vld [vmem:[%s13478_s3 + $0x200] sm:$0xff]  }
 0x138   : > { %9884 = vmatprep.subr.bf16.mxu1 %v10615_v13  ;;  %v10655_v12 = vld [vmem:[%s13478_s3 + $0x280] sm:$0xff]   ;;  %v3449_v13 = vcombine.high %v3447_v10, %v3447_v10 }
 0x13a   : > { %9863 = vmatpush3.bf16.msra.mxu0 %v10616_v15  ;;  %v10657_v15 = vld [vmem:[%s13478_s3 + $0x2c8] sm:$0xff]  }
 0x13b   : > { %9885 = vmatpush3.bf16.msra.mxu1 %v10617_v18  ;;  %9892 = vmatprep.subr.bf16.mxu0 %v10619_v21  ;;  %v10660_v18 = vld [vmem:[%s13478_s3 + $0x250] sm:$0xff]  }
 0x13c   : > { %9914 = vmatprep.subr.bf16.mxu1 %v10620_v22  ;;  %v10663_v21 = vld [vmem:[%s13478_s3 + $0x290] sm:$0xff]   ;;  %v10664_v22 = vld [vmem:[%s13478_s3 + $0x258] sm:$0xff]  }
 0x13d   : > { %4727 = vmatmul.mubr.bf16.vlgmr.msra.gmra.mrb[24].mxu0 %v3423_v16  ;;  %v10658_v16 = vld [vmem:[%s13478_s3 + $0x208] sm:$0xff]  }
 0x13e   : > { %4767 = vmatmul.mubr.bf16.vlgmr.msra.gmra.mrb[24].mxu1 %v3430_v20  ;;  %9893 = vmatpush3.bf16.msra.mxu0 %v10621_v24  ;;  %v10662_v20 = vld [vmem:[%s13478_s3 + $0x210] sm:$0xff]   ;;  %v10666_v24 = vld [vmem:[%s13478_s3 + $0x218] sm:$0xff]  }
 0x13f   : > { %9915 = vmatpush3.bf16.msra.mxu1 %v10622_v25  ;;  %9894 = vmatprep.subr.bf16.mxu0 %v10623_v26  ;;  %v10667_v25 = vld [vmem:[%s13478_s3 + $0x298] sm:$0xff]   ;;  %v10668_v26 = vld [vmem:[%s13478_s3 + $0x260] sm:$0xff]  }
 0x140   : > { %9916 = vmatprep.subr.bf16.mxu1 %v10624_v27  ;;  %4806 = vmatprep.mubr.bf16.mxu0 %v3448_v9  ;;  %v10669_v27 = vld [vmem:[%s13478_s3 + $0x2e0] sm:$0xff]   ;;  %v10697_v9 = vld [vmem:[%s13478_s3 + $0x358] sm:$0xff]  }
 0x141   : > { %4846 = vmatprep.mubr.bf16.mxu1 %v3449_v13  ;;  %v10701_v13 = vld [vmem:[%s13478_s3 + $0x360] sm:$0xff]  }
 0x142   : > { %9895 = vmatpush3.bf16.msra.mxu0 %v10625_v28  ;;  %v10670_v28 = vld [vmem:[%s13478_s3 + $0x220] sm:$0xff]  }
 0x143   : > { %9917 = vmatpush3.bf16.msra.mxu1 %v10626_v29  ;;  %9896 = vmatprep.subr.bf16.mxu0 %v10627_v30  ;;  %v10671_v29 = vld [vmem:[%s13478_s3 + $0x2a0] sm:$0xff]   ;;  %v10672_v30 = vld [vmem:[%s13478_s3 + $0x268] sm:$0xff]  }
 0x144   : > { %9918 = vmatprep.subr.bf16.mxu1 %v10628_v31  ;;  %v10673_v31 = vld [vmem:[%s13478_s3 + $0x2e8] sm:$0xff]  }
 0x146   : > { %9897 = vmatpush3.bf16.msra.mxu0 %v10629_v32  ;;  %v10674_v32 = vld [vmem:[%s13478_s3 + $0x228] sm:$0xff]  }
 0x147   : > { %9919 = vmatpush3.bf16.msra.mxu1 %v10630_v33  ;;  %9898 = vmatprep.subr.bf16.mxu0 %v10631_v34  ;;  %v10675_v33 = vld [vmem:[%s13478_s3 + $0x2a8] sm:$0xff]   ;;  %v10676_v34 = vld [vmem:[%s13478_s3 + $0x270] sm:$0xff]  }
 0x148   : > { %9920 = vmatprep.subr.bf16.mxu1 %v10632_v35  ;;  %v10677_v35 = vld [vmem:[%s13478_s3 + $0x2f0] sm:$0xff]  }
 0x14a   : > { %9899 = vmatpush3.bf16.msra.mxu0 %v10633_v36 }
 0x14b   : > { %9921 = vmatpush3.bf16.msra.mxu1 %v10634_v37  ;;  %9900 = vmatprep.subr.bf16.mxu0 %v10635_v38  ;;  %v10678_v38 = vld [vmem:[%s13478_s3 + $0x230] sm:$0xff]  }
 0x14c   : > { %9922 = vmatprep.subr.bf16.mxu1 %v10636_v39  ;;  %v10679_v39 = vld [vmem:[%s13478_s3 + $0x2b0] sm:$0xff]  }
 0x14e   : > { %9901 = vmatpush3.bf16.msra.mxu0 %v10637_v40 }
 0x14f   : > { %9923 = vmatpush3.bf16.msra.mxu1 %v10638_v41  ;;  %9902 = vmatprep.subr.bf16.mxu0 %v10639_v42 }
 0x150   : > { %9924 = vmatprep.subr.bf16.mxu1 %v10640_v43  ;;  %v9600_v50 = vpop.f32.mrb[0].mxu0 }
 0x151   : > { %v9622_v51 = vpop.f32.mrb[0].mxu1  ;;  %v9601_v54 = vpop.f32.mrb[1].mxu0 }
 0x152   : > { %v9623_v55 = vpop.f32.mrb[1].mxu1  ;;  %v9602_v56 = vadd.f32 %v9601_v54, %v9600_v50  ;;  %v9603_v58 = vpop.f32.mrb[2].mxu0  ;;  %9903 = vmatpush3.bf16.msra.mxu0 %v10641_v45 }
 0x153   : > { %v9624_v57 = vadd.f32 %v9623_v55, %v9622_v51  ;;  %v9625_v59 = vpop.f32.mrb[2].mxu1  ;;  %9925 = vmatpush3.bf16.msra.mxu1 %v10642_v46  ;;  %v9604_v62 = vpop.f32.mrb[3].mxu0  ;;  %9904 = vmatprep.subr.bf16.mxu0 %v10643_v47  ;;  %v10680_v47 = vld [vmem:[%s13478_s3 + $0x278] sm:$0xff]   ;;  %v9287_v55 = vld [vmem:[%s13480_s10 + $0x40] sm:$0xff] }
 0x154   : > { %v9626_v63 = vpop.f32.mrb[3].mxu1  ;;  %9926 = vmatprep.subr.bf16.mxu1 %v10644_v49  ;;  %v2563_v0 = vadd.f32 %v9602_v56, %v9092_v48  ;;  %v10681_v48 = vld [vmem:[%s13478_s3 + $0x2f8] sm:$0xff]   ;;  %v3457_v56 = vrot.slane %v9287_v55, %v11400_v44  ;;  %v10685_v58 = vld [vmem:[%s13478_s3 + $0x340] sm:$0xff]  }
 0x155   : > { %v10686_v59 = vld [vmem:[%s13478_s3 + $0x3c0] sm:$0xff]  }
 0x156   : > { %v12106_v4 = vadd.f32 %v9624_v57, %v2563_v0  ;;  %9905 = vmatpush3.bf16.msra.mxu0 %v10645_v52  ;;  %v10682_v52 = vld [vmem:[%s13478_s3 + $0x238] sm:$0xff]   ;;  %v3450_v57 = vcombine.high %v9287_v55, %v9287_v55  ;;  %v10687_v62 = vld [vmem:[%s13478_s3 + $0x300] sm:$0xff]   ;;  %v10725_v55 = vld [vmem:[%s13478_s3 + $0x488] sm:$0xff]  }
 0x157   : > { %9927 = vmatpush3.bf16.msra.mxu1 %v10646_v53  ;;  %9906 = vmatprep.subr.bf16.mxu0 %v10647_v60  ;;  %v10683_v53 = vld [vmem:[%s13478_s3 + $0x2b8] sm:$0xff]   ;;  %v3465_v60 = vcombine.high %v3457_v56, %v3457_v56  ;;  %v10688_v63 = vld [vmem:[%s13478_s3 + $0x380] sm:$0xff]  }
 0x158   : > { %9928 = vmatprep.subr.bf16.mxu1 %v10648_v61  ;;  %v3464_v61 = vrot.slane %v3450_v57, %v11400_v44  ;;  %v10727_v57 = vld [vmem:[%s13478_s3 + $0x4d0] sm:$0xff]  }
 0x15a   : > { %9907 = vmatpush3.bf16.msra.mxu0 %v10649_v1  ;;  %v3466_v0 = vcombine.high %v3464_v61, %v3464_v61  ;;  %v10689_v1 = vld [vmem:[%s13478_s3 + $0x348] sm:$0xff]  }
 0x15b   : > { %9929 = vmatpush3.bf16.msra.mxu1 %v10650_v2  ;;  %9936 = vmatprep.subr.bf16.mxu0 %v10652_v7  ;;  %v10690_v2 = vld [vmem:[%s13478_s3 + $0x3c8] sm:$0xff]   ;;  %v10695_v7 = vld [vmem:[%s13478_s3 + $0x310] sm:$0xff]  }
 0x15c   : > { %9958 = vmatprep.subr.bf16.mxu1 %v10653_v8  ;;  %v10696_v8 = vld [vmem:[%s13478_s3 + $0x390] sm:$0xff]  }
 0x15d   : > { %4807 = vmatmul.mubr.bf16.vlgmr.msra.gmra.mrb[28].mxu0 %v3440_v5  ;;  %v10693_v5 = vld [vmem:[%s13478_s3 + $0x350] sm:$0xff]  }
 0x15e   : > { %4847 = vmatmul.mubr.bf16.vlgmr.msra.gmra.mrb[28].mxu1 %v3447_v10  ;;  %9937 = vmatpush3.bf16.msra.mxu0 %v10654_v11  ;;  %v10698_v10 = vld [vmem:[%s13478_s3 + $0x3d8] sm:$0xff]  }
 0x15f   : > { %9959 = vmatpush3.bf16.msra.mxu1 %v10655_v12  ;;  %9938 = vmatprep.subr.bf16.mxu0 %v10656_v14  ;;  %v10699_v11 = vld [vmem:[%s13478_s3 + $0x318] sm:$0xff]   ;;  %v10702_v14 = vld [vmem:[%s13478_s3 + $0x3e0] sm:$0xff]  }
 0x160   : > { %9960 = vmatprep.subr.bf16.mxu1 %v10657_v15  ;;  %4886 = vmatprep.mubr.bf16.mxu0 %v3465_v60  ;;  %v10700_v12 = vld [vmem:[%s13478_s3 + $0x398] sm:$0xff]   ;;  %v10703_v15 = vld [vmem:[%s13478_s3 + $0x320] sm:$0xff]  }
 0x161   : > { %4926 = vmatprep.mubr.bf16.mxu1 %v3466_v0  ;;  %v10730_v60 = vld [vmem:[%s13478_s3 + $0x458] sm:$0xff]   ;;  %v10734_v0 = vld [vmem:[%s13478_s3 + $0x460] sm:$0xff]  }
 0x162   : > { %9939 = vmatpush3.bf16.msra.mxu0 %v10658_v16  ;;  %v10704_v16 = vld [vmem:[%s13478_s3 + $0x3a0] sm:$0xff]  }
 0x163   : > { %9961 = vmatpush3.bf16.msra.mxu1 %v10659_v17  ;;  %9940 = vmatprep.subr.bf16.mxu0 %v10660_v18  ;;  %v10705_v17 = vld [vmem:[%s13478_s3 + $0x368] sm:$0xff]  }
 0x164   : > { %9962 = vmatprep.subr.bf16.mxu1 %v10661_v19  ;;  %v10706_v18 = vld [vmem:[%s13478_s3 + $0x3e8] sm:$0xff]  }
 0x165   : > { %v10707_v19 = vld [vmem:[%s13478_s3 + $0x328] sm:$0xff]  }
 0x166   : > { %9941 = vmatpush3.bf16.msra.mxu0 %v10662_v20  ;;  %v10708_v20 = vld [vmem:[%s13478_s3 + $0x3a8] sm:$0xff]  }
 0x167   : > { %9963 = vmatpush3.bf16.msra.mxu1 %v10663_v21  ;;  %9942 = vmatprep.subr.bf16.mxu0 %v10664_v22  ;;  %v10709_v21 = vld [vmem:[%s13478_s3 + $0x370] sm:$0xff]  }
 0x168   : > { %9964 = vmatprep.subr.bf16.mxu1 %v10665_v23 }
 0x16a   : > { %9943 = vmatpush3.bf16.msra.mxu0 %v10666_v24  ;;  %v10710_v24 = vld [vmem:[%s13478_s3 + $0x3f0] sm:$0xff]  }
 0x16b   : > { %9965 = vmatpush3.bf16.msra.mxu1 %v10667_v25  ;;  %9944 = vmatprep.subr.bf16.mxu0 %v10668_v26  ;;  %v10711_v25 = vld [vmem:[%s13478_s3 + $0x330] sm:$0xff]  }
 0x16c   : > { %9966 = vmatprep.subr.bf16.mxu1 %v10669_v27 }
 0x16e   : > { %9945 = vmatpush3.bf16.msra.mxu0 %v10670_v28 }
 0x16f   : > { %9967 = vmatpush3.bf16.msra.mxu1 %v10671_v29  ;;  %9946 = vmatprep.subr.bf16.mxu0 %v10672_v30 }
 0x170   : > { %9968 = vmatprep.subr.bf16.mxu1 %v10673_v31  ;;  %v9644_v36 = vpop.f32.mrb[4].mxu0 }
 0x171   : > { %v9666_v37 = vpop.f32.mrb[4].mxu1  ;;  %v9645_v40 = vpop.f32.mrb[5].mxu0 }
 0x172   : > { %v9667_v41 = vpop.f32.mrb[5].mxu1  ;;  %v9646_v42 = vadd.f32 %v9645_v40, %v9644_v36  ;;  %v9647_v45 = vpop.f32.mrb[6].mxu0  ;;  %9947 = vmatpush3.bf16.msra.mxu0 %v10674_v32  ;;  %v10712_v32 = vld [vmem:[%s13478_s3 + $0x3b0] sm:$0xff]   ;;  %v10716_v40 = vld [vmem:[%s13478_s3 + $0x3b8] sm:$0xff]  }
 0x173   : > { %v9668_v43 = vadd.f32 %v9667_v41, %v9666_v37  ;;  %v9669_v46 = vpop.f32.mrb[6].mxu1  ;;  %9969 = vmatpush3.bf16.msra.mxu1 %v10675_v33  ;;  %v9648_v49 = vpop.f32.mrb[7].mxu0  ;;  %9948 = vmatprep.subr.bf16.mxu0 %v10676_v34  ;;  %v10713_v33 = vld [vmem:[%s13478_s3 + $0x378] sm:$0xff]   ;;  %v9288_v41 = vld [vmem:[%s13480_s10 + $0x48] sm:$0xff]  ;;  %v10718_v45 = vld [vmem:[%s13478_s3 + $0x440] sm:$0xff]  }
 0x174   : > { %v9670_v50 = vpop.f32.mrb[7].mxu1  ;;  %9970 = vmatprep.subr.bf16.mxu1 %v10677_v35  ;;  %v2643_v51 = vadd.f32 %v9646_v42, %v12106_v4  ;;  %v10692_v4 = vld [vmem:[%s13478_s3 + $0x388] sm:$0xff]   ;;  %v10714_v37 = vld [vmem:[%s13478_s3 + $0x3f8] sm:$0xff]   ;;  %v3474_v42 = vrot.slane %v9288_v41, %v11400_v44  ;;  %v10719_v46 = vld [vmem:[%s13478_s3 + $0x4c0] sm:$0xff]  }
 0x175   : > { %v10720_v49 = vld [vmem:[%s13478_s3 + $0x400] sm:$0xff]  }
 0x176   : > { %v12207_v54 = vadd.f32 %v9668_v43, %v2643_v51  ;;  %9949 = vmatpush3.bf16.msra.mxu0 %v10678_v38  ;;  %v10715_v38 = vld [vmem:[%s13478_s3 + $0x338] sm:$0xff]   ;;  %v3467_v43 = vcombine.high %v9288_v41, %v9288_v41  ;;  %v10721_v50 = vld [vmem:[%s13478_s3 + $0x480] sm:$0xff]   ;;  %v10758_v41 = vld [vmem:[%s13478_s3 + $0x588] sm:$0xff]  }
 0x177   : > { %9971 = vmatpush3.bf16.msra.mxu1 %v10679_v39  ;;  %9950 = vmatprep.subr.bf16.mxu0 %v10680_v47  ;;  %v3482_v47 = vcombine.high %v3474_v42, %v3474_v42 }
 0x178   : > { %9972 = vmatprep.subr.bf16.mxu1 %v10681_v48  ;;  %v3481_v48 = vrot.slane %v3467_v43, %v11400_v44  ;;  %v10760_v43 = vld [vmem:[%s13478_s3 + $0x5d0] sm:$0xff]  }
 0x17a   : > { %9951 = vmatpush3.bf16.msra.mxu0 %v10682_v52  ;;  %v3483_v51 = vcombine.high %v3481_v48, %v3481_v48  ;;  %v10722_v52 = vld [vmem:[%s13478_s3 + $0x448] sm:$0xff]  }
 0x17b   : > { %9973 = vmatpush3.bf16.msra.mxu1 %v10683_v53  ;;  %9980 = vmatprep.subr.bf16.mxu0 %v10685_v58  ;;  %v10723_v53 = vld [vmem:[%s13478_s3 + $0x4c8] sm:$0xff]   ;;  %v10728_v58 = vld [vmem:[%s13478_s3 + $0x410] sm:$0xff]  }
 0x17c   : > { %10002 = vmatprep.subr.bf16.mxu1 %v10686_v59  ;;  %v10729_v59 = vld [vmem:[%s13478_s3 + $0x490] sm:$0xff]  }
 0x17d   : > { %4887 = vmatmul.mubr.bf16.vlgmr.msra.gmra.mrb[32].mxu0 %v3457_v56  ;;  %v10726_v56 = vld [vmem:[%s13478_s3 + $0x450] sm:$0xff]  }
 0x17e   : > { %4927 = vmatmul.mubr.bf16.vlgmr.msra.gmra.mrb[32].mxu1 %v3464_v61  ;;  %9981 = vmatpush3.bf16.msra.mxu0 %v10687_v62  ;;  %v10731_v61 = vld [vmem:[%s13478_s3 + $0x4d8] sm:$0xff]  }
 0x17f   : > { %10003 = vmatpush3.bf16.msra.mxu1 %v10688_v63  ;;  %9982 = vmatprep.subr.bf16.mxu0 %v10689_v1  ;;  %v10732_v62 = vld [vmem:[%s13478_s3 + $0x418] sm:$0xff]   ;;  %v10735_v1 = vld [vmem:[%s13478_s3 + $0x4e0] sm:$0xff]  }
 0x180   : > { %10004 = vmatprep.subr.bf16.mxu1 %v10690_v2  ;;  %4966 = vmatprep.mubr.bf16.mxu0 %v3482_v47  ;;  %v10733_v63 = vld [vmem:[%s13478_s3 + $0x498] sm:$0xff]   ;;  %v10736_v2 = vld [vmem:[%s13478_s3 + $0x420] sm:$0xff]  }
 0x181   : > { %5006 = vmatprep.mubr.bf16.mxu1 %v3483_v51  ;;  %v10763_v47 = vld [vmem:[%s13478_s3 + $0x558] sm:$0xff]   ;;  %v10767_v51 = vld [vmem:[%s13478_s3 + $0x560] sm:$0xff]  }
 0x182   : > { %9983 = vmatpush3.bf16.msra.mxu0 %v10691_v3  ;;  %v10737_v3 = vld [vmem:[%s13478_s3 + $0x4a0] sm:$0xff]  }
 0x183   : > { %10005 = vmatpush3.bf16.msra.mxu1 %v10692_v4  ;;  %9984 = vmatprep.subr.bf16.mxu0 %v10693_v5  ;;  %v10738_v4 = vld [vmem:[%s13478_s3 + $0x468] sm:$0xff]  }
 0x184   : > { %10006 = vmatprep.subr.bf16.mxu1 %v10694_v6  ;;  %v10739_v5 = vld [vmem:[%s13478_s3 + $0x4e8] sm:$0xff]  }
 0x185   : > { %v10740_v6 = vld [vmem:[%s13478_s3 + $0x428] sm:$0xff]  }
 0x186   : > { %9985 = vmatpush3.bf16.msra.mxu0 %v10695_v7  ;;  %v10741_v7 = vld [vmem:[%s13478_s3 + $0x4a8] sm:$0xff]  }
 0x187   : > { %10007 = vmatpush3.bf16.msra.mxu1 %v10696_v8  ;;  %9986 = vmatprep.subr.bf16.mxu0 %v10697_v9 }
 0x188   : > { %10008 = vmatprep.subr.bf16.mxu1 %v10698_v10  ;;  %v10742_v10 = vld [vmem:[%s13478_s3 + $0x470] sm:$0xff]  }
 0x18a   : > { %9987 = vmatpush3.bf16.msra.mxu0 %v10699_v11  ;;  %v10743_v11 = vld [vmem:[%s13478_s3 + $0x4f0] sm:$0xff]  }
 0x18b   : > { %10009 = vmatpush3.bf16.msra.mxu1 %v10700_v12  ;;  %9988 = vmatprep.subr.bf16.mxu0 %v10701_v13 }
 0x18c   : > { %10010 = vmatprep.subr.bf16.mxu1 %v10702_v14 }
 0x18e   : > { %9989 = vmatpush3.bf16.msra.mxu0 %v10703_v15 }
 0x18f   : > { %10011 = vmatpush3.bf16.msra.mxu1 %v10704_v16  ;;  %9990 = vmatprep.subr.bf16.mxu0 %v10705_v17 }
 0x190   : > { %v9688_v22 = vpop.f32.mrb[8].mxu0  ;;  %10012 = vmatprep.subr.bf16.mxu1 %v10706_v18  ;;  %v10744_v18 = vld [vmem:[%s13478_s3 + $0x430] sm:$0xff]  }
 0x191   : > { %v9710_v23 = vpop.f32.mrb[8].mxu1  ;;  %v9689_v26 = vpop.f32.mrb[9].mxu0 }
 0x192   : > { %v9711_v27 = vpop.f32.mrb[9].mxu1  ;;  %v9690_v28 = vadd.f32 %v9689_v26, %v9688_v22  ;;  %v9691_v30 = vpop.f32.mrb[10].mxu0  ;;  %9991 = vmatpush3.bf16.msra.mxu0 %v10707_v19  ;;  %v10745_v19 = vld [vmem:[%s13478_s3 + $0x4b0] sm:$0xff]   ;;  %v10748_v26 = vld [vmem:[%s13478_s3 + $0x438] sm:$0xff]  }
 0x193   : > { %v9712_v29 = vadd.f32 %v9711_v27, %v9710_v23  ;;  %v9713_v31 = vpop.f32.mrb[10].mxu1  ;;  %10013 = vmatpush3.bf16.msra.mxu1 %v10708_v20  ;;  %v9692_v34 = vpop.f32.mrb[11].mxu0  ;;  %9992 = vmatprep.subr.bf16.mxu0 %v10709_v21  ;;  %v10746_v23 = vld [vmem:[%s13478_s3 + $0x478] sm:$0xff]  }
 0x194   : > { %v9714_v35 = vpop.f32.mrb[11].mxu1  ;;  %v2723_v36 = vadd.f32 %v9690_v28, %v12207_v54  ;;  %10014 = vmatprep.subr.bf16.mxu1 %v10710_v24  ;;  %v10724_v54 = vld [vmem:[%s13478_s3 + $0x408] sm:$0xff]   ;;  %v10747_v24 = vld [vmem:[%s13478_s3 + $0x4f8] sm:$0xff]   ;;  %v9289_v28 = vld [vmem:[%s13480_s10 + $0x50] sm:$0xff] }
 0x195   : > { %v10749_v27 = vld [vmem:[%s13478_s3 + $0x4b8] sm:$0xff]   ;;  %v3484_v30 = vcombine.high %v9289_v28, %v9289_v28  ;;  %v10751_v31 = vld [vmem:[%s13478_s3 + $0x540] sm:$0xff]  }
 0x196   : > { %v12308_v39 = vadd.f32 %v9712_v29, %v2723_v36  ;;  %9993 = vmatpush3.bf16.msra.mxu0 %v10711_v25  ;;  %v3491_v29 = vrot.slane %v9289_v28, %v11400_v44  ;;  %v10753_v35 = vld [vmem:[%s13478_s3 + $0x500] sm:$0xff]  }
 0x197   : > { %10015 = vmatpush3.bf16.msra.mxu1 %v10712_v32  ;;  %9994 = vmatprep.subr.bf16.mxu0 %v10713_v33  ;;  %v10752_v32 = vld [vmem:[%s13478_s3 + $0x5c0] sm:$0xff]   ;;  %v3498_v34 = vrot.slane %v3484_v30, %v11400_v44 }
 0x198   : > { %10016 = vmatprep.subr.bf16.mxu1 %v10714_v37  ;;  %v3499_v33 = vcombine.high %v3491_v29, %v3491_v29  ;;  %v10754_v36 = vld [vmem:[%s13478_s3 + $0x580] sm:$0xff]  }
 0x199   : > { %v3500_v37 = vcombine.high %v3498_v34, %v3498_v34 }
 0x19a   : > { %9995 = vmatpush3.bf16.msra.mxu0 %v10715_v38  ;;  %v10755_v38 = vld [vmem:[%s13478_s3 + $0x548] sm:$0xff]  }
 0x19b   : > { %10017 = vmatpush3.bf16.msra.mxu1 %v10716_v40  ;;  %10024 = vmatprep.subr.bf16.mxu0 %v10718_v45  ;;  %v10757_v40 = vld [vmem:[%s13478_s3 + $0x508] sm:$0xff]   ;;  %v10761_v45 = vld [vmem:[%s13478_s3 + $0x510] sm:$0xff]  }
 0x19c   : > { %10046 = vmatprep.subr.bf16.mxu1 %v10719_v46  ;;  %v10762_v46 = vld [vmem:[%s13478_s3 + $0x590] sm:$0xff]  }
 0x19d   : > { %4967 = vmatmul.mubr.bf16.vlgmr.msra.gmra.mrb[36].mxu0 %v3474_v42  ;;  %v10759_v42 = vld [vmem:[%s13478_s3 + $0x550] sm:$0xff]  }
 0x19e   : > { %10025 = vmatpush3.bf16.msra.mxu0 %v10720_v49  ;;  %5007 = vmatmul.mubr.bf16.vlgmr.msra.gmra.mrb[36].mxu1 %v3481_v48  ;;  %v10764_v48 = vld [vmem:[%s13478_s3 + $0x5d8] sm:$0xff]  }
 0x19f   : > { %10026 = vmatprep.subr.bf16.mxu0 %v10722_v52  ;;  %10047 = vmatpush3.bf16.msra.mxu1 %v10721_v50  ;;  %v10765_v49 = vld [vmem:[%s13478_s3 + $0x518] sm:$0xff]   ;;  %v10768_v52 = vld [vmem:[%s13478_s3 + $0x5e0] sm:$0xff]  }
 0x1a0   : > { %10048 = vmatprep.subr.bf16.mxu1 %v10723_v53  ;;  %5046 = vmatprep.mubr.bf16.mxu0 %v3499_v33  ;;  %v10766_v50 = vld [vmem:[%s13478_s3 + $0x598] sm:$0xff]   ;;  %v10769_v53 = vld [vmem:[%s13478_s3 + $0x520] sm:$0xff]  }
 0x1a1   : > { %5086 = vmatprep.mubr.bf16.mxu1 %v3500_v37 }
 0x1a2   : > { %10027 = vmatpush3.bf16.msra.mxu0 %v10724_v54  ;;  %v10770_v54 = vld [vmem:[%s13478_s3 + $0x5a0] sm:$0xff]  }
 0x1a3   : > { %10028 = vmatprep.subr.bf16.mxu0 %v10726_v56  ;;  %10049 = vmatpush3.bf16.msra.mxu1 %v10725_v55  ;;  %v10771_v55 = vld [vmem:[%s13478_s3 + $0x568] sm:$0xff]  }
 0x1a4   : > { %10050 = vmatprep.subr.bf16.mxu1 %v10727_v57  ;;  %v10772_v56 = vld [vmem:[%s13478_s3 + $0x5e8] sm:$0xff]  }
 0x1a5   : > { %v10773_v57 = vld [vmem:[%s13478_s3 + $0x528] sm:$0xff]  }
 0x1a6   : > { %10029 = vmatpush3.bf16.msra.mxu0 %v10728_v58 }
 0x1a7   : > { %10030 = vmatprep.subr.bf16.mxu0 %v10730_v60  ;;  %10051 = vmatpush3.bf16.msra.mxu1 %v10729_v59  ;;  %v10774_v60 = vld [vmem:[%s13478_s3 + $0x5a8] sm:$0xff]  }
 0x1a8   : > { %10052 = vmatprep.subr.bf16.mxu1 %v10731_v61  ;;  %v10775_v61 = vld [vmem:[%s13478_s3 + $0x570] sm:$0xff]  }
 0x1aa   : > { %10031 = vmatpush3.bf16.msra.mxu0 %v10732_v62 }
 0x1ab   : > { %10032 = vmatprep.subr.bf16.mxu0 %v10734_v0  ;;  %10053 = vmatpush3.bf16.msra.mxu1 %v10733_v63 }
 0x1ac   : > { %10054 = vmatprep.subr.bf16.mxu1 %v10735_v1 }
 0x1ae   : > { %10033 = vmatpush3.bf16.msra.mxu0 %v10736_v2 }
 0x1af   : > { %10034 = vmatprep.subr.bf16.mxu0 %v10738_v4  ;;  %10055 = vmatpush3.bf16.msra.mxu1 %v10737_v3  ;;  %v10776_v4 = vld [vmem:[%s13478_s3 + $0x5f0] sm:$0xff]  }
 0x1b0   : > { %v9732_v8 = vpop.f32.mrb[12].mxu0  ;;  %10056 = vmatprep.subr.bf16.mxu1 %v10739_v5  ;;  %v10777_v5 = vld [vmem:[%s13478_s3 + $0x530] sm:$0xff]  }
 0x1b1   : > { %v9754_v9 = vpop.f32.mrb[12].mxu1  ;;  %v9733_v12 = vpop.f32.mrb[13].mxu0 }
 0x1b2   : > { %v9755_v13 = vpop.f32.mrb[13].mxu1  ;;  %v9734_v14 = vadd.f32 %v9733_v12, %v9732_v8  ;;  %v9735_v16 = vpop.f32.mrb[14].mxu0  ;;  %10035 = vmatpush3.bf16.msra.mxu0 %v10740_v6  ;;  %v10780_v12 = vld [vmem:[%s13478_s3 + $0x5f8] sm:$0xff]  }
 0x1b3   : > { %v9756_v15 = vadd.f32 %v9755_v13, %v9754_v9  ;;  %v9757_v17 = vpop.f32.mrb[14].mxu1  ;;  %v9736_v20 = vpop.f32.mrb[15].mxu0  ;;  %10036 = vmatprep.subr.bf16.mxu0 %v10742_v10  ;;  %10057 = vmatpush3.bf16.msra.mxu1 %v10741_v7  ;;  %v10778_v9 = vld [vmem:[%s13478_s3 + $0x5b0] sm:$0xff]   ;;  %v10779_v10 = vld [vmem:[%s13478_s3 + $0x578] sm:$0xff]  }
 0x1b4   : > { %v9758_v21 = vpop.f32.mrb[15].mxu1  ;;  %v2803_v22 = vadd.f32 %v9734_v14, %v12308_v39  ;;  %10058 = vmatprep.subr.bf16.mxu1 %v10743_v11  ;;  %v10756_v39 = vld [vmem:[%s13478_s3 + $0x5c8] sm:$0xff]   ;;  %v10781_v13 = vld [vmem:[%s13478_s3 + $0x538] sm:$0xff]  }
 0x1b5   : > { %v10782_v14 = vld [vmem:[%s13478_s3 + $0x5b8] sm:$0xff]  }
 0x1b6   : > { %v12409_v25 = vadd.f32 %v9756_v15, %v2803_v22  ;;  %10037 = vmatpush3.bf16.msra.mxu0 %v10744_v18  ;;  %v9290_v15 = vld [vmem:[%s13480_s10 + $0x58] sm:$0xff] }
 0x1b7   : > { %10038 = vmatprep.subr.bf16.mxu0 %v10746_v23  ;;  %10059 = vmatpush3.bf16.msra.mxu1 %v10745_v19  ;;  %v3508_v16 = vrot.slane %v9290_v15, %v11400_v44  ;;  %v3501_v17 = vcombine.high %v9290_v15, %v9290_v15 }
 0x1b8   : > { %10060 = vmatprep.subr.bf16.mxu1 %v10747_v24 }
 0x1b9   : > { %v3516_v18 = vcombine.high %v3508_v16, %v3508_v16  ;;  %v3515_v19 = vrot.slane %v3501_v17, %v11400_v44  ;;  %v3009_v44 = vld [vmem:[%s13477_s18 + $0x1] sm:$0xf] }
 0x1ba   : > { %10039 = vmatpush3.bf16.msra.mxu0 %v10748_v26 }
 0x1bb   : > { %10068 = vmatprep.subr.bf16.mxu0 %v10751_v31  ;;  %10061 = vmatpush3.bf16.msra.mxu1 %v10749_v27  ;;  %v3517_v20 = vcombine.high %v3515_v19, %v3515_v19 }
 0x1bc   : > { %10090 = vmatprep.subr.bf16.mxu1 %v10752_v32 }
 0x1bd   : > { %5047 = vmatmul.mubr.bf16.vlgmr.msra.gmra.mrb[40].mxu0 %v3491_v29 }
 0x1be   : > { %10069 = vmatpush3.bf16.msra.mxu0 %v10753_v35  ;;  %5087 = vmatmul.mubr.bf16.vlgmr.msra.gmra.mrb[40].mxu1 %v3498_v34 }
 0x1bf   : > { %10070 = vmatprep.subr.bf16.mxu0 %v10755_v38  ;;  %10091 = vmatpush3.bf16.msra.mxu1 %v10754_v36  ;;  %v9291_v36 = vld [vmem:[%s13481_s6] ss:$0 sm:$0xff] }
 0x1c0   : > { %10092 = vmatprep.subr.bf16.mxu1 %v10756_v39  ;;  %5126 = vmatprep.mubr.bf16.mxu0 %v3516_v18 }
 0x1c1   : > { %5166 = vmatprep.mubr.bf16.mxu1 %v3517_v20 }
 0x1c2   : > { %10071 = vmatpush3.bf16.msra.mxu0 %v10757_v40 }
 0x1c3   : > { %10072 = vmatprep.subr.bf16.mxu0 %v10759_v42  ;;  %10093 = vmatpush3.bf16.msra.mxu1 %v10758_v41 }
 0x1c4   : > { %10094 = vmatprep.subr.bf16.mxu1 %v10760_v43 }
 0x1c6   : > { %10073 = vmatpush3.bf16.msra.mxu0 %v10761_v45 }
 0x1c7   : > { %10074 = vmatprep.subr.bf16.mxu0 %v10763_v47  ;;  %10095 = vmatpush3.bf16.msra.mxu1 %v10762_v46 }
 0x1c8   : > { %10096 = vmatprep.subr.bf16.mxu1 %v10764_v48 }
 0x1ca   : > { %10075 = vmatpush3.bf16.msra.mxu0 %v10765_v49 }
 0x1cb   : > { %10076 = vmatprep.subr.bf16.mxu0 %v10767_v51  ;;  %10097 = vmatpush3.bf16.msra.mxu1 %v10766_v50 }
 0x1cc   : > { %10098 = vmatprep.subr.bf16.mxu1 %v10768_v52 }
 0x1ce   : > { %10077 = vmatpush3.bf16.msra.mxu0 %v10769_v53 }
 0x1cf   : > { %10078 = vmatprep.subr.bf16.mxu0 %v10771_v55  ;;  %10099 = vmatpush3.bf16.msra.mxu1 %v10770_v54 }
 0x1d0   : > { %v9776_v58 = vpop.f32.mrb[16].mxu0  ;;  %10100 = vmatprep.subr.bf16.mxu1 %v10772_v56 }
 0x1d1   : > { %v9798_v59 = vpop.f32.mrb[16].mxu1  ;;  %v9777_v62 = vpop.f32.mrb[17].mxu0 }
 0x1d2   : > { %v9799_v63 = vpop.f32.mrb[17].mxu1  ;;  %v9778_v0 = vadd.f32 %v9777_v62, %v9776_v58  ;;  %v9779_v2 = vpop.f32.mrb[18].mxu0  ;;  %10079 = vmatpush3.bf16.msra.mxu0 %v10773_v57 }
 0x1d3   : > { %v9800_v1 = vadd.f32 %v9799_v63, %v9798_v59  ;;  %v9801_v3 = vpop.f32.mrb[18].mxu1  ;;  %v9780_v6 = vpop.f32.mrb[19].mxu0  ;;  %10080 = vmatprep.subr.bf16.mxu0 %v10775_v61  ;;  %10101 = vmatpush3.bf16.msra.mxu1 %v10774_v60 }
 0x1d4   : > { %v9802_v7 = vpop.f32.mrb[19].mxu1  ;;  %v2883_v8 = vadd.f32 %v9778_v0, %v12409_v25  ;;  %10102 = vmatprep.subr.bf16.mxu1 %v10776_v4 }
 0x1d6   : > { %v2923_v11 = vadd.f32 %v9800_v1, %v2883_v8  ;;  %10081 = vmatpush3.bf16.msra.mxu0 %v10777_v5 }
 0x1d7   : > { %10082 = vmatprep.subr.bf16.mxu0 %v10779_v10  ;;  %10103 = vmatpush3.bf16.msra.mxu1 %v10778_v9 }
 0x1d8   : > { %10104 = vmatprep.subr.bf16.mxu1 %v10780_v12 }
 0x1da   : > { %10083 = vmatpush3.bf16.msra.mxu0 %v10781_v13 }
 0x1db   : > { %10105 = vmatpush3.bf16.msra.mxu1 %v10782_v14 }
 0x1dd   : > { %5127 = vmatmul.mubr.bf16.vlgmr.msra.gmra.mrb[44].mxu0 %v3508_v16 }
 0x1de   : > { %5167 = vmatmul.mubr.bf16.vlgmr.msra.gmra.mrb[44].mxu1 %v3515_v19 }
 0x1f0   : > { %v9820_v21 = vpop.f32.mrb[20].mxu0 }
 0x1f1   : > { %v9842_v22 = vpop.f32.mrb[20].mxu1  ;;  %v9821_v23 = vpop.f32.mrb[21].mxu0 }
 0x1f2   : > { %v9843_v24 = vpop.f32.mrb[21].mxu1  ;;  %v9822_v25 = vadd.f32 %v9821_v23, %v9820_v21  ;;  %v9823_v27 = vpop.f32.mrb[22].mxu0 }
 0x1f3   : > { %v9844_v26 = vadd.f32 %v9843_v24, %v9842_v22  ;;  %v9845_v28 = vpop.f32.mrb[22].mxu1  ;;  %v9824_v29 = vpop.f32.mrb[23].mxu0 }
 0x1f4   : > { %v9846_v30 = vpop.f32.mrb[23].mxu1  ;;  %v2963_v31 = vadd.f32 %v9822_v25, %v2923_v11 }
 0x1f6   : > { %v3003_v32 = vadd.f32 %v9844_v26, %v2963_v31 }
 0x1f8   : > { %v3010_v33 = vadd.f32 %v3009_v44, %v3003_v32 }
 0x1fa   : > { %3011 = vst [vmem:[%s13479_s17 + $0x1] sm:$0xf] %v3010_v33 }
 0x210   : > { %v9864_v34 = vpop.f32.mrb[24].mxu0 }
 0x211   : > { %v9886_v35 = vpop.f32.mrb[24].mxu1  ;;  %v9865_v37 = vpop.f32.mrb[25].mxu0 }
 0x212   : > { %v9887_v38 = vpop.f32.mrb[25].mxu1  ;;  %v9866_v39 = vadd.f32 %v9865_v37, %v9864_v34  ;;  %v9867_v41 = vpop.f32.mrb[26].mxu0 }
 0x213   : > { %v9888_v40 = vadd.f32 %v9887_v38, %v9886_v35  ;;  %v9889_v42 = vpop.f32.mrb[26].mxu1  ;;  %v9868_v43 = vpop.f32.mrb[27].mxu0  ;;  %v5176_v41 = vld [vmem:[%s13477_s18 + $0x1] sm:$0xf] }
 0x214   : > { %v9890_v45 = vpop.f32.mrb[27].mxu1  ;;  %v4729_v46 = vadd.f32 %v9866_v39, %v9291_v36 }
 0x216   : > { %v4769_v47 = vadd.f32 %v9888_v40, %v4729_v46 }
 0x230   : > { %v9908_v48 = vpop.f32.mrb[28].mxu0 }
 0x231   : > { %v9930_v49 = vpop.f32.mrb[28].mxu1  ;;  %v9909_v50 = vpop.f32.mrb[29].mxu0 }
 0x232   : > { %v9931_v51 = vpop.f32.mrb[29].mxu1  ;;  %v9910_v52 = vadd.f32 %v9909_v50, %v9908_v48  ;;  %v9911_v54 = vpop.f32.mrb[30].mxu0 }
 0x233   : > { %v9932_v53 = vadd.f32 %v9931_v51, %v9930_v49  ;;  %v9933_v55 = vpop.f32.mrb[30].mxu1  ;;  %v9912_v56 = vpop.f32.mrb[31].mxu0 }
 0x234   : > { %v9934_v57 = vpop.f32.mrb[31].mxu1  ;;  %v4809_v58 = vadd.f32 %v9910_v52, %v4769_v47 }
 0x236   : > { %v4849_v59 = vadd.f32 %v9932_v53, %v4809_v58 }
 0x250   : > { %v9952_v60 = vpop.f32.mrb[32].mxu0 }
 0x251   : > { %v9974_v61 = vpop.f32.mrb[32].mxu1  ;;  %v9953_v62 = vpop.f32.mrb[33].mxu0 }
 0x252   : > { %v9954_v63 = vadd.f32 %v9953_v62, %v9952_v60  ;;  %v9975_v0 = vpop.f32.mrb[33].mxu1  ;;  %v9955_v1 = vpop.f32.mrb[34].mxu0 }
 0x253   : > { %v9976_v2 = vadd.f32 %v9975_v0, %v9974_v61  ;;  %v9977_v3 = vpop.f32.mrb[34].mxu1  ;;  %v9956_v4 = vpop.f32.mrb[35].mxu0 }
 0x254   : > { %v4889_v5 = vadd.f32 %v9954_v63, %v4849_v59  ;;  %v9978_v6 = vpop.f32.mrb[35].mxu1 }
 0x256   : > { %v4929_v7 = vadd.f32 %v9976_v2, %v4889_v5 }
 0x270   : > { %v9996_v8 = vpop.f32.mrb[36].mxu0 }
 0x271   : > { %v9997_v9 = vpop.f32.mrb[37].mxu0  ;;  %v10018_v10 = vpop.f32.mrb[36].mxu1 }
 0x272   : > { %v9998_v11 = vadd.f32 %v9997_v9, %v9996_v8  ;;  %v9999_v12 = vpop.f32.mrb[38].mxu0  ;;  %v10019_v13 = vpop.f32.mrb[37].mxu1 }
 0x273   : > { %v10000_v14 = vpop.f32.mrb[39].mxu0  ;;  %v10020_v16 = vadd.f32 %v10019_v13, %v10018_v10  ;;  %v10021_v17 = vpop.f32.mrb[38].mxu1 }
 0x274   : > { %v4969_v15 = vadd.f32 %v9998_v11, %v4929_v7  ;;  %v10022_v18 = vpop.f32.mrb[39].mxu1 }
 0x276   : > { %v5009_v19 = vadd.f32 %v10020_v16, %v4969_v15 }
 0x290   : > { %v10040_v20 = vpop.f32.mrb[40].mxu0 }
 0x291   : > { %v10041_v21 = vpop.f32.mrb[41].mxu0  ;;  %v10062_v22 = vpop.f32.mrb[40].mxu1 }
 0x292   : > { %v10042_v23 = vadd.f32 %v10041_v21, %v10040_v20  ;;  %v10043_v24 = vpop.f32.mrb[42].mxu0  ;;  %v10063_v25 = vpop.f32.mrb[41].mxu1 }
 0x293   : > { %v10044_v26 = vpop.f32.mrb[43].mxu0  ;;  %v10064_v28 = vadd.f32 %v10063_v25, %v10062_v22  ;;  %v10065_v29 = vpop.f32.mrb[42].mxu1 }
 0x294   : > { %v5049_v27 = vadd.f32 %v10042_v23, %v5009_v19  ;;  %v10066_v30 = vpop.f32.mrb[43].mxu1 }
 0x296   : > { %v5089_v31 = vadd.f32 %v10064_v28, %v5049_v27 }
 0x2b0   : > { %v10084_v44 = vpop.f32.mrb[44].mxu0 }
 0x2b1   : > { %v10085_v32 = vpop.f32.mrb[45].mxu0  ;;  %v10106_v33 = vpop.f32.mrb[44].mxu1 }
 0x2b2   : > { %v10086_v34 = vadd.f32 %v10085_v32, %v10084_v44  ;;  %v10087_v35 = vpop.f32.mrb[46].mxu0  ;;  %v10107_v36 = vpop.f32.mrb[45].mxu1 }
 0x2b3   : > { %v10088_v37 = vpop.f32.mrb[47].mxu0  ;;  %v10108_v39 = vadd.f32 %v10107_v36, %v10106_v33  ;;  %v10109_v40 = vpop.f32.mrb[46].mxu1 }
 0x2b4   : > { %v5129_v38 = vadd.f32 %v10086_v34, %v5089_v31  ;;  %v10110_v42 = vpop.f32.mrb[47].mxu1 }
 0x2b6   : > { %v5169_v43 = vadd.f32 %v10108_v39, %v5129_v38 }
 0x2b8   : > { %v5177_v45 = vadd.f32 %v5176_v41, %v5169_v43 }
 0x2ba   : > { %9485 = vst [vmem:[%s13479_s17 + $0x9] sm:$0xf] %v5177_v45 }
 0x2bb PF: > { %s13482_s22 = sld [smem:[#allocation24_spill]]  ;;  %v5187_v47 = vlaneseq  ;;  %v11014_v48 = vmov 1966171168   ;;  %vm5341_vm0 = vcmask 1041408   ;;  %vm11017_vm1 = vmmov 0   ;;  %s13484_s27 = scalar_lea.vmem %s13424_s14, %s11227_s4 }
 0x2bc   : > { %v5185_v49 = vunpack.c.l.s4 %v11014_v48  ;;  %vm6056_vm2 = vcmask 261120   ;;  %vm6120_vm3 = vcmask 1042432   ;;  %vm6103_vm4 = vcmask 36864   ;;  %s13487_s29 = scalar_lea.vmem %s13418_s8, %s11227_s4  ;;  %s13489_s25 = scalar_lea.vmem %s13425_s15, %s11227_s4 }
 0x2bd   : > { %v5188_v51 = vshrl.u32 %v5187_v47, 7  ;;  %vm6116_vm5 = vcmask 39936   ;;  %vm6512_vm6 = vcmask 523264   ;;  %vm6514_vm7 = vcmask 785408   ;;  %s13490_s7 = scalar_lea.vmem %s13426_s16, %s11227_s4  ;;  %p9573_p9 = scmp.ge.s32.totalorder %s11000_s21, 1 }
 0x2be   : > { %v5186_v53 = vunpack.c.0.s8 %v5185_v49  ;;  %vm6989_vm8 = vcmask 1044480   ;;  %s13492_s9 = sld [smem:[#allocation24_spill]] (!%p9573_p9) }
 0x2bf   : > { %v12596_v23 = vsub.s32 0, %v5188_v51  ;;  %v12598_v24 = vsub.s32 1, %v5188_v51  ;;  %v12600_v25 = vsub.s32 2, %v5188_v51  ;;  %v12602_v26 = vsub.s32 3, %v5188_v51 }
 0x2c0   : > { %v12545_v55 = vsub.s32 %v5186_v53, %v5188_v51  ;;  %v12604_v28 = vsub.s32 4, %v5188_v51  ;;  %v12606_v29 = vsub.s32 5, %v5188_v51  ;;  %v12608_v30 = vsub.s32 6, %v5188_v51 }
 0x2c1   : > { %v5179_v46 = vld [vmem:[%s13482_s22] sm:$0x1f]  ;;  %v5180_v50 = vld [vmem:[%s13482_s22 + $0x8] sm:$0x1f]  ;;  %v12610_v31 = vsub.s32 7, %v5188_v51 }
 0x2c2   : > { %v5183_v52 = vcombine.high %v5179_v46, %v5179_v46  ;;  %v5222_v54 = vcombine.high %v5180_v50, %v5180_v50  ;;  %v5190_v56 = vrot.slane %v5179_v46, %v12545_v55  ;;  %v5229_v58 = vrot.slane %v5180_v50, %v12545_v55 }
 0x2c3   : > { %13483 = vst [vmem:[#allocation11_spill] sm:$0xff] %v12610_v31 }
 0x2c4   : > { %v5197_v57 = vrot.slane %v5183_v52, %v12545_v55  ;;  %v5236_v59 = vrot.slane %v5222_v54, %v12545_v55  ;;  %v5198_v60 = vcombine.high %v5190_v56, %v5190_v56  ;;  %v12552_v61 = vrot.slane %v5190_v56, %v12545_v55 }
 0x2c5   : > { %v5237_v63 = vcombine.high %v5229_v58, %v5229_v58  ;;  %v12558_v0 = vrot.slane %v5229_v58, %v12545_v55 }
 0x2c6   : > { %v12555_v62 = vrot.slane %v5197_v57, %v12545_v55  ;;  %v12561_v1 = vrot.slane %v5198_v60, %v12545_v55  ;;  %v12567_v3 = vrot.slane %v5236_v59, %v12545_v55  ;;  %v12614_v32 = vcombine.high %v12552_v61, %v12552_v61 }
 0x2c7   : > { %v12564_v2 = vrot.slane %v5237_v63, %v12545_v55  ;;  %v12571_v4 = vcombine.high %v12558_v0, %v12558_v0 }
 0x2c8   : > { %v5275_v5 = vcombine.low %v12555_v62, %v12558_v0  ;;  %v5273_v6 = vcombine.low %v12552_v61, %v12561_v1  ;;  %v9486_v7 = vcombine.high %v12552_v61, %v12561_v1  ;;  %v12618_v33 = vcombine.high %v12561_v1, %v12561_v1 }
 0x2c9   : > { %v12581_v8 = vcombine.high %v12564_v2, %v12564_v2  ;;  %v5276_v9 = vcombine.low %v12564_v2, %v12571_v4 }
 0x2ca   : > { %v5297_v10 = vrot.slane %v5275_v5, %v12545_v55  ;;  %v5283_v11 = vrot.slane %v5273_v6, %v12545_v55  ;;  %v5290_v12 = vrot.slane %v9486_v7, %v12545_v55 }
 0x2cb   : > { %v5322_v13 = vcombine.low %v12581_v8, %v12567_v3  ;;  %v5304_v14 = vrot.slane %v5276_v9, %v12545_v55 }
 0x2cc   : > { %v5305_v15 = vcombine.low %v5283_v11, %v5290_v12 }
 0x2cd   : > { %v5329_v16 = vrot.slane %v5322_v13, %v12545_v55  ;;  %v5306_v17 = vcombine.low %v5297_v10, %v5304_v14 }
 0x2ce   : > { %v5313_v18 = vrot.slane %v5305_v15, %v12545_v55 }
 0x2cf   : > { %v5336_v19 = vrot.slane %v5329_v16, %v12545_v55  ;;  %v5320_v20 = vrot.slane %v5306_v17, %v12545_v55 }
 0x2d1   : > { %v5321_v21 = vcombine.low %v5313_v18, %v5320_v20  ;;  %v5342_v22 = vsel %vm5341_vm0, %v5336_v19, 0.0 }
 0x2d3   : > { %5339 = vadd.xlane.f32.xlu0 %v5321_v21 }
 0x2d7   : > { %5343 = vadd.xlane.f32.xlu0 %v5342_v22 }
 0x360   : > { %v5340_v27 = vpop.xlane.xlu0 %5339 }
 0x361   : > { %v5346_v44 = vmul.f32 0.0078125, %v5340_v27 }
 0x363   : > { %v5353_v34 = vrot.slane %v5346_v44, %v12596_v23  ;;  %v5357_v35 = vrot.slane %v5346_v44, %v12598_v24  ;;  %v5361_v36 = vrot.slane %v5346_v44, %v12600_v25  ;;  %v5365_v37 = vrot.slane %v5346_v44, %v12602_v26 }
 0x364   : > { %v5344_v38 = vpop.xlane.xlu0 %5343  ;;  %v5369_v39 = vrot.slane %v5346_v44, %v12604_v28  ;;  %v5373_v40 = vrot.slane %v5346_v44, %v12606_v29  ;;  %v5377_v41 = vrot.slane %v5346_v44, %v12608_v30  ;;  %v5381_v42 = vrot.slane %v5346_v44, %v12610_v31 }
 0x365   : > { %v5347_v43 = vmul.f32 0.0078125, %v5344_v38  ;;  %v12629_v45 = vsub.f32 %v12552_v61, %v5353_v34  ;;  %v12632_v46 = vsub.f32 %v12561_v1, %v5357_v35  ;;  %v12635_v47 = vsub.f32 %v12614_v32, %v5361_v36  ;;  %v10796_v38 = vld [vmem:[%s11239_s28 + $0x4] ss:$12 sps:$4 sm:$0xff]  }
 0x366   : > { %v12638_v48 = vsub.f32 %v12618_v33, %v5365_v37  ;;  %v12641_v49 = vsub.f32 %v12555_v62, %v5369_v39  ;;  %v12644_v50 = vsub.f32 %v12558_v0, %v5373_v40  ;;  %v12647_v51 = vsub.f32 %v12564_v2, %v5377_v41  ;;  %v10798_v39 = vld [vmem:[%s11239_s28] ss:$12 sps:$4 sm:$0xff]   ;;  %v10799_v40 = vld [vmem:[%s11239_s28 + $0x8] ss:$12 sps:$4 sm:$0xff]   ;;  %5967 = vmatprep.subr.bf16.mxu0 %v10796_v38 }
 0x367   : > { %v5385_v52 = vrot.slane %v5347_v43, %v12596_v23  ;;  %v5389_v53 = vrot.slane %v5347_v43, %v12598_v24  ;;  %v12652_v54 = vsub.f32 %v12571_v4, %v5381_v42  ;;  %v5410_v56 = vmul.f32 %v12629_v45, %v12629_v45  ;;  %5968 = vmatpush1.bf16.msra.mxu0 %v10798_v39  ;;  %v10800_v42 = vld [vmem:[%s11239_s28 + $0x1c] ss:$12 sps:$4 sm:$0xff]   ;;  %v10802_v43 = vld [vmem:[%s11239_s28 + $0x18] ss:$12 sps:$4 sm:$0xff]  }
 0x368   : > { %v5411_v57 = vmul.f32 %v12632_v46, %v12632_v46  ;;  %v5412_v58 = vmul.f32 %v12635_v47, %v12635_v47  ;;  %v5413_v59 = vmul.f32 %v12638_v48, %v12638_v48  ;;  %v5414_v60 = vmul.f32 %v12641_v49, %v12641_v49  ;;  %5969 = vmatprep.subr.bf16.mxu0 %v10800_v42 }
 0x369   : > { %v12665_v63 = vsub.f32 %v12581_v8, %v5385_v52  ;;  %v12668_v5 = vsub.f32 %v12567_v3, %v5389_v53  ;;  %v5415_v6 = vmul.f32 %v12644_v50, %v12644_v50  ;;  %v5416_v7 = vmul.f32 %v12647_v51, %v12647_v51  ;;  %v10803_v52 = vld [vmem:[%s11239_s28 + $0x20] ss:$12 sps:$4 sm:$0xff]  }
 0x36a   : > { %v5417_v9 = vmul.f32 %v12652_v54, %v12652_v54  ;;  %v5430_v10 = vcombine.low %v5410_v56, %v5411_v57  ;;  %v5431_v11 = vcombine.low %v5412_v58, %v5413_v59  ;;  %v13444_v41 = vmov 0.0   ;;  %v10804_v53 = vld [vmem:[%s11239_s28 + $0x34] ss:$12 sps:$4 sm:$0xff]   ;;  %v10806_v56 = vld [vmem:[%s11239_s28 + $0x30] ss:$12 sps:$4 sm:$0xff]  }
 0x36b   : > { %v5418_v12 = vmul.f32 %v12665_v63, %v12665_v63  ;;  %v5419_v13 = vmul.f32 %v12668_v5, %v12668_v5  ;;  %v5432_v14 = vcombine.low %v5414_v60, %v5415_v6  ;;  %10184 = vmatprep.subr.bf16.mxu1 %v13444_v41  ;;  %5970 = vmatpush1.bf16.msra.mxu0 %v10802_v43  ;;  %v10807_v57 = vld [vmem:[%s11239_s28 + $0x38] ss:$12 sps:$4 sm:$0xff]   ;;  %v10810_v59 = vld [vmem:[%s11239_s28 + $0x48] ss:$12 sps:$4 sm:$0xff]   ;;  %v10811_v60 = vld [vmem:[%s11239_s28 + $0x50] ss:$12 sps:$4 sm:$0xff]  }
 0x36c   : > { %v5433_v15 = vcombine.low %v5416_v7, %v5417_v9  ;;  %v5440_v16 = vrot.slane %v5430_v10, %v12545_v55  ;;  %v5447_v17 = vrot.slane %v5431_v11, %v12545_v55  ;;  %10185 = vmatpush3.bf16.msra.mxu1 %v10799_v40  ;;  %5971 = vmatprep.subr.bf16.mxu0 %v10804_v53  ;;  %v10808_v58 = vld [vmem:[%s11239_s28 + $0x4c] ss:$12 sps:$4 sm:$0xff]   ;;  %v10812_v6 = vld [vmem:[%s11239_s28 + $0x64] ss:$12 sps:$4 sm:$0xff]   ;;  %v10815_v9 = vld [vmem:[%s11239_s28 + $0x68] ss:$12 sps:$4 sm:$0xff]  }
 0x36d   : > { %v5454_v18 = vrot.slane %v5432_v14, %v12545_v55  ;;  %v5479_v19 = vcombine.low %v5418_v12, %v5419_v13  ;;  %10186 = vmatprep.subr.bf16.mxu1 %v13444_v41  ;;  %v10814_v7 = vld [vmem:[%s11239_s28 + $0x60] ss:$12 sps:$4 sm:$0xff]   ;;  %v10816_v10 = vld [vmem:[%s11239_s28 + $0x7c] ss:$12 sps:$4 sm:$0xff]   ;;  %v10818_v11 = vld [vmem:[%s11239_s28 + $0x78] ss:$12 sps:$4 sm:$0xff]   ;;  %10200 = vmatprep.mubr.msk.bf16.mxu1 %vm11017_vm1, %v13444_v41 }
 0x36e   : > { %v5461_v20 = vrot.slane %v5433_v15, %v12545_v55  ;;  %v5462_v21 = vcombine.low %v5440_v16, %v5447_v17  ;;  %v10819_v12 = vld [vmem:[%s11239_s28 + $0x80] ss:$12 sps:$4 sm:$0xff]   ;;  %v10822_v14 = vld [vmem:[%s11239_s28 + $0x90] ss:$12 sps:$4 sm:$0xff]   ;;  %v10823_v15 = vld [vmem:[%s11239_s28 + $0x98] ss:$12 sps:$4 sm:$0xff]  }
 0x36f   : > { %v5486_v22 = vrot.slane %v5479_v19, %v12545_v55  ;;  %5972 = vmatpush1.bf16.msra.mxu0 %v10806_v56  ;;  %v10820_v13 = vld [vmem:[%s11239_s28 + $0x94] ss:$12 sps:$4 sm:$0xff]   ;;  %v10824_v16 = vld [vmem:[%s11239_s28 + $0xac] ss:$12 sps:$4 sm:$0xff]   ;;  %v13443_v17 = vmov 0  }
 0x370   : > { %v5463_v27 = vcombine.low %v5454_v18, %v5461_v20  ;;  %v5470_v44 = vrot.slane %v5462_v21, %v12545_v55  ;;  %10187 = vmatpush3.bf16.msra.mxu1 %v10803_v52  ;;  %5973 = vmatprep.subr.bf16.mxu0 %v10808_v58  ;;  %v10826_v18 = vld [vmem:[%s11239_s28 + $0xa8] ss:$12 sps:$4 sm:$0xff]   ;;  %v10827_v19 = vld [vmem:[%s11239_s28 + $0xb0] ss:$12 sps:$4 sm:$0xff]   ;;  %v9487_v20 = vld [vmem:[%s823_s1] ss:$0 sm:$0xff] }
 0x371   : > { %v5493_v35 = vrot.slane %v5486_v22, %v12545_v55  ;;  %10188 = vmatprep.subr.bf16.mxu1 %v13444_v41  ;;  %5999 = vmatprep.mubr.bf16.mxu0 %v13443_v17  ;;  %v9488_v21 = vld [vmem:[%s13484_s27] ss:$0 sm:$0xff]  ;;  %v5574_v22 = vcombine.high %v9487_v20, %v9487_v20  ;;  %s11020_s28 = smov 32   ;;  %s11021_s1 = smov 64  }
 0x372   : > { %v5477_v34 = vrot.slane %v5463_v27, %v12545_v55  ;;  %v5646_v27 = vcombine.high %v9488_v21, %v9488_v21  ;;  %v5653_v38 = vrot.slane %v9488_v21, %v12545_v55 }
 0x373   : > { %v5498_v37 = vsel %vm5341_vm0, %v5493_v35, 0.0  ;;  %5974 = vmatpush1.bf16.msra.mxu0 %v10810_v59  ;;  %v5581_v35 = vrot.slane %v9487_v20, %v12545_v55 }
 0x374   : > { %v5478_v36 = vcombine.low %v5470_v44, %v5477_v34  ;;  %10189 = vmatpush3.bf16.msra.mxu1 %v10807_v57  ;;  %5975 = vmatprep.subr.bf16.mxu0 %v10812_v6  ;;  %v5660_v39 = vrot.slane %v5646_v27, %v12545_v55  ;;  %v5661_v56 = vcombine.high %v5653_v38, %v5653_v38 }
 0x375   : > { %10190 = vmatprep.subr.bf16.mxu1 %v13444_v41  ;;  %v5589_v43 = vcombine.high %v5581_v35, %v5581_v35  ;;  %v5597_v58 = vrot.slane %v5581_v35, %v12545_v55 }
 0x376   : > { %5496 = vadd.xlane.f32.xlu1 %v5478_v36  ;;  %v5588_v36 = vrot.slane %v5574_v22, %v12545_v55  ;;  %v5662_v57 = vcombine.high %v5660_v39, %v5660_v39 }
 0x377   : > { %5976 = vmatpush1.bf16.msra.mxu0 %v10814_v7  ;;  %v5669_v7 = vrot.slane %v5653_v38, %v12545_v55 }
 0x378   : > { %10191 = vmatpush3.bf16.msra.mxu1 %v10811_v60  ;;  %5977 = vmatprep.subr.bf16.mxu0 %v10816_v10  ;;  %v5590_v52 = vcombine.high %v5588_v36, %v5588_v36  ;;  %v5604_v59 = vrot.slane %v5588_v36, %v12545_v55  ;;  %v5611_v60 = vrot.slane %v5589_v43, %v12545_v55 }
 0x379   : > { %10192 = vmatprep.subr.bf16.mxu1 %v13444_v41  ;;  %v5683_v10 = vrot.slane %v5661_v56, %v12545_v55 }
 0x37a   : > { %5499 = vadd.xlane.f32.xlu1 %v5498_v37  ;;  %v5618_v6 = vrot.slane %v5590_v52, %v12545_v55 }
 0x37b   : > { %5978 = vmatpush1.bf16.msra.mxu0 %v10818_v11  ;;  %v5690_v11 = vrot.slane %v5662_v57, %v12545_v55  ;;  %v5693_v20 = vcombine.high %v5683_v10, %v5683_v10 }
 0x37c   : > { %10193 = vmatpush3.bf16.msra.mxu1 %v10815_v9  ;;  %5979 = vmatprep.subr.bf16.mxu0 %v10820_v13  ;;  %v5676_v9 = vrot.slane %v5660_v39, %v12545_v55  ;;  %v5620_v13 = vcombine.high %v5604_v59, %v5604_v59 }
 0x37d   : > { %10194 = vmatprep.subr.bf16.mxu1 %v13444_v41  ;;  %v5694_v21 = vcombine.high %v5690_v11, %v5690_v11 }
 0x37f   : > { %5980 = vmatpush1.bf16.msra.mxu0 %v10822_v14  ;;  %v5621_v14 = vcombine.high %v5611_v60, %v5611_v60 }
 0x380   : > { %10195 = vmatpush3.bf16.msra.mxu1 %v10819_v12  ;;  %5981 = vmatprep.subr.bf16.mxu0 %v10824_v16  ;;  %v5619_v12 = vcombine.high %v5597_v58, %v5597_v58 }
 0x381   : > { %10196 = vmatprep.subr.bf16.mxu1 %v13444_v41 }
 0x383   : > { %5982 = vmatpush1.bf16.msra.mxu0 %v10826_v18  ;;  %v5691_v18 = vcombine.high %v5669_v7, %v5669_v7 }
 0x384   : > { %10197 = vmatpush3.bf16.msra.mxu1 %v10823_v15  ;;  %10228 = vmatprep.subr.bf16.mxu0 %v13444_v41  ;;  %v5622_v15 = vcombine.high %v5618_v6, %v5618_v6 }
 0x385   : > { %10198 = vmatprep.subr.bf16.mxu1 %v13444_v41 }
 0x388   : > { %10199 = vmatpush3.bf16.msra.mxu1 %v10827_v19  ;;  %v5692_v19 = vcombine.high %v5676_v9, %v5676_v9 }
 0x389   : > { %10204 = vmatprep.subr.bf16.mxu1 %v13444_v41 }
 0x403   : > { %v5497_v44 = vpop.xlane.xlu1 %5496 }
 0x404   : > { %v5501_v34 = vmul.f32 0.0078125, %v5497_v44 }
 0x406   : > { %v5503_v37 = vadd.f32 1e-06, %v5501_v34 }
 0x407   : > { %v5500_v40 = vpop.xlane.xlu1 %5499 }
 0x408   : > { %10876 = vrsqrt.f32 %v5503_v37  ;;  %v5502_v42 = vmul.f32 0.0078125, %v5500_v40 }
 0x40a   : > { %v5504_v53 = vadd.f32 1e-06, %v5502_v42 }
 0x40c   : > { %10878 = vrsqrt.f32 %v5504_v53 }
 0x412   : > { %v10877_v16 = vpop.eup %10876 }
 0x413   : > { %v5512_v22 = vrot.slane %v10877_v16, %v12596_v23  ;;  %v5516_v27 = vrot.slane %v10877_v16, %v12598_v24  ;;  %v5520_v44 = vrot.slane %v10877_v16, %v12600_v25  ;;  %v5524_v34 = vrot.slane %v10877_v16, %v12602_v26 }
 0x414   : > { %v5528_v35 = vrot.slane %v10877_v16, %v12604_v28  ;;  %v5532_v36 = vrot.slane %v10877_v16, %v12606_v29  ;;  %v5536_v37 = vrot.slane %v10877_v16, %v12608_v30  ;;  %v5540_v38 = vrot.slane %v10877_v16, %v12610_v31 }
 0x415   : > { %v5559_v39 = vmul.f32 %v5512_v22, %v12629_v45  ;;  %v5560_v40 = vmul.f32 %v5516_v27, %v12632_v46  ;;  %v5561_v42 = vmul.f32 %v5520_v44, %v12635_v47  ;;  %v5562_v43 = vmul.f32 %v5524_v34, %v12638_v48 }
 0x416   : > { %v10879_v52 = vpop.eup %10878  ;;  %v5563_v53 = vmul.f32 %v5528_v35, %v12641_v49  ;;  %v5564_v56 = vmul.f32 %v5532_v36, %v12644_v50  ;;  %v5565_v57 = vmul.f32 %v5536_v37, %v12647_v51  ;;  %v5566_v17 = vmul.f32 %v5540_v38, %v12652_v54 }
 0x417   : > { %v5544_v41 = vrot.slane %v10879_v52, %v12596_v23  ;;  %v5548_v16 = vrot.slane %v10879_v52, %v12598_v24  ;;  %v5631_v45 = vmul.f32 %v5597_v58, %v5559_v39  ;;  %v5632_v22 = vmul.f32 %v5611_v60, %v5560_v40 }
 0x418   : > { %v5633_v46 = vmul.f32 %v5619_v12, %v5561_v42  ;;  %v5634_v27 = vmul.f32 %v5621_v14, %v5562_v43  ;;  %v5635_v47 = vmul.f32 %v5604_v59, %v5563_v53  ;;  %v5636_v44 = vmul.f32 %v5618_v6, %v5564_v56 }
 0x419   : > { %v5567_v48 = vmul.f32 %v5544_v41, %v12665_v63  ;;  %v5568_v49 = vmul.f32 %v5548_v16, %v12668_v5  ;;  %v5637_v34 = vmul.f32 %v5620_v13, %v5565_v57  ;;  %v5638_v50 = vmul.f32 %v5622_v15, %v5566_v17 }
 0x41a   : > { %v5703_v35 = vadd.f32 %v5669_v7, %v5631_v45  ;;  %v5704_v51 = vadd.f32 %v5683_v10, %v5632_v22  ;;  %v5705_v36 = vadd.f32 %v5691_v18, %v5633_v46  ;;  %v5706_v54 = vadd.f32 %v5693_v20, %v5634_v27  ;;  %v5822_v20 = vld [vmem:[%s11249_s20] sm:$0x7]  ;;  %s11019_s20 = smov 96  }
 0x41b   : > { %v5639_v37 = vmul.f32 %v5597_v58, %v5567_v48  ;;  %v5640_v38 = vmul.f32 %v5611_v60, %v5568_v49  ;;  %v5707_v31 = vadd.f32 %v5676_v9, %v5635_v47  ;;  %v5708_v52 = vadd.f32 %v5690_v11, %v5636_v44 }
 0x41c   : > { %v5709_v39 = vadd.f32 %v5692_v19, %v5637_v34  ;;  %v5710_v40 = vadd.f32 %v5694_v21, %v5638_v50  ;;  %v5723_v12 = vcombine.low %v5703_v35, %v5704_v51  ;;  %v5724_v14 = vcombine.low %v5705_v36, %v5706_v54 }
 0x41d   : > { %v5711_v59 = vadd.f32 %v5669_v7, %v5639_v37  ;;  %v5712_v6 = vadd.f32 %v5683_v10, %v5640_v38  ;;  %v5725_v42 = vcombine.low %v5707_v31, %v5708_v52  ;;  %v13485_v19 = vmov 0.0  }
 0x41e   : > { %v5726_v63 = vcombine.low %v5709_v39, %v5710_v40  ;;  %v5733_v5 = vrot.slane %v5723_v12, %v12545_v55  ;;  %v5740_v41 = vrot.slane %v5724_v14, %v12545_v55  ;;  %v5827_v21 = vrot.slane %v5822_v20, %v12596_v23 }
 0x41f   : > { %v5747_v17 = vrot.slane %v5725_v42, %v12545_v55  ;;  %v5772_v13 = vcombine.low %v5711_v59, %v5712_v6  ;;  %v5835_v43 = vrot.slane %v5822_v20, %v12600_v25  ;;  %v5831_v57 = vrot.slane %v5822_v20, %v12598_v24 }
 0x420   : > { %v5754_v58 = vrot.slane %v5726_v63, %v12545_v55  ;;  %v5755_v60 = vcombine.low %v5733_v5, %v5740_v41  ;;  %v11018_v39 = vmov 65535  }
 0x421   : > { %v5779_v9 = vrot.slane %v5772_v13, %v12545_v55  ;;  %v6121_v40 = vsel %vm5341_vm0, 4294967295, %v11018_v39 }
 0x422   : > { %v5756_v11 = vcombine.low %v5747_v17, %v5754_v58  ;;  %v5763_v15 = vrot.slane %v5755_v60, %v12545_v55  ;;  %v12789_v12 = vsel %vm6120_vm3, %v6121_v40, 0 }
 0x423   : > { %v5786_v31 = vrot.slane %v5779_v9, %v12545_v55 }
 0x424   : > { %v5770_v7 = vrot.slane %v5756_v11, %v12545_v55 }
 0x426   : > { %v5771_v10 = vcombine.low %v5763_v15, %v5770_v7 }
 0x428   : > { %v5789_v18 = vpack.c.bf16 %v5786_v31, %v5771_v10 }
 0x42a   : > { %6000 = vmatmul.mubr.bf16.vlgmr.msra.gmra.mrb[0].mxu0 %v5789_v18  ;;  %10201 = vmatmul.mubr.bf16.vlgmr.msra.gmra.mrb[0].mxu1 %v5789_v18 }
 0x42b   : > { %10206 = vmatprep.mubr.msk.bf16.mxu1 %vm11017_vm1, %v13485_v19  ;;  %10230 = vmatprep.mubr.msk.bf16.mxu0 %vm11017_vm1, %v13485_v19 }
 0x4fd   : > { %v6001_v53 = vpop.f32.mrb[0].mxu0  ;;  %v6044_v56 = vpop.f32.mrb[0].mxu1 }
 0x4fe   : > { %v6002_v16 = vadd.f32 %v6001_v53, %v5827_v21  ;;  %v6003_v45 = vpop.f32.mrb[1].mxu0  ;;  %v10202_v22 = vpop.f32.mrb[1].mxu1  ;;  %v6045_v47 = vadd.f32 %v6044_v56, %v5835_v43 }
 0x4ff   : > { %v6005_v46 = vpop.f32.mrb[2].mxu0  ;;  %v6047_v27 = vpop.f32.mrb[2].mxu1  ;;  %v6004_v50 = vadd.f32 %v6003_v45, %v5831_v57 }
 0x500   : > { %v6006_v44 = vadd.f32 %v6005_v46, %v5827_v21  ;;  %v6048_v48 = vadd.f32 %v6047_v27, %v5835_v43  ;;  %v6007_v49 = vpop.f32.mrb[3].mxu0  ;;  %v10203_v34 = vpop.f32.mrb[3].mxu1  ;;  %v6051_v51 = vmul.f32 0.17677669, %v6002_v16 }
 0x501   : > { %v6008_v35 = vadd.f32 %v6007_v49, %v5831_v57 }
 0x502   : > { %v6052_v36 = vmul.f32 0.17677669, %v6006_v44  ;;  %v12784_v54 = vpack.c.bf16 %v6048_v48, %v6045_v47 }
 0x503   : > { %v6054_v37 = vpack.c.bf16 %v6008_v35, %v6004_v50 }
 0x504   : > { %v6053_v38 = vpack.c.bf16 %v6052_v36, %v6051_v51  ;;  %v6124_v14 = vand.u32 %v12789_v12, %v12784_v54 }
 0x505   : > { %v6061_v52 = vsel %vm6056_vm2, %v6054_v37, 0  ;;  %v6523_v41 = vshrl.u32 %v6054_v37, 16  ;;  %v6526_v17 = vshll.u32 %v6054_v37, 16 }
 0x506   : > { %10205 = vmatpush3.bf16.xpose.msra.mxu1 %v6061_v52  ;;  %v6516_v10 = vshrl.u32 %v6053_v38, 16  ;;  %v6519_v18 = vshll.u32 %v6053_v38, 16 }
 0x507   : > { %10210 = vmatprep.subr.bf16.mxu1 %v13485_v19  ;;  %v6525_v13 = vrot.slane %v6523_v41, 2  ;;  %v6528_v58 = vrot.slane %v6526_v17, 3 }
 0x508   : > { %v6518_v20 = vrot.slane %v6516_v10, 2  ;;  %v6521_v21 = vrot.slane %v6519_v18, 3 }
 0x509   : > { %v6529_v60 = vor.u32 %v6528_v58, %v6525_v13 }
 0x50a   : > { %v6522_v43 = vor.u32 %v6521_v21, %v6518_v20 }
 0x50b   : > { %v6534_v50 = vsel %vm6056_vm2, %v6529_v60, 0 }
 0x50d   : > { %10207 = vmatmul.mubr.msk.bf16.vlgmr.msra.gmra.mrb[4].mxu1 %vm6056_vm2, %v6053_v38 }
 0x50e   : > { %10211 = vmatpush3.bf16.msra.mxu1 %v6124_v14  ;;  %10212 = vmatprep.mubr.msk.bf16.mxu1 %vm11017_vm1, %v13485_v19 }
 0x50f   : > { %10216 = vmatprep.subr.bf16.mxu1 %v13485_v19 }
 0x5e0   : > { %v6097_v59 = vpop.f32.mrb[4].mxu1 }
 0x5e1   : > { %v10208_v6 = vpop.f32.mrb[5].mxu1  ;;  %v6104_v42 = vsel %vm6103_vm4, %v6097_v59, -inf }
 0x5e2   : > { %6105 = vmax.xlane.f32.xlu0 %v6104_v42  ;;  %v6100_v63 = vpop.f32.mrb[6].mxu1 }
 0x5e3   : > { %v10209_v5 = vpop.f32.mrb[7].mxu1 }
 0x5f8   : > { %6170 = vrot.lane.b32.xlu0 %v6054_v37, %s11019_s20 }
 0x5fc   : > { %6391 = vrot.lane.b32.xlu0 %v6054_v37, %s11020_s28 }
 0x600   : > { %6643 = vrot.lane.b32.xlu0 %v6529_v60, %s11019_s20 }
 0x604   : > { %6753 = vrot.lane.b32.xlu0 %v6529_v60, %s11021_s1 }
 0x608   : > { %6863 = vrot.lane.b32.xlu0 %v6529_v60, %s11020_s28 }
 0x66f   : > { %v6106_v9 = vpop.xlane.xlu0 %6105 }
 0x670   : > { %v6107_v11 = vsub.f32 %v6097_v59, %v6106_v9 }
 0x672   : > { %v6108_v15 = vmul.f32 1.442695, %v6107_v11 }
 0x673   : > { %v6171_v57 = vpop.permute.xlu0 %6170 }
 0x674   : > { %10880 = vpow2.f32 %v6108_v15  ;;  %v6176_v44 = vsel %vm6056_vm2, %v6171_v57, 0 }
 0x677   : > { %v6392_v27 = vpop.permute.xlu0 %6391 }
 0x678   : > { %v6397_v49 = vsel %vm6056_vm2, %v6392_v27, 0 }
 0x67b   : > { %v6644_v35 = vpop.permute.xlu0 %6643 }
 0x67c   : > { %v6649_v51 = vsel %vm6056_vm2, %v6644_v35, 0 }
 0x67e   : > { %v10881_v7 = vpop.eup %10880 }
 0x67f   : > { %v6110_v31 = vsel %vm6103_vm4, %v10881_v7, 0.0  ;;  %v6754_v36 = vpop.permute.xlu0 %6753 }
 0x680   : > { %6111 = vadd.xlane.f32.xlu1 %v6110_v31 }
 0x683   : > { %v6864_v52 = vpop.permute.xlu0 %6863 }
 0x684   : > { %v6869_v40 = vsel %vm6056_vm2, %v6864_v52, 0 }
 0x691   : > { %6167 = vrot.lane.b32.xlu1 %v6053_v38, %s11019_s20 }
 0x695   : > { %6281 = vrot.lane.b32.xlu1 %v6054_v37, %s11021_s1 }
 0x699   : > { %6279 = vrot.lane.b32.xlu1 %v6053_v38, %s11021_s1 }
 0x69d   : > { %6389 = vrot.lane.b32.xlu1 %v6053_v38, %s11020_s28  ;;  %v6759_v38 = vsel %vm6056_vm2, %v6754_v36, 0 }
 0x6a1   : > { %6641 = vrot.lane.b32.xlu1 %v6522_v43, %s11019_s20 }
 0x6a5   : > { %6751 = vrot.lane.b32.xlu1 %v6522_v43, %s11021_s1 }
 0x6a9   : > { %6861 = vrot.lane.b32.xlu1 %v6522_v43, %s11020_s28 }
 0x70d   : > { %v6112_v53 = vpop.xlane.xlu1 %6111 }
 0x70e   : > { %10882 = vrcp.f32 %v6112_v53 }
 0x711   : > { %v6168_v56 = vpop.permute.xlu1 %6167 }
 0x715   : > { %v6282_v16 = vpop.permute.xlu1 %6281 }
 0x716   : > { %v6287_v45 = vsel %vm6056_vm2, %v6282_v16, 0 }
 0x717   : > { %10229 = vmatpush3.bf16.xpose.msra.mxu0 %v6287_v45 }
 0x718   : > { %v10883_v22 = vpop.eup %10882  ;;  %10240 = vmatprep.subr.bf16.mxu0 %v13485_v19 }
 0x719   : > { %v6114_v46 = vmul.f32 %v10883_v22, %v10881_v7  ;;  %v6280_v48 = vpop.permute.xlu1 %6279 }
 0x71b   : > { %v6115_v47 = vpack.c.bf16 %v6114_v46, %v6114_v46 }
 0x71d   : > { %10213 = vmatmul.mubr.msk.bf16.vlgmr.msra.gmra.mrb[8].mxu1 %vm6116_vm5, %v6115_v47  ;;  %v6390_v34 = vpop.permute.xlu1 %6389 }
 0x71e   : > { %10217 = vmatpush3.bf16.xpose.msra.mxu1 %v6176_v44  ;;  %10231 = vmatmul.mubr.msk.bf16.vlgmr.msra.gmra.mrb[4].mxu0 %vm6056_vm2, %v6280_v48 }
 0x71f   : > { %10241 = vmatpush3.bf16.xpose.msra.mxu0 %v6397_v49  ;;  %10218 = vmatprep.mubr.msk.bf16.mxu1 %vm11017_vm1, %v13485_v19 }
 0x720   : > { %10242 = vmatprep.mubr.msk.bf16.mxu0 %vm11017_vm1, %v13485_v19  ;;  %10252 = vmatprep.subr.bf16.mxu0 %v13485_v19 }
 0x721   : > { %10222 = vmatprep.subr.bf16.mxu1 %v13485_v19  ;;  %v6642_v37 = vpop.permute.xlu1 %6641 }
 0x725   : > { %10219 = vmatmul.mubr.msk.bf16.vlgmr.msra.gmra.mrb[12].mxu1 %vm6056_vm2, %v6168_v56  ;;  %v6752_v39 = vpop.permute.xlu1 %6751 }
 0x726   : > { %10243 = vmatmul.mubr.msk.bf16.vlgmr.msra.gmra.mrb[8].mxu0 %vm6056_vm2, %v6390_v34  ;;  %10224 = vmatprep.mubr.msk.bf16.mxu1 %vm11017_vm1, %v13485_v19 }
 0x727   : > { %10253 = vmatpush3.bf16.xpose.msra.mxu0 %v6534_v50  ;;  %10254 = vmatprep.mubr.msk.bf16.mxu0 %vm11017_vm1, %v13485_v19 }
 0x728   : > { %10264 = vmatprep.subr.bf16.mxu0 %v13485_v19 }
 0x729   : > { %v6862_v14 = vpop.permute.xlu1 %6861 }
 0x72e   : > { %10255 = vmatmul.mubr.msk.bf16.vlgmr.msra.gmra.mrb[12].mxu0 %vm6056_vm2, %v6522_v43 }
 0x72f   : > { %10265 = vmatpush3.bf16.xpose.msra.mxu0 %v6649_v51  ;;  %10266 = vmatprep.mubr.msk.bf16.mxu0 %vm11017_vm1, %v13485_v19 }
 0x730   : > { %10276 = vmatprep.subr.bf16.mxu0 %v13485_v19 }
 0x736   : > { %10267 = vmatmul.mubr.msk.bf16.vlgmr.msra.gmra.mrb[16].mxu0 %vm6056_vm2, %v6642_v37 }
 0x737   : > { %10277 = vmatpush3.bf16.xpose.msra.mxu0 %v6759_v38  ;;  %10278 = vmatprep.mubr.msk.bf16.mxu0 %vm11017_vm1, %v13485_v19 }
 0x738   : > { %10288 = vmatprep.subr.bf16.mxu0 %v13485_v19 }
 0x73e   : > { %10279 = vmatmul.mubr.msk.bf16.vlgmr.msra.gmra.mrb[20].mxu0 %vm6056_vm2, %v6752_v39 }
 0x73f   : > { %10289 = vmatpush3.bf16.xpose.msra.mxu0 %v6869_v40  ;;  %10290 = vmatprep.mubr.msk.bf16.mxu0 %vm11017_vm1, %v13485_v19 }
 0x740   : > { %10300 = vmatprep.subr.bf16.mxu0 %v13485_v19 }
 0x746   : > { %10291 = vmatmul.mubr.msk.bf16.vlgmr.msra.gmra.mrb[24].mxu0 %vm6056_vm2, %v6862_v14 }
 0x747   : > { %10316 = vmatprep.mubr.msk.bf16.mxu0 %vm11017_vm1, %v13485_v19 }
 0x7f0   : > { %v12849_v59 = vpop.f32.mrb[8].mxu1 }
 0x7f1   : > { %v10214_v6 = vpop.f32.mrb[9].mxu1  ;;  %v6323_v42 = vpop.f32.mrb[4].mxu0 }
 0x7f2   : > { %v6163_v63 = vpop.f32.mrb[10].mxu1  ;;  %v10232_v5 = vpop.f32.mrb[5].mxu0  ;;  %v6329_v41 = vsel %vm6103_vm4, %v6323_v42, -inf }
 0x7f3   : > { %6330 = vmax.xlane.f32.xlu1 %v6329_v41  ;;  %v10215_v17 = vpop.f32.mrb[11].mxu1  ;;  %v6326_v13 = vpop.f32.mrb[6].mxu0 }
 0x7f4   : > { %v10233_v58 = vpop.f32.mrb[7].mxu0 }
 0x7f8   : > { %v6212_v60 = vpop.f32.mrb[12].mxu1 }
 0x7f9   : > { %v10220_v9 = vpop.f32.mrb[13].mxu1  ;;  %v6433_v11 = vpop.f32.mrb[8].mxu0  ;;  %v6218_v15 = vsel %vm6103_vm4, %v6212_v60, -inf }
 0x7fa   : > { %v10244_v7 = vpop.f32.mrb[9].mxu0  ;;  %6219 = vmax.xlane.f32.xlu0 %v6218_v15  ;;  %v6215_v31 = vpop.f32.mrb[14].mxu1  ;;  %v6439_v21 = vsel %vm6103_vm4, %v6433_v11, -inf }
 0x7fb   : > { %v10221_v10 = vpop.f32.mrb[15].mxu1  ;;  %v6436_v18 = vpop.f32.mrb[10].mxu0 }
 0x7fc   : > { %v10245_v20 = vpop.f32.mrb[11].mxu0 }
 0x7fe   : > { %6440 = vmax.xlane.f32.xlu0 %v6439_v21 }
 0x801   : > { %v6570_v43 = vpop.f32.mrb[12].mxu0 }
 0x802   : > { %v10256_v53 = vpop.f32.mrb[13].mxu0  ;;  %v6576_v56 = vsel %vm6103_vm4, %v6570_v43, -inf }
 0x803   : > { %v6573_v57 = vpop.f32.mrb[14].mxu0  ;;  %6577 = vmax.xlane.f32.xlu0 %v6576_v56 }
 0x804   : > { %v10257_v16 = vpop.f32.mrb[15].mxu0 }
 0x809   : > { %v6685_v45 = vpop.f32.mrb[16].mxu0 }
 0x80a   : > { %v10268_v22 = vpop.f32.mrb[17].mxu0  ;;  %v6691_v46 = vsel %vm6103_vm4, %v6685_v45, -inf }
 0x80b   : > { %v6688_v27 = vpop.f32.mrb[18].mxu0  ;;  %6692 = vmax.xlane.f32.xlu0 %v6691_v46 }
 0x80c   : > { %v10269_v47 = vpop.f32.mrb[19].mxu0 }
 0x811   : > { %v6795_v44 = vpop.f32.mrb[20].mxu0 }
 0x812   : > { %v10280_v48 = vpop.f32.mrb[21].mxu0  ;;  %v6801_v49 = vsel %vm6103_vm4, %v6795_v44, -inf }
 0x813   : > { %6802 = vmax.xlane.f32.xlu1 %v6801_v49  ;;  %v6798_v34 = vpop.f32.mrb[22].mxu0 }
 0x814   : > { %v10281_v50 = vpop.f32.mrb[23].mxu0 }
 0x815   : > { %v6591_v50 = vshll.u32 %v12784_v54, 16 }
 0x819   : > { %v6905_v35 = vpop.f32.mrb[24].mxu0 }
 0x81a   : > { %v10292_v51 = vpop.f32.mrb[25].mxu0  ;;  %v6911_v36 = vsel %vm6103_vm4, %v6905_v35, -inf }
 0x81b   : > { %v6908_v37 = vpop.f32.mrb[26].mxu0  ;;  %6912 = vmax.xlane.f32.xlu0 %v6911_v36  ;;  %v6593_v51 = vrot.slane %v6591_v50, 3 }
 0x81c   : > { %v10293_v38 = vpop.f32.mrb[27].mxu0 }
 0x880   : > { %v6331_v52 = vpop.xlane.xlu1 %6330 }
 0x881   : > { %v6332_v39 = vsub.f32 %v6323_v42, %v6331_v52 }
 0x883   : > { %v6333_v40 = vmul.f32 1.442695, %v6332_v39 }
 0x885   : > { %10884 = vpow2.f32 %v6333_v40 }
 0x887   : > { %v6220_v14 = vpop.xlane.xlu0 %6219 }
 0x888   : > { %v6221_v17 = vsub.f32 %v6212_v60, %v6220_v14 }
 0x88a   : > { %v6222_v15 = vmul.f32 1.442695, %v6221_v17 }
 0x88b   : > { %v6441_v6 = vpop.xlane.xlu0 %6440 }
 0x88c   : > { %v6442_v63 = vsub.f32 %v6433_v11, %v6441_v6 }
 0x88e   : > { %v6443_v5 = vmul.f32 1.442695, %v6442_v63 }
 0x88f   : > { %v12858_v41 = vpop.eup %10884 }
 0x890   : > { %10886 = vpow2.f32 %v6443_v5  ;;  %v6578_v13 = vpop.xlane.xlu0 %6577  ;;  %v6335_v58 = vsel %vm6103_vm4, %v12858_v41, 0.0 }
 0x891   : > { %v6579_v9 = vsub.f32 %v6570_v43, %v6578_v13  ;;  %6336 = vadd.xlane.f32.xlu0 %v6335_v58 }
 0x893   : > { %v6580_v7 = vmul.f32 1.442695, %v6579_v9 }
 0x895   : > { %10888 = vpow2.f32 %v6580_v7 }
 0x896   : > { %10890 = vpow2.f32 %v6222_v15 }
 0x898   : > { %v6693_v20 = vpop.xlane.xlu0 %6692 }
 0x899   : > { %v6694_v22 = vsub.f32 %v6685_v45, %v6693_v20  ;;  %v6588_v45 = vshrl.u32 %v12784_v54, 16 }
 0x89a   : > { %v12862_v42 = vpop.eup %10886 }
 0x89b   : > { %v6445_v11 = vsel %vm6103_vm4, %v12862_v42, 0.0  ;;  %v6695_v27 = vmul.f32 1.442695, %v6694_v22 }
 0x89c   : > { %6446 = vadd.xlane.f32.xlu1 %v6445_v11 }
 0x89f   : > { %v12866_v31 = vpop.eup %10888 }
 0x8a0   : > { %v6582_v60 = vsel %vm6103_vm4, %v12866_v31, 0.0  ;;  %v10891_v10 = vpop.eup %10890  ;;  %v6803_v21 = vpop.xlane.xlu1 %6802 }
 0x8a1   : > { %6583 = vadd.xlane.f32.xlu1 %v6582_v60  ;;  %v6224_v18 = vsel %vm6103_vm4, %v10891_v10, 0.0  ;;  %v6804_v43 = vsub.f32 %v6795_v44, %v6803_v21 }
 0x8a3   : > { %v6805_v56 = vmul.f32 1.442695, %v6804_v43 }
 0x8a5   : > { %6225 = vadd.xlane.f32.xlu1 %v6224_v18  ;;  %10892 = vpow2.f32 %v6805_v56 }
 0x8a7   : > { %6231 = vrot.lane.b32.xlu0 %v12784_v54, %s11019_s20 }
 0x8a8   : > { %v6913_v53 = vpop.xlane.xlu0 %6912 }
 0x8a9   : > { %v6914_v57 = vsub.f32 %v6905_v35, %v6913_v53  ;;  %v6590_v35 = vrot.slane %v6588_v45, 2 }
 0x8ab   : > { %6451 = vrot.lane.b32.xlu0 %v12784_v54, %s11020_s28  ;;  %v6915_v16 = vmul.f32 1.442695, %v6914_v57  ;;  %v6594_v36 = vor.u32 %v6593_v51, %v6590_v35 }
 0x8ad   : > { %10894 = vpow2.f32 %v6915_v16  ;;  %v6599_v18 = vand.u32 %v6594_v36, %v12789_v12 }
 0x8ae   : > { %10896 = vpow2.f32 %v6695_v27 }
 0x8af   : > { %v12877_v46 = vpop.eup %10892 }
 0x8b0   : > { %v6807_v47 = vsel %vm6103_vm4, %v12877_v46, 0.0 }
 0x8b6   : > { %6341 = vrot.lane.b32.xlu1 %v12784_v54, %s11021_s1 }
 0x8b7   : > { %v12881_v48 = vpop.eup %10894 }
 0x8b8   : > { %v6917_v44 = vsel %vm6103_vm4, %v12881_v48, 0.0  ;;  %v12885_v49 = vpop.eup %10896 }
 0x8b9   : > { %v6697_v34 = vsel %vm6103_vm4, %v12885_v49, 0.0 }
 0x8ca   : > { %6808 = vadd.xlane.f32.xlu0 %v6807_v47 }
 0x8ce   : > { %6918 = vadd.xlane.f32.xlu0 %v6917_v44 }
 0x8da   : > { %6698 = vadd.xlane.f32.xlu1 %v6697_v34 }
 0x8e4   : > { %6813 = vrot.lane.b32.xlu0 %v6594_v36, %s11021_s1 }
 0x8eb   : > { %6703 = vrot.lane.b32.xlu1 %v6594_v36, %s11019_s20 }
 0x8ef   : > { %6923 = vrot.lane.b32.xlu1 %v6594_v36, %s11020_s28 }
 0x91e   : > { %v6337_v37 = vpop.xlane.xlu0 %6336 }
 0x922   : > { %v6232_v38 = vpop.permute.xlu0 %6231 }
 0x923   : > { %v6237_v52 = vand.u32 %v6232_v38, %v12789_v12  ;;  %v10829_v38 = vld [vmem:[%s11219_s19 + $0x8] sm:$0xff]  }
 0x925   : > { %10223 = vmatpush3.bf16.msra.mxu1 %v6237_v52 }
 0x926   : > { %10234 = vmatprep.subr.bf16.mxu1 %v13485_v19  ;;  %v6452_v9 = vpop.permute.xlu0 %6451 }
 0x927   : > { %v6457_v11 = vand.u32 %v6452_v9, %v12789_v12 }
 0x929   : > { %v6447_v39 = vpop.xlane.xlu1 %6446 }
 0x92e   : > { %v6584_v40 = vpop.xlane.xlu1 %6583 }
 0x932   : > { %v6226_v14 = vpop.xlane.xlu1 %6225 }
 0x933   : > { %10898 = vrcp.f32 %v6226_v14 }
 0x934   : > { %10900 = vrcp.f32 %v6337_v37  ;;  %v10828_v37 = vld [vmem:[%s11219_s19] sm:$0xff]  }
 0x935   : > { %10902 = vrcp.f32 %v6447_v39  ;;  %10301 = vmatpush3.bf16.msra.mxu0 %v10828_v37 }
 0x936   : > { %v6342_v63 = vpop.permute.xlu1 %6341  ;;  %10904 = vrcp.f32 %v6584_v40  ;;  %10302 = vmatprep.subr.bf16.mxu0 %v13485_v19 }
 0x937   : > { %v6347_v13 = vand.u32 %v6342_v63, %v12789_v12 }
 0x939   : > { %10303 = vmatpush3.bf16.msra.mxu0 %v10829_v38 }
 0x93a   : > { %10304 = vmatprep.subr.bf16.mxu0 %v13485_v19 }
 0x93d   : > { %v10899_v54 = vpop.eup %10898 }
 0x93e   : > { %v6228_v6 = vmul.f32 %v10899_v54, %v10891_v10  ;;  %v10901_v17 = vpop.eup %10900 }
 0x93f   : > { %v6339_v58 = vmul.f32 %v10901_v17, %v12858_v41  ;;  %v10903_v7 = vpop.eup %10902 }
 0x940   : > { %v6229_v5 = vpack.c.bf16 %v6228_v6, %v6228_v6  ;;  %v6449_v60 = vmul.f32 %v10903_v7, %v12862_v42  ;;  %v10905_v41 = vpop.eup %10904 }
 0x941   : > { %v6340_v15 = vpack.c.bf16 %v6339_v58, %v6339_v58  ;;  %v6586_v20 = vmul.f32 %v10905_v41, %v12866_v31  ;;  %v10833_v41 = vld [vmem:[%s11219_s19 + $0x28] sm:$0xff]  }
 0x942   : > { %10225 = vmatmul.mubr.msk.bf16.vlgmr.msra.gmra.mrb[16].mxu1 %vm6116_vm5, %v6229_v5  ;;  %v6450_v10 = vpack.c.bf16 %v6449_v60, %v6449_v60  ;;  %v10831_v60 = vld [vmem:[%s11219_s19 + $0x18] sm:$0xff]  }
 0x943   : > { %10235 = vmatpush3.bf16.msra.mxu1 %v6347_v13  ;;  %10236 = vmatprep.mubr.msk.bf16.mxu1 %vm11017_vm1, %v13485_v19  ;;  %v6587_v21 = vpack.c.bf16 %v6586_v20, %v6586_v20 }
 0x944   : > { %10246 = vmatprep.subr.bf16.mxu1 %v13485_v19 }
 0x94a   : > { %10237 = vmatmul.mubr.msk.bf16.vlgmr.msra.gmra.mrb[20].mxu1 %vm6116_vm5, %v6340_v15 }
 0x94b   : > { %10247 = vmatpush3.bf16.msra.mxu1 %v6457_v11  ;;  %10248 = vmatprep.mubr.msk.bf16.mxu1 %vm11017_vm1, %v13485_v19 }
 0x94c   : > { %10258 = vmatprep.subr.bf16.mxu1 %v13485_v19 }
 0x952   : > { %10249 = vmatmul.mubr.msk.bf16.vlgmr.msra.gmra.mrb[24].mxu1 %vm6116_vm5, %v6450_v10  ;;  %v10832_v10 = vld [vmem:[%s11219_s19 + $0x20] sm:$0xff]  }
 0x953   : > { %10259 = vmatpush3.bf16.msra.mxu1 %v6599_v18  ;;  %10260 = vmatprep.mubr.msk.bf16.mxu1 %vm11017_vm1, %v13485_v19 }
 0x954   : > { %10270 = vmatprep.subr.bf16.mxu1 %v13485_v19 }
 0x957   : > { %v6809_v42 = vpop.xlane.xlu0 %6808 }
 0x95a   : > { %10261 = vmatmul.mubr.msk.bf16.vlgmr.msra.gmra.mrb[28].mxu1 %vm6116_vm5, %v6587_v21 }
 0x95b   : > { %10272 = vmatprep.mubr.msk.bf16.mxu1 %vm11017_vm1, %v13485_v19  ;;  %v6919_v57 = vpop.xlane.xlu0 %6918 }
 0x95f   : > { %v6814_v16 = vpop.permute.xlu0 %6813 }
 0x960   : > { %v6819_v44 = vand.u32 %v6814_v16, %v12789_v12 }
 0x967   : > { %v6699_v43 = vpop.xlane.xlu1 %6698 }
 0x968   : > { %10906 = vrcp.f32 %v6699_v43  ;;  %v10834_v43 = vld [vmem:[%s11219_s19 + $0x30] sm:$0xff]  }
 0x969   : > { %10908 = vrcp.f32 %v6809_v42 }
 0x96a   : > { %10910 = vrcp.f32 %v6919_v57 }
 0x96b   : > { %v6704_v53 = vpop.permute.xlu1 %6703 }
 0x96c   : > { %v6709_v56 = vand.u32 %v6704_v53, %v12789_v12 }
 0x96e   : > { %10271 = vmatpush3.bf16.msra.mxu1 %v6709_v56  ;;  %v10835_v56 = vld [vmem:[%s11219_s19 + $0x38] sm:$0xff]  }
 0x96f   : > { %10282 = vmatprep.subr.bf16.mxu1 %v13485_v19  ;;  %v6924_v45 = vpop.permute.xlu1 %6923 }
 0x970   : > { %v6929_v35 = vand.u32 %v6924_v45, %v12789_v12  ;;  %v10830_v12 = vld [vmem:[%s11219_s19 + $0x10] sm:$0xff]  }
 0x971   : > { %10305 = vmatpush3.bf16.msra.mxu0 %v10830_v12 }
 0x972   : > { %v10907_v31 = vpop.eup %10906  ;;  %10306 = vmatprep.subr.bf16.mxu0 %v13485_v19 }
 0x973   : > { %v6701_v22 = vmul.f32 %v10907_v31, %v12885_v49  ;;  %v10909_v47 = vpop.eup %10908 }
 0x974   : > { %v6811_v34 = vmul.f32 %v10909_v47, %v12877_v46  ;;  %v10911_v50 = vpop.eup %10910  ;;  %v13486_v46 = vmov 0  }
 0x975   : > { %v6702_v27 = vpack.c.bf16 %v6701_v22, %v6701_v22  ;;  %v6921_v51 = vmul.f32 %v10911_v50, %v12881_v48  ;;  %10307 = vmatpush3.bf16.msra.mxu0 %v10831_v60 }
 0x976   : > { %v6812_v49 = vpack.c.bf16 %v6811_v34, %v6811_v34  ;;  %10308 = vmatprep.subr.bf16.mxu0 %v13485_v19 }
 0x977   : > { %10273 = vmatmul.mubr.msk.bf16.vlgmr.msra.gmra.mrb[32].mxu1 %vm6116_vm5, %v6702_v27  ;;  %v6922_v36 = vpack.c.bf16 %v6921_v51, %v6921_v51 }
 0x978   : > { %10283 = vmatpush3.bf16.msra.mxu1 %v6819_v44  ;;  %10284 = vmatprep.mubr.msk.bf16.mxu1 %vm11017_vm1, %v13485_v19 }
 0x979   : > { %10294 = vmatprep.subr.bf16.mxu1 %v13485_v19  ;;  %10309 = vmatpush3.bf16.msra.mxu0 %v10832_v10 }
 0x97a   : > { %10310 = vmatprep.subr.bf16.mxu0 %v13485_v19 }
 0x97d   : > { %10311 = vmatpush3.bf16.msra.mxu0 %v10833_v41 }
 0x97e   : > { %10312 = vmatprep.subr.bf16.mxu0 %v13485_v19 }
 0x97f   : > { %10285 = vmatmul.mubr.msk.bf16.vlgmr.msra.gmra.mrb[36].mxu1 %vm6116_vm5, %v6812_v49 }
 0x980   : > { %10295 = vmatpush3.bf16.msra.mxu1 %v6929_v35  ;;  %10296 = vmatprep.mubr.msk.bf16.mxu1 %vm11017_vm1, %v13485_v19 }
 0x981   : > { %10313 = vmatpush3.bf16.msra.mxu0 %v10834_v43 }
 0x982   : > { %10314 = vmatprep.subr.bf16.mxu0 %v13485_v19 }
 0x985   : > { %10315 = vmatpush3.bf16.msra.mxu0 %v10835_v56 }
 0x987   : > { %10297 = vmatmul.mubr.msk.bf16.vlgmr.msra.gmra.mrb[40].mxu1 %vm6116_vm5, %v6922_v36 }
 0x988   : > { %7930 = vmatprep.mubr.bf16.mxu1 %v13486_v46 }
 0xa15   : > { %v6273_v52 = vpop.f32.mrb[16].mxu1 }
 0xa16   : > { %v10226_v48 = vpop.f32.mrb[17].mxu1 }
 0xa17   : > { %v6276_v39 = vpop.f32.mrb[18].mxu1 }
 0xa18   : > { %v10227_v40 = vpop.f32.mrb[19].mxu1 }
 0xa1d   : > { %v6383_v14 = vpop.f32.mrb[20].mxu1 }
 0xa1e   : > { %v10238_v54 = vpop.f32.mrb[21].mxu1 }
 0xa1f   : > { %v6386_v6 = vpop.f32.mrb[22].mxu1 }
 0xa20   : > { %v10239_v63 = vpop.f32.mrb[23].mxu1 }
 0xa21   : > { %v9537_v63 = vld [vmem:[%s13487_s29] ss:$0 sm:$0xff] }
 0xa25   : > { %v6493_v5 = vpop.f32.mrb[24].mxu1 }
 0xa26   : > { %v10250_v17 = vpop.f32.mrb[25].mxu1 }
 0xa27   : > { %v6496_v13 = vpop.f32.mrb[26].mxu1 }
 0xa28   : > { %v10251_v58 = vpop.f32.mrb[27].mxu1 }
 0xa2d   : > { %v6635_v9 = vpop.f32.mrb[28].mxu1 }
 0xa2e   : > { %v10262_v15 = vpop.f32.mrb[29].mxu1 }
 0xa2f   : > { %v6638_v7 = vpop.f32.mrb[30].mxu1 }
 0xa30   : > { %v10263_v11 = vpop.f32.mrb[31].mxu1 }
 0xa4a   : > { %v6745_v18 = vpop.f32.mrb[32].mxu1 }
 0xa4b   : > { %v10784_v20 = vpack.i.bf16 %v6273_v52, %v6745_v18  ;;  %v10274_v21 = vpop.f32.mrb[33].mxu1 }
 0xa4c   : > { %v6748_v42 = vpop.f32.mrb[34].mxu1 }
 0xa4d   : > { %10785 = vrot.lane.b32.xlu1 %v10784_v20, %s11020_s28  ;;  %v10275_v53 = vpop.f32.mrb[35].mxu1 }
 0xa52   : > { %v6855_v57 = vpop.f32.mrb[36].mxu1 }
 0xa53   : > { %v10789_v31 = vpack.i.bf16 %v6383_v14, %v6855_v57  ;;  %v10286_v16 = vpop.f32.mrb[37].mxu1 }
 0xa54   : > { %v6858_v22 = vpop.f32.mrb[38].mxu1 }
 0xa55   : > { %10790 = vrot.lane.b32.xlu1 %v10789_v31, %s11021_s1  ;;  %v10287_v27 = vpop.f32.mrb[39].mxu1 }
 0xa59   : > { %6508 = vrot.lane.b32.xlu1 %v6493_v5, %s11019_s20  ;;  %v7203_v5 = vrot.slane %v9537_v63, %v12545_v55 }
 0xa5a   : > { %v6965_v47 = vpop.f32.mrb[40].mxu1 }
 0xa5b   : > { %6980 = vrot.lane.b32.xlu0 %v6965_v47, %s11019_s20  ;;  %v10298_v44 = vpop.f32.mrb[41].mxu1  ;;  %v7211_v13 = vcombine.high %v7203_v5, %v7203_v5  ;;  %v7219_v15 = vrot.slane %v7203_v5, %v12545_v55 }
 0xa5c   : > { %v6968_v34 = vpop.f32.mrb[42].mxu1 }
 0xa5d   : > { %v10299_v45 = vpop.f32.mrb[43].mxu1  ;;  %v7233_v41 = vrot.slane %v7211_v13, %v12545_v55  ;;  %v7241_v57 = vcombine.high %v7219_v15, %v7219_v15 }
 0xa5f   : > { %v7243_v34 = vcombine.high %v7233_v41, %v7233_v41 }
 0xabf   : > { %v10786_v49 = vpop.permute.xlu1 %10785 }
 0xac0   : > { %v10788_v19 = vunpack.i.h.bf16 %v10786_v49  ;;  %v10787_v35 = vunpack.i.l.bf16 %v10786_v49 }
 0xac2   : > { %v6511_v46 = vsel %vm6056_vm2, %v12849_v59, %v10788_v19  ;;  %v6983_v37 = vsel %vm6056_vm2, %v6635_v9, %v10787_v35  ;;  %v7196_v59 = vcombine.high %v9537_v63, %v9537_v63 }
 0xac4   : > { %v7210_v17 = vrot.slane %v7196_v59, %v12545_v55 }
 0xac6   : > { %v7212_v9 = vcombine.high %v7210_v17, %v7210_v17  ;;  %v7226_v7 = vrot.slane %v7210_v17, %v12545_v55 }
 0xac7   : > { %v10791_v50 = vpop.permute.xlu1 %10790 }
 0xac8   : > { %v10793_v51 = vunpack.i.h.bf16 %v10791_v50  ;;  %v10792_v36 = vunpack.i.l.bf16 %v10791_v50  ;;  %v7240_v56 = vrot.slane %v7212_v9, %v12545_v55  ;;  %v7242_v31 = vcombine.high %v7226_v7, %v7226_v7 }
 0xaca   : > { %v6513_v12 = vsel %vm6512_vm6, %v6511_v46, %v10793_v51  ;;  %v6984_v52 = vsel %vm6512_vm6, %v6983_v37, %v10792_v36  ;;  %v7244_v37 = vcombine.high %v7240_v56, %v7240_v56 }
 0xacb   : > { %v6509_v38 = vpop.permute.xlu1 %6508 }
 0xacc   : > { %v6515_v14 = vsel %vm6514_vm7, %v6513_v12, %v6509_v38 }
 0xacd   : > { %v6981_v48 = vpop.permute.xlu0 %6980 }
 0xace   : > { %v6985_v39 = vsel %vm6514_vm7, %v6984_v52, %v6981_v48 }
 0xacf   : > { %v6987_v40 = vrot.slane %v6985_v39, 3 }
 0xad1   : > { %v6990_v54 = vsel %vm6989_vm8, %v6515_v14, %v6987_v40 }
 0xad2   : > { %v6991_v6 = vpack.c.bf16 %v6987_v40, %v6990_v54 }
 0xad4   : > { %10317 = vmatmul.mubr.bf16.vlgmr.msra.gmra.mrb[28].mxu0 %v6991_v6 }
 0xba7   : > { %v7090_v58 = vpop.f32.mrb[28].mxu0 }
 0xba8   : > { %v7099_v11 = vcombine.high %v7090_v58, %v7090_v58  ;;  %v7106_v60 = vrot.slane %v7090_v58, %v12545_v55  ;;  %v10318_v10 = vpop.f32.mrb[29].mxu0 }
 0xba9   : > { %v7093_v18 = vpop.f32.mrb[30].mxu0 }
 0xbaa   : > { %v7113_v20 = vrot.slane %v7099_v11, %v12545_v55  ;;  %v7114_v21 = vcombine.high %v7106_v60, %v7106_v60  ;;  %v7122_v42 = vrot.slane %v7106_v60, %v12545_v55  ;;  %v7154_v43 = vrot.slane %v7093_v18, %v12545_v55  ;;  %v10319_v53 = vpop.f32.mrb[31].mxu0 }
 0xbac   : > { %v7115_v16 = vcombine.high %v7113_v20, %v7113_v20  ;;  %v7129_v22 = vrot.slane %v7113_v20, %v12545_v55  ;;  %v7136_v27 = vrot.slane %v7114_v21, %v12545_v55  ;;  %v7144_v47 = vcombine.high %v7122_v42, %v7122_v42 }
 0xbad   : > { %v7180_v44 = vadd.f32 %v7122_v42, %v12552_v61  ;;  %v7155_v45 = vcombine.high %v7154_v43, %v7154_v43  ;;  %v7162_v49 = vrot.slane %v7154_v43, %v12545_v55 }
 0xbae   : > { %v7143_v50 = vrot.slane %v7115_v16, %v12545_v55  ;;  %v7145_v19 = vcombine.high %v7129_v22, %v7129_v22  ;;  %v7146_v35 = vcombine.high %v7136_v27, %v7136_v27  ;;  %v7181_v51 = vadd.f32 %v7136_v27, %v12561_v1 }
 0xbaf   : > { %v7182_v36 = vadd.f32 %v7144_v47, %v12614_v32  ;;  %v7184_v46 = vadd.f32 %v7129_v22, %v12555_v62  ;;  %v7169_v38 = vrot.slane %v7155_v45, %v12545_v55  ;;  %v12982_v39 = vadd.f32 %v7219_v15, %v7180_v44 }
 0xbb0   : > { %v7147_v12 = vcombine.high %v7143_v50, %v7143_v50  ;;  %v7183_v61 = vadd.f32 %v7146_v35, %v12618_v33  ;;  %v7185_v52 = vadd.f32 %v7143_v50, %v12558_v0  ;;  %v7186_v48 = vadd.f32 %v7145_v19, %v12564_v2 }
 0xbb1   : > { %v12984_v40 = vadd.f32 %v7233_v41, %v7181_v51  ;;  %v12986_v14 = vadd.f32 %v7241_v57, %v7182_v36  ;;  %v7188_v1 = vadd.f32 %v7162_v49, %v12581_v8  ;;  %v12992_v54 = vadd.f32 %v7226_v7, %v7184_v46  ;;  %v13488_v51 = vld [vmem:[#allocation11_spill] sm:$0xff] }
 0xbb2   : > { %v7187_v62 = vadd.f32 %v7147_v12, %v12571_v4  ;;  %v12990_v32 = vadd.f32 %v7243_v34, %v7183_v61  ;;  %v12994_v6 = vadd.f32 %v7240_v56, %v7185_v52  ;;  %v7189_v0 = vadd.f32 %v7169_v38, %v12567_v3 }
 0xbb3   : > { %v7275_v2 = vcombine.low %v12982_v39, %v12984_v40  ;;  %v12999_v33 = vadd.f32 %v7242_v31, %v7186_v48  ;;  %v13007_v59 = vadd.f32 %v7219_v15, %v7188_v1 }
 0xbb4   : > { %v13001_v63 = vadd.f32 %v7244_v37, %v7187_v62  ;;  %v7276_v8 = vcombine.low %v12986_v14, %v12990_v32  ;;  %v7277_v4 = vcombine.low %v12992_v54, %v12994_v6  ;;  %v13009_v5 = vadd.f32 %v7233_v41, %v7189_v0 }
 0xbb5   : > { %v7285_v17 = vrot.slane %v7275_v2, %v12545_v55 }
 0xbb6   : > { %v7278_v3 = vcombine.low %v12999_v33, %v13001_v63  ;;  %v7292_v13 = vrot.slane %v7276_v8, %v12545_v55  ;;  %v7324_v58 = vcombine.low %v13007_v59, %v13009_v5  ;;  %v7299_v9 = vrot.slane %v7277_v4, %v12545_v55 }
 0xbb8   : > { %v7306_v7 = vrot.slane %v7278_v3, %v12545_v55  ;;  %v7307_v11 = vcombine.low %v7285_v17, %v7292_v13  ;;  %v7331_v15 = vrot.slane %v7324_v58, %v12545_v55 }
 0xbba   : > { %v7308_v60 = vcombine.low %v7299_v9, %v7306_v7  ;;  %v7338_v10 = vrot.slane %v7331_v15, %v12545_v55  ;;  %v7315_v41 = vrot.slane %v7307_v11, %v12545_v55 }
 0xbbc   : > { %v7322_v18 = vrot.slane %v7308_v60, %v12545_v55  ;;  %v7343_v20 = vsel %vm5341_vm0, %v7338_v10, 0.0 }
 0xbbd   : > { %7344 = vadd.xlane.f32.xlu1 %v7343_v20 }
 0xbbe   : > { %v7323_v21 = vcombine.low %v7315_v41, %v7322_v18 }
 0xbc0   : > { %7341 = vadd.xlane.f32.xlu0 %v7323_v21 }
 0xc4a   : > { %v7345_v42 = vpop.xlane.xlu1 %7344 }
 0xc4b   : > { %v7347_v43 = vmul.f32 0.0078125, %v7345_v42 }
 0xc4d   : > { %v7342_v53 = vpop.xlane.xlu0 %7341  ;;  %v7385_v56 = vrot.slane %v7347_v43, %v12596_v23  ;;  %v7389_v57 = vrot.slane %v7347_v43, %v12598_v24 }
 0xc4e   : > { %v7346_v31 = vmul.f32 0.0078125, %v7342_v53 }
 0xc4f   : > { %v13027_v16 = vsub.f32 %v13007_v59, %v7385_v56  ;;  %v13030_v22 = vsub.f32 %v13009_v5, %v7389_v57 }
 0xc50   : > { %v7353_v27 = vrot.slane %v7346_v31, %v12596_v23  ;;  %v7357_v47 = vrot.slane %v7346_v31, %v12598_v24  ;;  %v7361_v44 = vrot.slane %v7346_v31, %v12600_v25  ;;  %v7365_v34 = vrot.slane %v7346_v31, %v12602_v26 }
 0xc51   : > { %v7369_v45 = vrot.slane %v7346_v31, %v12604_v28  ;;  %v7373_v49 = vrot.slane %v7346_v31, %v12606_v29  ;;  %v7418_v50 = vmul.f32 %v13027_v16, %v13027_v16  ;;  %v7419_v19 = vmul.f32 %v13030_v22, %v13030_v22 }
 0xc52   : > { %v7377_v35 = vrot.slane %v7346_v31, %v12608_v30  ;;  %v7381_v36 = vrot.slane %v7346_v31, %v13488_v51  ;;  %v13045_v46 = vsub.f32 %v12982_v39, %v7353_v27  ;;  %v13048_v37 = vsub.f32 %v12984_v40, %v7357_v47  ;;  %v10836_v27 = vld [vmem:[%s11244_s23] ss:$8 sps:$4 sm:$0xff]   ;;  %v10838_v47 = vld [vmem:[%s11244_s23 + $0x4] ss:$8 sps:$4 sm:$0xff]  }
 0xc53   : > { %v13051_v38 = vsub.f32 %v12986_v14, %v7361_v44  ;;  %v13054_v12 = vsub.f32 %v12990_v32, %v7365_v34  ;;  %v13057_v61 = vsub.f32 %v12992_v54, %v7369_v45  ;;  %v13060_v52 = vsub.f32 %v12994_v6, %v7373_v49  ;;  %7898 = vmatprep.subr.bf16.mxu1 %v10838_v47  ;;  %v10841_v44 = vld [vmem:[%s11244_s23 + $0x14] ss:$8 sps:$4 sm:$0xff]   ;;  %v10839_v34 = vld [vmem:[%s11244_s23 + $0x10] ss:$8 sps:$4 sm:$0xff]   ;;  %v10844_v45 = vld [vmem:[%s11244_s23 + $0x24] ss:$8 sps:$4 sm:$0xff]  }
 0xc54   : > { %v13063_v48 = vsub.f32 %v12999_v33, %v7377_v35  ;;  %v13066_v1 = vsub.f32 %v13001_v63, %v7381_v36  ;;  %v7410_v62 = vmul.f32 %v13045_v46, %v13045_v46  ;;  %v7411_v0 = vmul.f32 %v13048_v37, %v13048_v37  ;;  %7899 = vmatpush1.bf16.msra.mxu1 %v10836_v27  ;;  %v10842_v49 = vld [vmem:[%s11244_s23 + $0x20] ss:$8 sps:$4 sm:$0xff]   ;;  %v10850_v35 = vld [vmem:[%s11244_s23 + $0x44] ss:$8 sps:$4 sm:$0xff]  }
 0xc55   : > { %v7412_v2 = vmul.f32 %v13051_v38, %v13051_v38  ;;  %v7413_v8 = vmul.f32 %v13054_v12, %v13054_v12  ;;  %v7414_v4 = vmul.f32 %v13057_v61, %v13057_v61  ;;  %v7415_v3 = vmul.f32 %v13060_v52, %v13060_v52  ;;  %7900 = vmatprep.subr.bf16.mxu1 %v10841_v44  ;;  %v10848_v36 = vld [vmem:[%s11244_s23 + $0x40] ss:$8 sps:$4 sm:$0xff]  }
 0xc56   : > { %v7416_v17 = vmul.f32 %v13063_v48, %v13063_v48  ;;  %v7417_v13 = vmul.f32 %v13066_v1, %v13066_v1  ;;  %v7430_v58 = vcombine.low %v7410_v62, %v7411_v0  ;;  %v7479_v10 = vcombine.low %v7418_v50, %v7419_v19  ;;  %v10847_v50 = vld [vmem:[%s11244_s23 + $0x34] ss:$8 sps:$4 sm:$0xff]   ;;  %v10845_v19 = vld [vmem:[%s11244_s23 + $0x30] ss:$8 sps:$4 sm:$0xff]  }
 0xc57   : > { %v7431_v9 = vcombine.low %v7412_v2, %v7413_v8  ;;  %v7432_v7 = vcombine.low %v7414_v4, %v7415_v3  ;;  %v10853_v62 = vld [vmem:[%s11244_s23 + $0x54] ss:$8 sps:$4 sm:$0xff]   ;;  %v10851_v0 = vld [vmem:[%s11244_s23 + $0x50] ss:$8 sps:$4 sm:$0xff]   ;;  %v10856_v2 = vld [vmem:[%s11244_s23 + $0x64] ss:$8 sps:$4 sm:$0xff]  }
 0xc58   : > { %v7433_v11 = vcombine.low %v7416_v17, %v7417_v13  ;;  %v7440_v15 = vrot.slane %v7430_v58, %v12545_v55  ;;  %v7486_v43 = vrot.slane %v7479_v10, %v12545_v55  ;;  %7901 = vmatpush1.bf16.msra.mxu1 %v10839_v34  ;;  %v10854_v8 = vld [vmem:[%s11244_s23 + $0x60] ss:$8 sps:$4 sm:$0xff]   ;;  %v10859_v4 = vld [vmem:[%s11244_s23 + $0x74] ss:$8 sps:$4 sm:$0xff]   ;;  %v10857_v3 = vld [vmem:[%s11244_s23 + $0x70] ss:$8 sps:$4 sm:$0xff]  }
 0xc59   : > { %v7447_v60 = vrot.slane %v7431_v9, %v12545_v55  ;;  %v7454_v41 = vrot.slane %v7432_v7, %v12545_v55  ;;  %7902 = vmatprep.subr.bf16.mxu1 %v10844_v45  ;;  %v10860_v17 = vld [vmem:[%s11260_s2 + $0x40] sm:$0xff]   ;;  %v10862_v58 = vld [vmem:[%s11260_s2 + $0x48] sm:$0xff]  }
 0xc5a   : > { %v7461_v18 = vrot.slane %v7433_v11, %v12545_v55  ;;  %v7493_v57 = vrot.slane %v7486_v43, %v12545_v55  ;;  %v10861_v13 = vld [vmem:[%s11260_s2] sm:$0xff]   ;;  %10162 = vmatprep.subr.bf16.mxu0 %v10860_v17  ;;  %v10863_v9 = vld [vmem:[%s11260_s2 + $0x8] sm:$0xff]  }
 0xc5b   : > { %v7462_v20 = vcombine.low %v7440_v15, %v7447_v60  ;;  %10163 = vmatpush3.bf16.msra.mxu0 %v10861_v13  ;;  %v9538_v7 = vld [vmem:[%s13489_s25] ss:$0 sm:$0xff] }
 0xc5c   : > { %v7463_v21 = vcombine.low %v7454_v41, %v7461_v18  ;;  %v7498_v31 = vsel %vm5341_vm0, %v7493_v57, 0.0  ;;  %7903 = vmatpush1.bf16.msra.mxu1 %v10842_v49  ;;  %10164 = vmatprep.subr.bf16.mxu0 %v10862_v58  ;;  %v9539_v11 = vld [vmem:[%s13490_s7] ss:$0 sm:$0xff]  ;;  %v7574_v15 = vcombine.high %v9538_v7, %v9538_v7  ;;  %v7581_v18 = vrot.slane %v9538_v7, %v12545_v55 }
 0xc5d   : > { %v7470_v42 = vrot.slane %v7462_v20, %v12545_v55  ;;  %7904 = vmatprep.subr.bf16.mxu1 %v10847_v50  ;;  %v7646_v60 = vcombine.high %v9539_v11, %v9539_v11 }
 0xc5e   : > { %v7477_v53 = vrot.slane %v7463_v21, %v12545_v55  ;;  %v7588_v20 = vrot.slane %v7574_v15, %v12545_v55  ;;  %v7589_v57 = vcombine.high %v7581_v18, %v7581_v18  ;;  %v7597_v34 = vrot.slane %v7581_v18, %v12545_v55 }
 0xc5f   : > { %10165 = vmatpush3.bf16.msra.mxu0 %v10863_v9  ;;  %v7660_v43 = vrot.slane %v7646_v60, %v12545_v55 }
 0xc60   : > { %v7478_v56 = vcombine.low %v7470_v42, %v7477_v53  ;;  %7905 = vmatpush1.bf16.msra.mxu1 %v10845_v19  ;;  %v7653_v42 = vrot.slane %v9539_v11, %v12545_v55  ;;  %v7611_v45 = vrot.slane %v7589_v57, %v12545_v55  ;;  %v7604_v49 = vrot.slane %v7588_v20, %v12545_v55 }
 0xc61   : > { %7906 = vmatprep.subr.bf16.mxu1 %v10850_v35  ;;  %v7662_v44 = vcombine.high %v7660_v43, %v7660_v43  ;;  %v7676_v35 = vrot.slane %v7660_v43, %v12545_v55 }
 0xc62   : > { %7496 = vadd.xlane.f32.xlu0 %v7478_v56  ;;  %v7661_v47 = vcombine.high %v7653_v42, %v7653_v42  ;;  %v7669_v19 = vrot.slane %v7653_v42, %v12545_v55 }
 0xc63   : > { %v7692_v13 = vcombine.high %v7676_v35, %v7676_v35 }
 0xc64   : > { %7907 = vmatpush1.bf16.msra.mxu1 %v10848_v36  ;;  %v7683_v36 = vrot.slane %v7661_v47, %v12545_v55  ;;  %v7691_v17 = vcombine.high %v7669_v19, %v7669_v19 }
 0xc65   : > { %7908 = vmatprep.subr.bf16.mxu1 %v10853_v62  ;;  %v7690_v62 = vrot.slane %v7662_v44, %v12545_v55 }
 0xc66   : > { %7499 = vadd.xlane.f32.xlu0 %v7498_v31  ;;  %v7590_v31 = vcombine.high %v7588_v20, %v7588_v20  ;;  %v7693_v58 = vcombine.high %v7683_v36, %v7683_v36 }
 0xc67   : > { %v7694_v9 = vcombine.high %v7690_v62, %v7690_v62 }
 0xc68   : > { %7909 = vmatpush1.bf16.msra.mxu1 %v10851_v0  ;;  %v7618_v50 = vrot.slane %v7590_v31, %v12545_v55  ;;  %v7619_v0 = vcombine.high %v7597_v34, %v7597_v34 }
 0xc69   : > { %7910 = vmatprep.subr.bf16.mxu1 %v10856_v2  ;;  %v7620_v2 = vcombine.high %v7604_v49, %v7604_v49 }
 0xc6c   : > { %7911 = vmatpush1.bf16.msra.mxu1 %v10854_v8  ;;  %v7621_v8 = vcombine.high %v7611_v45, %v7611_v45 }
 0xc6d   : > { %7912 = vmatprep.subr.bf16.mxu1 %v10859_v4  ;;  %v7622_v4 = vcombine.high %v7618_v50, %v7618_v50 }
 0xc70   : > { %7913 = vmatpush1.bf16.msra.mxu1 %v10857_v3 }
 0xcef   : > { %v7497_v10 = vpop.xlane.xlu0 %7496 }
 0xcf0   : > { %v7501_v41 = vmul.f32 0.0078125, %v7497_v10 }
 0xcf2   : > { %v7503_v21 = vadd.f32 1e-06, %v7501_v41 }
 0xcf3   : > { %v7500_v53 = vpop.xlane.xlu0 %7499 }
 0xcf4   : > { %10912 = vrsqrt.f32 %v7503_v21  ;;  %v7502_v56 = vmul.f32 0.0078125, %v7500_v53 }
 0xcf6   : > { %v7504_v27 = vadd.f32 1e-06, %v7502_v56 }
 0xcf8   : > { %10914 = vrsqrt.f32 %v7504_v27 }
 0xcfe   : > { %v10913_v3 = vpop.eup %10912 }
 0xcff   : > { %v7512_v7 = vrot.slane %v10913_v3, %v12596_v23  ;;  %v7516_v11 = vrot.slane %v10913_v3, %v12598_v24  ;;  %v7520_v15 = vrot.slane %v10913_v3, %v12600_v25  ;;  %v7524_v60 = vrot.slane %v10913_v3, %v12602_v26 }
 0xd00   : > { %v7528_v10 = vrot.slane %v10913_v3, %v12604_v28  ;;  %v7532_v41 = vrot.slane %v10913_v3, %v12606_v29  ;;  %v7536_v18 = vrot.slane %v10913_v3, %v12608_v30  ;;  %v7540_v20 = vrot.slane %v10913_v3, %v13488_v51 }
 0xd01   : > { %v7559_v21 = vmul.f32 %v7512_v7, %v13045_v46  ;;  %v7560_v42 = vmul.f32 %v7516_v11, %v13048_v37  ;;  %v7561_v43 = vmul.f32 %v7520_v15, %v13051_v38  ;;  %v7562_v53 = vmul.f32 %v7524_v60, %v13054_v12 }
 0xd02   : > { %v10915_v56 = vpop.eup %10914  ;;  %v7563_v57 = vmul.f32 %v7528_v10, %v13057_v61  ;;  %v7564_v31 = vmul.f32 %v7532_v41, %v13060_v52  ;;  %v7565_v27 = vmul.f32 %v7536_v18, %v13063_v48  ;;  %v7566_v47 = vmul.f32 %v7540_v20, %v13066_v1 }
 0xd03   : > { %v7544_v44 = vrot.slane %v10915_v56, %v12596_v23  ;;  %v7548_v51 = vrot.slane %v10915_v56, %v12598_v24  ;;  %v7631_v46 = vmul.f32 %v7597_v34, %v7559_v21  ;;  %v7632_v3 = vmul.f32 %v7611_v45, %v7560_v42 }
 0xd04   : > { %v7633_v37 = vmul.f32 %v7619_v0, %v7561_v43  ;;  %v7634_v7 = vmul.f32 %v7621_v8, %v7562_v53  ;;  %v7635_v38 = vmul.f32 %v7604_v49, %v7563_v57  ;;  %v7636_v11 = vmul.f32 %v7618_v50, %v7564_v31  ;;  %v10864_v53 = vld [vmem:[%s11260_s2 + $0x50] sm:$0xff]   ;;  %v10866_v31 = vld [vmem:[%s11260_s2 + $0x58] sm:$0xff]  }
 0xd05   : > { %v7567_v12 = vmul.f32 %v7544_v44, %v13027_v16  ;;  %v7568_v61 = vmul.f32 %v7548_v51, %v13030_v22  ;;  %v7637_v15 = vmul.f32 %v7620_v2, %v7565_v27  ;;  %v7638_v52 = vmul.f32 %v7622_v4, %v7566_v47  ;;  %v10865_v57 = vld [vmem:[%s11260_s2 + $0x10] sm:$0xff]   ;;  %10166 = vmatprep.subr.bf16.mxu0 %v10864_v53  ;;  %v10867_v27 = vld [vmem:[%s11260_s2 + $0x18] sm:$0xff]   ;;  %v10868_v47 = vld [vmem:[%s11260_s2 + $0x60] sm:$0xff]  }
 0xd06   : > { %v7703_v60 = vadd.f32 %v7669_v19, %v7631_v46  ;;  %v7704_v48 = vadd.f32 %v7683_v36, %v7632_v3  ;;  %v7705_v10 = vadd.f32 %v7691_v17, %v7633_v37  ;;  %v7706_v1 = vadd.f32 %v7693_v58, %v7634_v7  ;;  %10167 = vmatpush3.bf16.msra.mxu0 %v10865_v57  ;;  %v10869_v44 = vld [vmem:[%s11260_s2 + $0x20] sm:$0xff]   ;;  %v10870_v51 = vld [vmem:[%s11260_s2 + $0x68] sm:$0xff]   ;;  %v10872_v3 = vld [vmem:[%s11260_s2 + $0x70] sm:$0xff]  }
 0xd07   : > { %v7639_v41 = vmul.f32 %v7597_v34, %v7567_v12  ;;  %v7640_v18 = vmul.f32 %v7611_v45, %v7568_v61  ;;  %v7707_v20 = vadd.f32 %v7676_v35, %v7635_v38  ;;  %v7708_v56 = vadd.f32 %v7690_v62, %v7636_v11  ;;  %10168 = vmatprep.subr.bf16.mxu0 %v10866_v31  ;;  %v10871_v46 = vld [vmem:[%s11260_s2 + $0x28] sm:$0xff]   ;;  %v10873_v37 = vld [vmem:[%s11260_s2 + $0x30] sm:$0xff]   ;;  %v10874_v7 = vld [vmem:[%s11260_s2 + $0x78] sm:$0xff]  }
 0xd08   : > { %v7709_v21 = vadd.f32 %v7692_v13, %v7637_v15  ;;  %v7710_v42 = vadd.f32 %v7694_v9, %v7638_v52  ;;  %v7723_v0 = vcombine.low %v7703_v60, %v7704_v48  ;;  %v7724_v8 = vcombine.low %v7705_v10, %v7706_v1  ;;  %v10875_v38 = vld [vmem:[%s11260_s2 + $0x38] sm:$0xff]   ;;  %v7806_v11 = vld [vmem:[%s11255_s26] sm:$0x3]  ;;  %s13491_s2 = scalar_lea.vmem %s13422_s12, %s11227_s4 }
 0xd09   : > { %v7711_v49 = vadd.f32 %v7669_v19, %v7639_v41  ;;  %v7712_v50 = vadd.f32 %v7683_v36, %v7640_v18  ;;  %v7725_v43 = vcombine.low %v7707_v20, %v7708_v56  ;;  %v7811_v12 = vrot.slane %v7806_v11, %v12596_v23  ;;  %v9556_v53 = vld [vmem:[%s13491_s2] ss:$0 sm:$0xff] }
 0xd0a   : > { %v7726_v16 = vcombine.low %v7709_v21, %v7710_v42  ;;  %v7733_v22 = vrot.slane %v7723_v0, %v12545_v55  ;;  %v7740_v2 = vrot.slane %v7724_v8, %v12545_v55  ;;  %10169 = vmatpush3.bf16.msra.mxu0 %v10867_v27  ;;  %v7815_v61 = vrot.slane %v7806_v11, %v12598_v24 }
 0xd0b   : > { %v7747_v4 = vrot.slane %v7725_v43, %v12545_v55  ;;  %v7772_v34 = vcombine.low %v7711_v49, %v7712_v50  ;;  %10170 = vmatprep.subr.bf16.mxu0 %v10868_v47 }
 0xd0c   : > { %v7754_v45 = vrot.slane %v7726_v16, %v12545_v55  ;;  %v7755_v35 = vcombine.low %v7733_v22, %v7740_v2 }
 0xd0d   : > { %v7779_v62 = vrot.slane %v7772_v34, %v12545_v55 }
 0xd0e   : > { %v7756_v19 = vcombine.low %v7747_v4, %v7754_v45  ;;  %v7763_v36 = vrot.slane %v7755_v35, %v12545_v55  ;;  %10171 = vmatpush3.bf16.msra.mxu0 %v10869_v44 }
 0xd0f   : > { %v7786_v13 = vrot.slane %v7779_v62, %v12545_v55  ;;  %10172 = vmatprep.subr.bf16.mxu0 %v10870_v51 }
 0xd10   : > { %v7770_v17 = vrot.slane %v7756_v19, %v12545_v55 }
 0xd12   : > { %v7771_v58 = vcombine.low %v7763_v36, %v7770_v17  ;;  %10173 = vmatpush3.bf16.msra.mxu0 %v10871_v46 }
 0xd13   : > { %10174 = vmatprep.subr.bf16.mxu0 %v10872_v3 }
 0xd14   : > { %v7789_v9 = vpack.c.bf16 %v7786_v13, %v7771_v58 }
 0xd16   : > { %7931 = vmatmul.mubr.bf16.vlgmr.msra.gmra.mrb[44].mxu1 %v7789_v9  ;;  %10175 = vmatpush3.bf16.msra.mxu0 %v10873_v37 }
 0xd17   : > { %10176 = vmatprep.subr.bf16.mxu0 %v10874_v7 }
 0xd1a   : > { %10177 = vmatpush3.bf16.msra.mxu0 %v10875_v38 }
 0xde9   : > { %v7932_v15 = vpop.f32.mrb[44].mxu1 }
 0xdea   : > { %v7933_v52 = vadd.f32 %v7932_v15, %v7811_v12  ;;  %v7934_v60 = vpop.f32.mrb[45].mxu1 }
 0xdeb   : > { %v7935_v48 = vadd.f32 %v7934_v60, %v7815_v61  ;;  %v7936_v10 = vpop.f32.mrb[46].mxu1 }
 0xdec   : > { %v7945_v1 = vmul.f32 0.70710677, %v7933_v52  ;;  %v7937_v41 = vadd.f32 %v7936_v10, %v7811_v12  ;;  %v7938_v18 = vpop.f32.mrb[47].mxu1  ;;  %v7941_v22 = vmul.f32 0.5, %v7933_v52 }
 0xded   : > { %v7946_v20 = vmul.f32 0.70710677, %v7935_v48  ;;  %v7939_v56 = vadd.f32 %v7938_v18, %v7815_v61  ;;  %v7942_v34 = vmul.f32 0.5, %v7935_v48 }
 0xdee   : > { %10916 = verf.f32 %v7945_v1  ;;  %v7947_v21 = vmul.f32 0.70710677, %v7937_v41  ;;  %v7943_v2 = vmul.f32 0.5, %v7937_v41 }
 0xdef   : > { %10918 = verf.f32 %v7946_v20  ;;  %v7948_v42 = vmul.f32 0.70710677, %v7939_v56  ;;  %v7944_v45 = vmul.f32 0.5, %v7939_v56 }
 0xdf0   : > { %10920 = verf.f32 %v7947_v21 }
 0xdf1   : > { %10922 = verf.f32 %v7948_v42 }
 0xdf8   : > { %v10917_v0 = vpop.eup %10916 }
 0xdf9   : > { %v10919_v8 = vpop.eup %10918  ;;  %v7953_v49 = vadd.f32 1.0, %v10917_v0 }
 0xdfa   : > { %v10921_v50 = vpop.eup %10920  ;;  %v7954_v43 = vadd.f32 1.0, %v10919_v8 }
 0xdfb   : > { %v10923_v16 = vpop.eup %10922  ;;  %v7955_v4 = vadd.f32 1.0, %v10921_v50  ;;  %v7957_v62 = vmul.f32 %v7953_v49, %v7941_v22 }
 0xdfc   : > { %v7956_v35 = vadd.f32 1.0, %v10923_v16  ;;  %v7958_v36 = vmul.f32 %v7954_v43, %v7942_v34 }
 0xdfd   : > { %v7959_v19 = vmul.f32 %v7955_v4, %v7943_v2 }
 0xdfe   : > { %v7960_v17 = vmul.f32 %v7956_v35, %v7944_v45 }
 0xdff   : > { %v7961_v13 = vpack.c.bf16 %v7959_v19, %v7957_v62 }
 0xe00   : > { %v7962_v58 = vpack.c.bf16 %v7960_v17, %v7958_v36 }
 0xe02   : > { %8130 = vmatprep.mubr.bf16.mxu0 %v7962_v58 }
 0xe03   : > { %8131 = vmatmul.mubr.bf16.vlgmr.msra.gmra.mrb[32].mxu0 %v7961_v13 }
 0xed6   : > { %v10178_v9 = vpop.f32.mrb[32].mxu0 }
 0xed7   : > { %v10179_v57 = vpop.f32.mrb[33].mxu0 }
 0xed8   : > { %v10180_v31 = vadd.f32 %v10179_v57, %v10178_v9  ;;  %v10181_v27 = vpop.f32.mrb[34].mxu0 }
 0xed9   : > { %v10182_v47 = vpop.f32.mrb[35].mxu0 }
 0xeda   : > { %v8133_v44 = vadd.f32 %v10180_v31, %v9556_v53  ;;  %v10183_v51 = vadd.f32 %v10182_v47, %v10181_v27 }
 0xedc   : > { %v8141_v46 = vcombine.high %v8133_v44, %v8133_v44  ;;  %v8148_v3 = vrot.slane %v8133_v44, %v12545_v55  ;;  %v8136_v37 = vadd.f32 %v10183_v51, %v9556_v53 }
 0xede   : > { %v8155_v7 = vrot.slane %v8141_v46, %v12545_v55  ;;  %v8156_v38 = vcombine.high %v8148_v3, %v8148_v3  ;;  %v8164_v11 = vrot.slane %v8148_v3, %v12545_v55  ;;  %v8196_v12 = vrot.slane %v8136_v37, %v12545_v55 }
 0xee0   : > { %v8157_v61 = vcombine.high %v8155_v7, %v8155_v7  ;;  %v8171_v15 = vrot.slane %v8155_v7, %v12545_v55  ;;  %v8178_v52 = vrot.slane %v8156_v38, %v12545_v55  ;;  %v8186_v60 = vcombine.high %v8164_v11, %v8164_v11  ;;  %8235 = sbr.rel (%p9573_p9) target bundleno = 3827 (0xef3), region = 108 }
 0xee1   : > { %v13190_v48 = vadd.f32 %v8164_v11, %v12982_v39  ;;  %v8197_v10 = vcombine.high %v8196_v12, %v8196_v12  ;;  %v8204_v1 = vrot.slane %v8196_v12, %v12545_v55 }
 0xee2   : > { %v8185_v41 = vrot.slane %v8157_v61, %v12545_v55  ;;  %v8187_v18 = vcombine.high %v8171_v15, %v8171_v15  ;;  %v8188_v20 = vcombine.high %v8178_v52, %v8178_v52  ;;  %v13195_v56 = vadd.f32 %v8178_v52, %v12984_v40 }
 0xee3   : > { %v13198_v21 = vadd.f32 %v8186_v60, %v12986_v14  ;;  %v13201_v42 = vadd.f32 %v8171_v15, %v12992_v54  ;;  %v8211_v0 = vrot.slane %v8197_v10, %v12545_v55  ;;  %v13205_v39 = vadd.f32 %v8204_v1, %v13007_v59 }
 0xee4   : > { %v8189_v8 = vcombine.high %v8185_v41, %v8185_v41  ;;  %v13208_v49 = vadd.f32 %v8188_v20, %v12990_v32  ;;  %v13211_v50 = vadd.f32 %v8185_v41, %v12994_v6  ;;  %v13214_v40 = vadd.f32 %v8187_v18, %v12999_v33 }
 0xee5   : > { %v13217_v14 = vadd.f32 %v8211_v0, %v13009_v5  ;;  %v8246_v59 = vcombine.low (!%p9573_p9), %v13190_v48, %v13195_v56  ;;  %v8268_v6 = vrot.slane (!%p9573_p9), %v13201_v42, %v12545_v55 }
 0xee6   : > { %v13220_v54 = vadd.f32 %v8189_v8, %v13001_v63  ;;  %v8247_v32 = vcombine.low (!%p9573_p9), %v13198_v21, %v13208_v49  ;;  %v8285_v33 = vcombine.low (!%p9573_p9), %v13211_v50, %v13214_v40 }
 0xee7   : > { %v8307_v63 = vrot.slane %v13217_v14, %v12545_v55  ;;  %v8254_v43 = vrot.slane %v8246_v59, %v12545_v55  ;;  %v8283_v34 = vrot.slane %v8268_v6, %v12545_v55 }
 0xee8   : > { %v8286_v5 = vcombine.low %v13220_v54, %v13205_v39  ;;  %v8261_v16 = vrot.slane %v8247_v32, %v12545_v55  ;;  %v8293_v22 = vrot.slane %v8285_v33, %v12545_v55 }
 0xee9   : > { %v8322_v35 = vrot.slane %v8307_v63, %v12545_v55 }
 0xeea   : > { %v8300_v2 = vrot.slane %v8286_v5, %v12545_v55  ;;  %v8269_v4 = vcombine.low %v8254_v43, %v8261_v16 }
 0xeec   : > { %v8308_v45 = vcombine.low %v8293_v22, %v8300_v2  ;;  %v8276_v62 = vrot.slane %v8269_v4, %v12545_v55 }
 0xeee   : > { %v8315_v19 = vrot.slane %v8308_v45, %v12545_v55  ;;  %v8284_v36 = vcombine.low %v8276_v62, %v8283_v34 }
 0xef0   : > { %v8323_v17 = vcombine.low %v8315_v19, %v8322_v35  ;;  %8326 = vst [vmem:[%s13492_s9] sm:$0x1f] %v8284_v36 }
 0xef2   : > { %8327 = vst [vmem:[%s13492_s9 + $0x8] sm:$0x1f] %v8323_v17 }
 0xef3 PF: > { %p9574_p5 = scmp.ne.s32.totalorder %s11000_s21, 1 }
 0xef4   : > { %v8344_v13 = vcombine.low (!%p9574_p5), %v13190_v48, %v13195_v56  ;;  %v8345_v58 = vcombine.low (!%p9574_p5), %v13198_v21, %v13208_v49  ;;  %v8346_v9 = vcombine.low (!%p9574_p5), %v13201_v42, %v13211_v50  ;;  %v8347_v53 = vcombine.low (!%p9574_p5), %v13214_v40, %v13220_v54  ;;  %v13493_v8 = vld [vmem:[#allocation11_spill] sm:$0xff] (!%p9574_p5)  ;;  %s13494_s1 = sld [smem:[#allocation22_spill]] (!%p9574_p5)  ;;  %s13495_s29 = sld [smem:[#allocation23_spill]] (!%p9574_p5) }
 0xef5   : > { %8331 = sbr.rel (%p9574_p5) target bundleno = 4181 (0x1055), region = 112  ;;  %v8393_v57 = vcombine.low (!%p9574_p5), %v13205_v39, %v13217_v14  ;;  %s13496_s25 = sld [smem:[#allocation24_spill]] (!%p9574_p5) }
 0xef6   : > { %v8354_v31 = vrot.slane (!%p9574_p5), %v8344_v13, %v12545_v55  ;;  %v8361_v27 = vrot.slane (!%p9574_p5), %v8345_v58, %v12545_v55  ;;  %v8368_v47 = vrot.slane (!%p9574_p5), %v8346_v9, %v12545_v55  ;;  %v8375_v44 = vrot.slane (!%p9574_p5), %v8347_v53, %v12545_v55 }
 0xef7   : > { %v8400_v51 = vrot.slane (!%p9574_p5), %v8393_v57, %v12545_v55 }
 0xef8   : > { %v8376_v46 = vcombine.low (!%p9574_p5), %v8354_v31, %v8361_v27  ;;  %v8377_v3 = vcombine.low (!%p9574_p5), %v8368_v47, %v8375_v44 }
 0xef9   : > { %v8407_v38 = vrot.slane (!%p9574_p5), %v8400_v51, %v12545_v55 }
 0xefa   : > { %v8384_v37 = vrot.slane (!%p9574_p5), %v8376_v46, %v12545_v55  ;;  %v8391_v7 = vrot.slane (!%p9574_p5), %v8377_v3, %v12545_v55 }
 0xefb   : > { %v8412_v12 = vsel (!%p9574_p5), %vm5341_vm0, %v8407_v38, 0.0  ;;  %v9576_v38 = vld [vmem:[%s13495_s29] ss:$0 sm:$0xff] (!%p9574_p5) }
 0xefc   : > { %v8392_v11 = vcombine.low %v8384_v37, %v8391_v7  ;;  %v9575_v7 = vld [vmem:[%s13494_s1] ss:$0 sm:$0xff] }
 0xefe   : > { %8410 = vadd.xlane.f32.xlu0 %v8392_v11  ;;  %v8643_v11 = vcombine.high %v9575_v7, %v9575_v7 }
 0xf02   : > { %8413 = vadd.xlane.f32.xlu0 %v8412_v12  ;;  %v8715_v12 = vcombine.high %v9576_v38, %v9576_v38 }
 0xf8b   : > { %v8411_v61 = vpop.xlane.xlu0 %8410 }
 0xf8c   : > { %v8415_v15 = vmul.f32 0.0078125, %v8411_v61 }
 0xf8e   : > { %v8422_v52 = vrot.slane %v8415_v15, %v12596_v23  ;;  %v8426_v60 = vrot.slane %v8415_v15, %v12598_v24  ;;  %v8430_v10 = vrot.slane %v8415_v15, %v12600_v25  ;;  %v8434_v1 = vrot.slane %v8415_v15, %v12602_v26 }
 0xf8f   : > { %v8414_v41 = vpop.xlane.xlu0 %8413  ;;  %v8438_v18 = vrot.slane %v8415_v15, %v12604_v28  ;;  %v8442_v20 = vrot.slane %v8415_v15, %v12606_v29  ;;  %v8446_v0 = vrot.slane %v8415_v15, %v12608_v30  ;;  %v8450_v59 = vrot.slane %v8415_v15, %v13493_v8 }
 0xf90   : > { %v8416_v32 = vmul.f32 0.0078125, %v8414_v41  ;;  %v13278_v6 = vsub.f32 %v13190_v48, %v8422_v52  ;;  %v13281_v33 = vsub.f32 %v13195_v56, %v8426_v60  ;;  %v13284_v5 = vsub.f32 %v13198_v21, %v8430_v10 }
 0xf91   : > { %v13287_v63 = vsub.f32 %v13208_v49, %v8434_v1  ;;  %v13290_v43 = vsub.f32 %v13201_v42, %v8438_v18  ;;  %v13293_v16 = vsub.f32 %v13211_v50, %v8442_v20  ;;  %v13296_v22 = vsub.f32 %v13214_v40, %v8446_v0 }
 0xf92   : > { %v8454_v48 = vrot.slane %v8416_v32, %v12596_v23  ;;  %v8458_v56 = vrot.slane %v8416_v32, %v12598_v24  ;;  %v13301_v2 = vsub.f32 %v13220_v54, %v8450_v59  ;;  %v8479_v21 = vmul.f32 %v13278_v6, %v13278_v6 }
 0xf93   : > { %v8480_v42 = vmul.f32 %v13281_v33, %v13281_v33  ;;  %v8481_v49 = vmul.f32 %v13284_v5, %v13284_v5  ;;  %v8482_v50 = vmul.f32 %v13287_v63, %v13287_v63  ;;  %v8483_v40 = vmul.f32 %v13290_v43, %v13290_v43 }
 0xf94   : > { %v13314_v4 = vsub.f32 %v13205_v39, %v8454_v48  ;;  %v13317_v54 = vsub.f32 %v13217_v14, %v8458_v56  ;;  %v8484_v34 = vmul.f32 %v13293_v16, %v13293_v16  ;;  %v8485_v45 = vmul.f32 %v13296_v22, %v13296_v22 }
 0xf95   : > { %v8486_v35 = vmul.f32 %v13301_v2, %v13301_v2  ;;  %v8499_v62 = vcombine.low %v8479_v21, %v8480_v42  ;;  %v8500_v19 = vcombine.low %v8481_v49, %v8482_v50  ;;  %v8650_v52 = vrot.slane %v9575_v7, %v12545_v55 }
 0xf96   : > { %v8501_v36 = vcombine.low %v8483_v40, %v8484_v34  ;;  %v8487_v17 = vmul.f32 %v13314_v4, %v13314_v4  ;;  %v8488_v39 = vmul.f32 %v13317_v54, %v13317_v54  ;;  %v8657_v60 = vrot.slane %v8643_v11, %v12545_v55 }
 0xf97   : > { %v8502_v14 = vcombine.low %v8485_v45, %v8486_v35  ;;  %v8509_v13 = vrot.slane %v8499_v62, %v12545_v55  ;;  %v8516_v58 = vrot.slane %v8500_v19, %v12545_v55  ;;  %v8722_v1 = vrot.slane %v9576_v38, %v12545_v55 }
 0xf98   : > { %v8523_v9 = vrot.slane %v8501_v36, %v12545_v55  ;;  %v8548_v53 = vcombine.low %v8487_v17, %v8488_v39  ;;  %v8729_v41 = vrot.slane %v8715_v12, %v12545_v55  ;;  %v8658_v0 = vcombine.high %v8650_v52, %v8650_v52 }
 0xf99   : > { %v8530_v57 = vrot.slane %v8502_v14, %v12545_v55  ;;  %v8531_v31 = vcombine.low %v8509_v13, %v8516_v58  ;;  %v8659_v59 = vcombine.high %v8657_v60, %v8657_v60  ;;  %v8730_v48 = vcombine.high %v8722_v1, %v8722_v1 }
 0xf9a   : > { %v8555_v27 = vrot.slane %v8548_v53, %v12545_v55  ;;  %v8731_v56 = vcombine.high %v8729_v41, %v8729_v41  ;;  %v8666_v21 = vrot.slane %v8650_v52, %v12545_v55  ;;  %v8673_v42 = vrot.slane %v8657_v60, %v12545_v55 }
 0xf9b   : > { %v8532_v47 = vcombine.low %v8523_v9, %v8530_v57  ;;  %v8539_v44 = vrot.slane %v8531_v31, %v12545_v55  ;;  %v8680_v49 = vrot.slane %v8658_v0, %v12545_v55  ;;  %v8687_v50 = vrot.slane %v8659_v59, %v12545_v55 }
 0xf9c   : > { %v8562_v46 = vrot.slane %v8555_v27, %v12545_v55  ;;  %v8738_v40 = vrot.slane %v8722_v1, %v12545_v55  ;;  %v8745_v34 = vrot.slane %v8729_v41, %v12545_v55  ;;  %v8752_v45 = vrot.slane %v8730_v48, %v12545_v55 }
 0xf9d   : > { %v8546_v51 = vrot.slane %v8532_v47, %v12545_v55  ;;  %v8759_v35 = vrot.slane %v8731_v56, %v12545_v55  ;;  %v8688_v62 = vcombine.high %v8666_v21, %v8666_v21  ;;  %v8689_v19 = vcombine.high %v8673_v42, %v8673_v42 }
 0xf9e   : > { %v8567_v37 = vsel %vm5341_vm0, %v8562_v46, 0.0  ;;  %v8690_v36 = vcombine.high %v8680_v49, %v8680_v49  ;;  %v8691_v17 = vcombine.high %v8687_v50, %v8687_v50  ;;  %v8760_v14 = vcombine.high %v8738_v40, %v8738_v40 }
 0xf9f   : > { %v8547_v3 = vcombine.low %v8539_v44, %v8546_v51  ;;  %v8761_v13 = vcombine.high %v8745_v34, %v8745_v34  ;;  %v8762_v58 = vcombine.high %v8752_v45, %v8752_v45  ;;  %v8763_v9 = vcombine.high %v8759_v35, %v8759_v35 }
 0xfa1   : > { %8565 = vadd.xlane.f32.xlu1 %v8547_v3 }
 0xfa5   : > { %8568 = vadd.xlane.f32.xlu1 %v8567_v37 }
0x102e   : > { %v8566_v61 = vpop.xlane.xlu1 %8565 }
0x102f   : > { %v8570_v15 = vmul.f32 0.0078125, %v8566_v61 }
0x1031   : > { %v8572_v10 = vadd.f32 1e-06, %v8570_v15 }
0x1032   : > { %v8569_v18 = vpop.xlane.xlu1 %8568 }
0x1033   : > { %10924 = vrsqrt.f32 %v8572_v10  ;;  %v8571_v20 = vmul.f32 0.0078125, %v8569_v18 }
0x1035   : > { %v8573_v32 = vadd.f32 1e-06, %v8571_v20 }
0x1037   : > { %10926 = vrsqrt.f32 %v8573_v32 }
0x103d   : > { %v10925_v39 = vpop.eup %10924 }
0x103e   : > { %v8581_v53 = vrot.slane %v10925_v39, %v12596_v23  ;;  %v8585_v57 = vrot.slane %v10925_v39, %v12598_v24  ;;  %v8589_v31 = vrot.slane %v10925_v39, %v12600_v25  ;;  %v8593_v27 = vrot.slane %v10925_v39, %v12602_v26 }
0x103f   : > { %v8597_v47 = vrot.slane %v10925_v39, %v12604_v28  ;;  %v8601_v44 = vrot.slane %v10925_v39, %v12606_v29  ;;  %v8605_v51 = vrot.slane %v10925_v39, %v12608_v30  ;;  %v8609_v46 = vrot.slane %v10925_v39, %v13493_v8 }
0x1040   : > { %v8628_v3 = vmul.f32 %v8581_v53, %v13278_v6  ;;  %v8629_v37 = vmul.f32 %v8585_v57, %v13281_v33  ;;  %v8630_v7 = vmul.f32 %v8589_v31, %v13284_v5  ;;  %v8631_v38 = vmul.f32 %v8593_v27, %v13287_v63 }
0x1041   : > { %v10927_v11 = vpop.eup %10926  ;;  %v8632_v25 = vmul.f32 %v8597_v47, %v13290_v43  ;;  %v8633_v26 = vmul.f32 %v8601_v44, %v13293_v16  ;;  %v8634_v28 = vmul.f32 %v8605_v51, %v13296_v22  ;;  %v8635_v29 = vmul.f32 %v8609_v46, %v13301_v2 }
0x1042   : > { %v8613_v30 = vrot.slane %v10927_v11, %v12596_v23  ;;  %v8617_v8 = vrot.slane %v10927_v11, %v12598_v24  ;;  %v8700_v6 = vmul.f32 %v8666_v21, %v8628_v3  ;;  %v8701_v12 = vmul.f32 %v8680_v49, %v8629_v37 }
0x1043   : > { %v8702_v33 = vmul.f32 %v8688_v62, %v8630_v7  ;;  %v8703_v61 = vmul.f32 %v8690_v36, %v8631_v38  ;;  %v8704_v5 = vmul.f32 %v8673_v42, %v8632_v25  ;;  %v8705_v15 = vmul.f32 %v8687_v50, %v8633_v26 }
0x1044   : > { %v8636_v63 = vmul.f32 %v8613_v30, %v13314_v4  ;;  %v8637_v43 = vmul.f32 %v8617_v8, %v13317_v54  ;;  %v8706_v52 = vmul.f32 %v8689_v19, %v8634_v28  ;;  %v8707_v16 = vmul.f32 %v8691_v17, %v8635_v29 }
0x1045   : > { %v8772_v60 = vadd.f32 %v8738_v40, %v8700_v6  ;;  %v8773_v22 = vadd.f32 %v8752_v45, %v8701_v12  ;;  %v8774_v10 = vadd.f32 %v8760_v14, %v8702_v33  ;;  %v8775_v2 = vadd.f32 %v8762_v58, %v8703_v61 }
0x1046   : > { %v8708_v1 = vmul.f32 %v8666_v21, %v8636_v63  ;;  %v8709_v23 = vmul.f32 %v8680_v49, %v8637_v43  ;;  %v8776_v41 = vadd.f32 %v8745_v34, %v8704_v5  ;;  %v8777_v24 = vadd.f32 %v8759_v35, %v8705_v15 }
0x1047   : > { %v8778_v18 = vadd.f32 %v8761_v13, %v8706_v52  ;;  %v8792_v20 = vcombine.low %v8772_v60, %v8773_v22  ;;  %v8793_v0 = vcombine.low %v8774_v10, %v8775_v2  ;;  %v8779_v59 = vadd.f32 %v8763_v9, %v8707_v16 }
0x1048   : > { %v8780_v32 = vadd.f32 %v8738_v40, %v8708_v1  ;;  %v8781_v48 = vadd.f32 %v8752_v45, %v8709_v23  ;;  %v8814_v56 = vrot.slane %v8776_v41, %v12545_v55 }
0x1049   : > { %v8800_v4 = vrot.slane %v8792_v20, %v12545_v55  ;;  %v8807_v54 = vrot.slane %v8793_v0, %v12545_v55  ;;  %v8831_v42 = vcombine.low %v8777_v24, %v8778_v18 }
0x104a   : > { %v8832_v50 = vcombine.low %v8779_v59, %v8780_v32  ;;  %v8853_v34 = vrot.slane %v8781_v48, %v12545_v55  ;;  %v8829_v40 = vrot.slane %v8814_v56, %v12545_v55 }
0x104b   : > { %v8815_v62 = vcombine.low %v8800_v4, %v8807_v54  ;;  %v8839_v21 = vrot.slane %v8831_v42, %v12545_v55 }
0x104c   : > { %v8846_v49 = vrot.slane %v8832_v50, %v12545_v55  ;;  %v8868_v17 = vrot.slane %v8853_v34, %v12545_v55 }
0x104d   : > { %v8822_v35 = vrot.slane %v8815_v62, %v12545_v55 }
0x104e   : > { %v8854_v45 = vcombine.low %v8839_v21, %v8846_v49 }
0x104f   : > { %v8830_v19 = vcombine.low %v8822_v35, %v8829_v40 }
0x1050   : > { %v8861_v36 = vrot.slane %v8854_v45, %v12545_v55 }
0x1051   : > { %8872 = vst [vmem:[%s13496_s25] sm:$0x1f] %v8830_v19 }
0x1052   : > { %v8869_v39 = vcombine.low %v8861_v36, %v8868_v17 }
0x1054   : > { %8873 = vst [vmem:[%s13496_s25 + $0x8] sm:$0x1f] %v8869_v39 }
0x1055 PF: > { %s13497_s7 = sld [smem:[#allocation8_spill]]  ;;  %s13498_s0 = sld [smem:[#allocation5_spill]] }
0x1056   : > { %s13499_s30 = sld [smem:[#allocation6_spill]]  ;;  %s13500_s20 = sld [smem:[#allocation10_spill]] }
0x1057   : > { %s13501_s21 = sld [smem:[#allocation7_spill]]  ;;  %s13502_s1 = sld [smem:[#allocation9_spill]] }
0x105b   : > { %s32_s22 = sadd.s32 1, %s13497_s7  }
0x105c   : > { %p29_p6 = scmp.ge.s32.totalorder %s32_s22, 4  }
0x105e   :  { %31 = sbr.rel (!%p29_p6) target bundleno = 18 (0x12), region = 186 }
0x1065   :  { %8896 = vsyncpa [#allocation3], 1 }
0x1066   :  { %8898 = vsyncpa [#allocation3 + $0x1], 1 }

</bundles_post_ra>
